<compile_context>
chip_gen: v7x
topology: tpu7x:2x2x1
jax: 0.10.0
libtpu: 0.0.40
codegen_flags: <defaults>
</compile_context>

<pallas_src>
import jax
import jax.numpy as jnp
from jax import lax
from jax.experimental import pallas as pl
from jax.experimental.pallas import tpu as pltpu

# Set to jnp.bfloat16 on v6e/v7x for full-rate MXU and halved weight/input DMA;
# f32 kept as default so the rtol=1e-4 check vs. the f32 reference holds.
WEIGHT_DTYPE = jnp.float32

# Fully unroll the in-kernel time loop up to this many steps.
_UNROLL_T = 16


# ----------------------------------------------------------------------------
# Pallas kernel
# ----------------------------------------------------------------------------
def make_graphrnn_kernel(num_layers, T, B, M, E, H):
    """Single invocation: prologue (embedding + layer-0 gate slab) ->
    time loop (GRU hidden chain only) -> epilogue (MLP + length mask)."""
    H2, H3, H4 = 2 * H, 3 * H, 4 * H

    def kernel(len_ref, x_ref, we_ref, be_ref,
               wi0_ref, bx0_ref, wh0_ref, bhn0_ref, *rest):
        n_fused = 2 * (num_layers - 1)
        fused_refs = rest[:n_fused]
        wm1_ref, bm1_ref, wm2_ref, bm2_ref = rest[n_fused:n_fused + 4]
        o_ref = rest[n_fused + 4]
        h_ref, gx0_ref, hs_ref = rest[n_fused + 5:]

        wdt = we_ref.dtype

        # ------------- prologue: everything hoistable out of the loop -------
        # Embedding Linear+ReLU over ALL timesteps: one (T*B, M) @ (M, E).
        x_flat = x_ref[...].reshape(T * B, M).astype(wdt)
        emb = jnp.maximum(
            jnp.dot(x_flat, we_ref[...], preferred_element_type=jnp.float32)
            + be_ref[...], 0.0)                                   # (T*B, E)

        # Layer-0 input-gate contributions for ALL timesteps (gates [r|z|n]),
        # so only the hidden matmul remains in the recurrence for layer 0.
        gx0 = jnp.dot(emb.astype(wdt), wi0_ref[...],
                      preferred_element_type=jnp.float32) + bx0_ref[...]
        gx0_ref[...] = gx0.reshape(T, B, H3)

        # Zero initial hidden state (self.hidden is None -> zeros).
        h_ref[...] = jnp.zeros_like(h_ref)

        # Loop-invariant bias broadcasts (broadcast_in_dim is not CSE'd).
        bhn0_b = jnp.broadcast_to(bhn0_ref[...], (B, H))
        fused_bias = [jnp.broadcast_to(fused_refs[2 * i + 1][...], (B, H4))
                      for i in range(num_layers - 1)]

        # ------------- recurrence: only the GRU hidden chain ----------------
        def step(t):
            # layer 0: gx precomputed; one (B,H) @ (H,3H) matmul.
            h_prev = h_ref[0]
            gx = gx0_ref[t]                                       # (B, 3H)
            gh = jnp.dot(h_prev.astype(wdt), wh0_ref[...],
                         preferred_element_type=jnp.float32)      # (B, 3H)
            r = jax.nn.sigmoid(gx[:, :H] + gh[:, :H])
            z = jax.nn.sigmoid(gx[:, H:H2] + gh[:, H:H2])
            n = jnp.tanh(gx[:, H2:] + r * (gh[:, H2:] + bhn0_b))
            h_new = (1.0 - z) * n + z * h_prev
            h_ref[0] = h_new
            inp = h_new

            # layers >= 1: one fused [x|h] (B,2H) @ (2H,4H) matmul per layer.
            for layer in range(1, num_layers):
                wf_ref = fused_refs[2 * (layer - 1)]
                h_prev = h_ref[layer]
                xh = jnp.concatenate([inp, h_prev], axis=-1).astype(wdt)
                g = jnp.dot(xh, wf_ref[...],
                            preferred_element_type=jnp.float32)
                g = g + fused_bias[layer - 1]                     # (B, 4H)
                r = jax.nn.sigmoid(g[:, :H])
                z = jax.nn.sigmoid(g[:, H:H2])
                n = jnp.tanh(g[:, H2:H3] + r * g[:, H3:])
                h_new = (1.0 - z) * n + z * h_prev
                h_ref[layer] = h_new
                inp = h_new

            hs_ref[t] = inp                                       # top-layer hidden

        if T <= _UNROLL_T:
            for t in range(T):                                    # full unroll
                step(t)
        else:
            @pl.loop(0, T)
            def _(t):
                step(t)

        # ------------- epilogue: adjacency MLP + length mask ----------------
        hs = hs_ref[...].reshape(T * B, H).astype(wdt)
        y = jnp.maximum(
            jnp.dot(hs, wm1_ref[...], preferred_element_type=jnp.float32)
            + bm1_ref[...], 0.0)                                  # (T*B, O)
        y = jax.nn.sigmoid(
            jnp.dot(y.astype(wdt), wm2_ref[...],
                    preferred_element_type=jnp.float32) + bm2_ref[...])
        y = y.reshape(T, B, M)

        # mask_out_bits_after_length: zero outputs at t >= length[b].
        t_iota = lax.broadcasted_iota(jnp.int32, (T, B, 1), 0)
        mask = t_iota < len_ref[...][None, :, :]                  # (T, B, 1)
        o_ref[...] = jnp.where(mask, y, 0.0)

    return kernel


# ----------------------------------------------------------------------------
# Weight packing (wrapper side)
# ----------------------------------------------------------------------------
def _pack_layer0(lp, wdt):
    """Layer 0: gates [r|z|n]; r/z hidden biases pre-added into bx (they sit
    outside the r-multiplication); bhn kept separate for n = tanh(nx+r*(nh+bhn))."""
    wi = jnp.concatenate([lp["wir"], lp["wiz"], lp["win"]], axis=1).astype(wdt)
    bx = jnp.concatenate([lp["bir"] + lp["bhr"], lp["biz"] + lp["bhz"],
                          lp["bin"]], axis=1).astype(jnp.float32)
    wh = jnp.concatenate([lp["whr"], lp["whz"], lp["whn"]], axis=1).astype(wdt)
    bhn = lp["bhn"].astype(jnp.float32)
    return wi, bx, wh, bhn


def _pack_fused_layer(lp, wdt):
    """Layers >= 1: single fused weight mapping [x|h] -> [r | z | n_x | n_h],
    with zero blocks so the GRU n-gate pieces stay separable after one matmul."""
    H = lp["whr"].shape[0]
    zeros = jnp.zeros((H, H), jnp.float32)
    top = jnp.concatenate([lp["wir"], lp["wiz"], lp["win"], zeros], axis=1)
    bot = jnp.concatenate([lp["whr"], lp["whz"], zeros, lp["whn"]], axis=1)
    wf = jnp.concatenate([top, bot], axis=0).astype(wdt)           # (2H, 4H)
    bf = jnp.concatenate([lp["bir"] + lp["bhr"], lp["biz"] + lp["bhz"],
                          lp["bin"], lp["bhn"]], axis=1).astype(jnp.float32)
    return wf, bf


def _padded_vmem_bytes(shape, dtype):
    """Conservative VMEM footprint of one resident array ((8,128)-tile pad)."""
    shape = tuple(int(s) for s in shape)
    if len(shape) == 0:
        shape = (1, 1)
    elif len(shape) == 1:
        shape = (1, shape[0])
    itemsize = jnp.dtype(dtype).itemsize
    sub = max(1, 32 // itemsize)             # 8 for f32/int32, 16 for bf16
    lead = 1
    for s in shape[:-2]:
        lead *= s
    rows = -(-shape[-2] // sub) * sub
    cols = -(-shape[-1] // 128) * 128
    return lead * rows * cols * itemsize


# ----------------------------------------------------------------------------
# Wrapper
# ----------------------------------------------------------------------------
def graphrnn_s_forward(params, input_sequences, input_length):
    """
    params: dict from init_params (Linear/GRU weights stored (in, out)).
    input_sequences: (B, T, M) float32
    input_length:    (B,) int32
    returns (B, T, M) float32, zeroed for t >= input_length[b].
    (Truncation to max(input_length) -- the pad_packed_sequence behaviour --
     is done by the caller, since the result shape is data dependent.)
    """
    B, T, M = input_sequences.shape
    gru_layers = params["gru"]
    L = len(gru_layers)
    H = gru_layers[0]["whr"].shape[0]
    E = params["we"].shape[1]
    wdt = WEIGHT_DTYPE

    # Pad batch to the sublane multiple of the matmul dtype; padded rows have
    # length 0 and are masked to zero.
    sub = 8 if jnp.dtype(wdt).itemsize == 4 else 16
    B_pad = max(sub, ((B + sub - 1) // sub) * sub)
    x = jnp.transpose(input_sequences, (1, 0, 2)).astype(wdt)     # (T, B, M)
    x = jnp.pad(x, ((0, 0), (0, B_pad - B), (0, 0)))
    lengths = jnp.zeros((B_pad, 1), jnp.int32).at[:B, 0].set(
        input_length.astype(jnp.int32))

    flat_inputs = [lengths, x,
                   params["we"].astype(wdt), params["be"].astype(jnp.float32)]
    flat_inputs.extend(_pack_layer0(gru_layers[0], wdt))
    for lp in gru_layers[1:]:
        flat_inputs.extend(_pack_fused_layer(lp, wdt))
    flat_inputs.extend([params["wm1"].astype(wdt),
                        params["bm1"].astype(jnp.float32),
                        params["wm2"].astype(wdt),
                        params["bm2"].astype(jnp.float32)])

    scratch_shapes = [
        pltpu.VMEM((L, B_pad, H), jnp.float32),       # carried GRU hidden state
        pltpu.VMEM((T, B_pad, 3 * H), jnp.float32),   # hoisted layer-0 gate slab
        pltpu.VMEM((T, B_pad, H), jnp.float32),       # top-layer hidden per step
    ]

    # Explicit scoped-VMEM budget (everything is resident; no pipeline bufs).
    need = sum(_padded_vmem_bytes(a.shape, a.dtype) for a in flat_inputs)
    need += _padded_vmem_bytes((T, B_pad, M), jnp.float32)        # output
    need += _padded_vmem_bytes((L, B_pad, H), jnp.float32)
    need += _padded_vmem_bytes((T, B_pad, 3 * H), jnp.float32)
    need += _padded_vmem_bytes((T, B_pad, H), jnp.float32)
    vmem_limit = int(min(64 * 2**20, max(16 * 2**20, 2 * need + (2 << 20))))

    vmem_spec = pl.BlockSpec(memory_space=pltpu.MemorySpace.VMEM)
    out_tbm = pl.pallas_call(
        make_graphrnn_kernel(L, T, B_pad, M, E, H),
        out_shape=jax.ShapeDtypeStruct((T, B_pad, M), jnp.float32),
        in_specs=[vmem_spec] * len(flat_inputs),
        out_specs=vmem_spec,
        scratch_shapes=scratch_shapes,
        compiler_params=pltpu.CompilerParams(vmem_limit_bytes=vmem_limit),
    )(*flat_inputs)

    return jnp.transpose(out_tbm, (1, 0, 2))[:B].astype(jnp.float32)


# ----------------------------------------------------------------------------
# Deterministic parameter init (synthetic; shapes follow the nn.Module __init__)
# ----------------------------------------------------------------------------
def init_params(key, *, adjacency_size, adjacency_embedding_size, hidden_size,
                num_layers, output_embedding_size):
    M, E, H, O = adjacency_size, adjacency_embedding_size, hidden_size, output_embedding_size
    keys = iter(jax.random.split(key, 256))

    def nk():
        return next(keys)

    def lin(fan_in, fan_out, scale=None):
        s = scale if scale is not None else 1.0 / jnp.sqrt(fan_in)
        w = jax.random.normal(nk(), (fan_in, fan_out), jnp.float32) * s
        b = jax.random.normal(nk(), (1, fan_out), jnp.float32) * 0.05
        return w, b

    params = {}
    params["we"], params["be"] = lin(M, E)          # embedding Linear(M, E)

    gru = []
    for layer in range(num_layers):
        in_size = E if layer == 0 else H
        lp = {}
        for name, fi, fo in [("wir", in_size, H), ("wiz", in_size, H), ("win", in_size, H),
                             ("whr", H, H), ("whz", H, H), ("whn", H, H)]:
            lp[name] = jax.random.normal(nk(), (fi, fo), jnp.float32) / jnp.sqrt(fi)
        for name in ["bir", "biz", "bin", "bhr", "bhz", "bhn"]:
            lp[name] = jax.random.normal(nk(), (1, H), jnp.float32) * 0.05
        gru.append(lp)
    params["gru"] = gru

    params["wm1"], params["bm1"] = lin(H, O)        # Linear(H, O)
    params["wm2"], params["bm2"] = lin(O, M)        # Linear(O, M)
    return params


# ----------------------------------------------------------------------------
# Pure-JAX reference (for correctness check)
# ----------------------------------------------------------------------------
def reference_forward(params, x, lengths):
    B, T, M = x.shape
    gru = params["gru"]
    L = len(gru)
    H = gru[0]["whr"].shape[0]

    emb = jnp.maximum(x @ params["we"] + params["be"], 0.0)      # (B, T, E)
    h0 = jnp.zeros((L, B, H), jnp.float32)

    def step(h, xt):
        inp = xt
        new_h = []
        for layer in range(L):
            lp = gru[layer]
            hp = h[layer]
            r = jax.nn.sigmoid(inp @ lp["wir"] + lp["bir"] + hp @ lp["whr"] + lp["bhr"])
            z = jax.nn.sigmoid(inp @ lp["wiz"] + lp["biz"] + hp @ lp["whz"] + lp["bhz"])
            n = jnp.tanh(inp @ lp["win"] + lp["bin"] + r * (hp @ lp["whn"] + lp["bhn"]))
            hn = (1.0 - z) * n + z * hp
            new_h.append(hn)
            inp = hn
        return jnp.stack(new_h), inp

    _, ys = jax.lax.scan(step, h0, jnp.swapaxes(emb, 0, 1))
    ys = jnp.swapaxes(ys, 0, 1)                                  # (B, T, H)

    y = jnp.maximum(ys @ params["wm1"] + params["bm1"], 0.0)
    y = jax.nn.sigmoid(y @ params["wm2"] + params["bm2"])
    mask = (jnp.arange(T)[None, :] < lengths[:, None])[..., None]
    return jnp.where(mask, y, 0.0)


# ----------------------------------------------------------------------------
if __name__ == "__main__":
    # Small, forward-consistent shapes.
    B = 4                   # batch_size
    T = 8                   # max_num_nodes (sequence length)
    M = 16                  # adjacency_size
    E = 32                  # adjacency_embedding_size (embed_first=True)
    H = 32                  # hidden_size
    L = 2                   # num_layers
    O = 32                  # output_embedding_size

    key = jax.random.PRNGKey(0)
    kp, kx = jax.random.split(key)

    params = init_params(kp, adjacency_size=M, adjacency_embedding_size=E,
                         hidden_size=H, num_layers=L, output_embedding_size=O)

    # Binary adjacency-vector sequences (incl. SOS row of ones at t=0).
    input_sequences = (jax.random.uniform(kx, (B, T, M)) > 0.5).astype(jnp.float32)
    input_sequences = input_sequences.at[:, 0, :].set(1.0)
    input_length = jnp.array([T, 5, 3, 6], dtype=jnp.int32)

    out_full = graphrnn_s_forward(params, input_sequences, input_length)
    out_full = jax.block_until_ready(out_full)

    # pad_packed_sequence truncates the time axis to max(length).
    t_max = int(jax.device_get(input_length).max())
    out = out_full[:, :t_max]

    ref = reference_forward(params, input_sequences, input_length)[:, :t_max]
    ref = jax.block_until_ready(ref)

    assert out.shape == (B, t_max, M)
    assert bool(jnp.allclose(out, ref, rtol=1e-4, atol=1e-4)), "mismatch vs JAX reference"

    print("KERNEL_OK")
</pallas_src>

<mosaic_0001>
module attributes {stable_mosaic.version = 11 : i64} {
  func.func @kernel(%arg0: memref<8x1xi32, #tpu.memory_space<vmem>>, %arg1: memref<8x8x16xf32, #tpu.memory_space<vmem>>, %arg2: memref<16x32xf32, #tpu.memory_space<vmem>>, %arg3: memref<1x32xf32, #tpu.memory_space<vmem>>, %arg4: memref<32x96xf32, #tpu.memory_space<vmem>>, %arg5: memref<1x96xf32, #tpu.memory_space<vmem>>, %arg6: memref<32x96xf32, #tpu.memory_space<vmem>>, %arg7: memref<1x32xf32, #tpu.memory_space<vmem>>, %arg8: memref<64x128xf32, #tpu.memory_space<vmem>>, %arg9: memref<1x128xf32, #tpu.memory_space<vmem>>, %arg10: memref<32x32xf32, #tpu.memory_space<vmem>>, %arg11: memref<1x32xf32, #tpu.memory_space<vmem>>, %arg12: memref<32x16xf32, #tpu.memory_space<vmem>>, %arg13: memref<1x16xf32, #tpu.memory_space<vmem>>, %arg14: memref<8x8x16xf32, #tpu.memory_space<vmem>>, %arg15: memref<2x8x32xf32, #tpu.memory_space<vmem>>, %arg16: memref<8x8x96xf32, #tpu.memory_space<vmem>>, %arg17: memref<8x8x32xf32, #tpu.memory_space<vmem>>) attributes {dimension_semantics = [], scalar_prefetch = 0 : i64, scratch_operands = 3 : i64, tpu.core_type = #tpu.core_type<tc>} {
    %c0 = arith.constant 0 : index
    %c0_0 = arith.constant 0 : index
    %c0_1 = arith.constant 0 : index
    %0 = vector.load %arg1[%c0, %c0_0, %c0_1] : memref<8x8x16xf32, #tpu.memory_space<vmem>>, vector<8x8x16xf32>
    %1 = vector.shape_cast %0 : vector<8x8x16xf32> to vector<64x16xf32>
    %c0_2 = arith.constant 0 : index
    %c0_3 = arith.constant 0 : index
    %2 = vector.load %arg2[%c0_2, %c0_3] : memref<16x32xf32, #tpu.memory_space<vmem>>, vector<16x32xf32>
    %cst = arith.constant dense<0.000000e+00> : vector<64x32xf32>
    %3 = tpu.matmul %1, %2, %cst {dimension_numbers = #tpu.dot_dimension_numbers<[1], [0], [0], [1], [0, 0, 1, 1], [], []>} : vector<64x16xf32>, vector<16x32xf32>, vector<64x32xf32> -> vector<64x32xf32>
    %c0_4 = arith.constant 0 : index
    %c0_5 = arith.constant 0 : index
    %4 = vector.load %arg3[%c0_4, %c0_5] : memref<1x32xf32, #tpu.memory_space<vmem>>, vector<1x32xf32>
    %5 = vector.broadcast %4 : vector<1x32xf32> to vector<64x32xf32>
    %6 = arith.addf %3, %5 : vector<64x32xf32>
    %cst_6 = arith.constant 0.000000e+00 : f32
    %7 = vector.broadcast %cst_6 : f32 to vector<64x32xf32>
    %8 = arith.maximumf %6, %7 : vector<64x32xf32>
    %c0_7 = arith.constant 0 : index
    %c0_8 = arith.constant 0 : index
    %9 = vector.load %arg4[%c0_7, %c0_8] : memref<32x96xf32, #tpu.memory_space<vmem>>, vector<32x96xf32>
    %cst_9 = arith.constant dense<0.000000e+00> : vector<64x96xf32>
    %10 = tpu.matmul %8, %9, %cst_9 {dimension_numbers = #tpu.dot_dimension_numbers<[1], [0], [0], [1], [0, 0, 1, 1], [], []>} : vector<64x32xf32>, vector<32x96xf32>, vector<64x96xf32> -> vector<64x96xf32>
    %c0_10 = arith.constant 0 : index
    %c0_11 = arith.constant 0 : index
    %11 = vector.load %arg5[%c0_10, %c0_11] : memref<1x96xf32, #tpu.memory_space<vmem>>, vector<1x96xf32>
    %12 = vector.broadcast %11 : vector<1x96xf32> to vector<64x96xf32>
    %13 = arith.addf %10, %12 : vector<64x96xf32>
    %14 = vector.shape_cast %13 : vector<64x96xf32> to vector<8x8x96xf32>
    %c0_12 = arith.constant 0 : index
    %c0_13 = arith.constant 0 : index
    %c0_14 = arith.constant 0 : index
    %15 = vector.load %arg16[%c0_12, %c0_13, %c0_14] : memref<8x8x96xf32, #tpu.memory_space<vmem>>, vector<8x8x96xf32>
    tpu.vector_store %arg16[%c0_12, %c0_13, %c0_14], %14 {strides = array<i32>} : memref<8x8x96xf32, #tpu.memory_space<vmem>>, vector<8x8x96xf32>,
    %cst_15 = arith.constant 0.000000e+00 : f32
    %16 = vector.broadcast %cst_15 : f32 to vector<2x8x32xf32>
    %c0_16 = arith.constant 0 : index
    %c0_17 = arith.constant 0 : index
    %c0_18 = arith.constant 0 : index
    %17 = vector.load %arg15[%c0_16, %c0_17, %c0_18] : memref<2x8x32xf32, #tpu.memory_space<vmem>>, vector<2x8x32xf32>
    tpu.vector_store %arg15[%c0_16, %c0_17, %c0_18], %16 {strides = array<i32>} : memref<2x8x32xf32, #tpu.memory_space<vmem>>, vector<2x8x32xf32>,
    %c0_19 = arith.constant 0 : index
    %c0_20 = arith.constant 0 : index
    %18 = vector.load %arg7[%c0_19, %c0_20] : memref<1x32xf32, #tpu.memory_space<vmem>>, vector<1x32xf32>
    %19 = vector.shape_cast %18 : vector<1x32xf32> to vector<1x32xf32>
    %20 = vector.broadcast %19 : vector<1x32xf32> to vector<8x32xf32>
    %c0_21 = arith.constant 0 : index
    %c0_22 = arith.constant 0 : index
    %21 = vector.load %arg9[%c0_21, %c0_22] : memref<1x128xf32, #tpu.memory_space<vmem>>, vector<1x128xf32>
    %22 = vector.shape_cast %21 : vector<1x128xf32> to vector<1x128xf32>
    %23 = vector.broadcast %22 : vector<1x128xf32> to vector<8x128xf32>
    %c0_23 = arith.constant 0 : index
    %c0_24 = arith.constant 0 : index
    %c0_25 = arith.constant 0 : index
    %24 = vector.load %arg15[%c0_23, %c0_24, %c0_25] : memref<2x8x32xf32, #tpu.memory_space<vmem>>, vector<1x8x32xf32>
    %25 = vector.shape_cast %24 : vector<1x8x32xf32> to vector<8x32xf32>
    %c0_26 = arith.constant 0 : index
    %c0_27 = arith.constant 0 : index
    %c0_28 = arith.constant 0 : index
    %26 = vector.load %arg16[%c0_26, %c0_27, %c0_28] : memref<8x8x96xf32, #tpu.memory_space<vmem>>, vector<1x8x96xf32>
    %27 = vector.shape_cast %26 : vector<1x8x96xf32> to vector<8x96xf32>
    %c0_29 = arith.constant 0 : index
    %c0_30 = arith.constant 0 : index
    %28 = vector.load %arg6[%c0_29, %c0_30] : memref<32x96xf32, #tpu.memory_space<vmem>>, vector<32x96xf32>
    %cst_31 = arith.constant dense<0.000000e+00> : vector<8x96xf32>
    %29 = tpu.matmul %25, %28, %cst_31 {dimension_numbers = #tpu.dot_dimension_numbers<[1], [0], [0], [1], [0, 0, 1, 1], [], []>} : vector<8x32xf32>, vector<32x96xf32>, vector<8x96xf32> -> vector<8x96xf32>
    %30 = vector.extract_strided_slice %27 {offsets = [0, 0], sizes = [8, 32], strides = [1, 1]} : vector<8x96xf32> to vector<8x32xf32>
    %31 = vector.extract_strided_slice %29 {offsets = [0, 0], sizes = [8, 32], strides = [1, 1]} : vector<8x96xf32> to vector<8x32xf32>
    %32 = arith.addf %30, %31 : vector<8x32xf32>
    %33 = arith.negf %32 : vector<8x32xf32>
    %34 = math.exp %33 : vector<8x32xf32>
    %cst_32 = arith.constant 1.000000e+00 : f32
    %35 = vector.broadcast %cst_32 : f32 to vector<8x32xf32>
    %36 = arith.addf %35, %34 : vector<8x32xf32>
    %37 = arith.divf %35, %36 : vector<8x32xf32>
    %38 = vector.extract_strided_slice %27 {offsets = [0, 32], sizes = [8, 32], strides = [1, 1]} : vector<8x96xf32> to vector<8x32xf32>
    %39 = vector.extract_strided_slice %29 {offsets = [0, 32], sizes = [8, 32], strides = [1, 1]} : vector<8x96xf32> to vector<8x32xf32>
    %40 = arith.addf %38, %39 : vector<8x32xf32>
    %41 = arith.negf %40 : vector<8x32xf32>
    %42 = math.exp %41 : vector<8x32xf32>
    %cst_33 = arith.constant 1.000000e+00 : f32
    %43 = vector.broadcast %cst_33 : f32 to vector<8x32xf32>
    %44 = arith.addf %43, %42 : vector<8x32xf32>
    %45 = arith.divf %43, %44 : vector<8x32xf32>
    %46 = vector.extract_strided_slice %27 {offsets = [0, 64], sizes = [8, 32], strides = [1, 1]} : vector<8x96xf32> to vector<8x32xf32>
    %47 = vector.extract_strided_slice %29 {offsets = [0, 64], sizes = [8, 32], strides = [1, 1]} : vector<8x96xf32> to vector<8x32xf32>
    %48 = arith.addf %47, %20 : vector<8x32xf32>
    %49 = arith.mulf %37, %48 : vector<8x32xf32>
    %50 = arith.addf %46, %49 : vector<8x32xf32>
    %51 = math.tanh %50 : vector<8x32xf32>
    %cst_34 = arith.constant 1.000000e+00 : f32
    %52 = vector.broadcast %cst_34 : f32 to vector<8x32xf32>
    %53 = arith.subf %52, %45 : vector<8x32xf32>
    %54 = arith.mulf %53, %51 : vector<8x32xf32>
    %55 = arith.mulf %45, %25 : vector<8x32xf32>
    %56 = arith.addf %54, %55 : vector<8x32xf32>
    %c0_35 = arith.constant 0 : index
    %c0_36 = arith.constant 0 : index
    %c0_37 = arith.constant 0 : index
    %57 = vector.load %arg15[%c0_35, %c0_36, %c0_37] : memref<2x8x32xf32, #tpu.memory_space<vmem>>, vector<1x8x32xf32>
    %58 = vector.shape_cast %57 : vector<1x8x32xf32> to vector<8x32xf32>
    %59 = vector.shape_cast %56 : vector<8x32xf32> to vector<1x8x32xf32>
    tpu.vector_store %arg15[%c0_35, %c0_36, %c0_37], %59 {strides = array<i32>} : memref<2x8x32xf32, #tpu.memory_space<vmem>>, vector<1x8x32xf32>,
    %c1 = arith.constant 1 : index
    %c0_38 = arith.constant 0 : index
    %c0_39 = arith.constant 0 : index
    %60 = vector.load %arg15[%c1, %c0_38, %c0_39] : memref<2x8x32xf32, #tpu.memory_space<vmem>>, vector<1x8x32xf32>
    %61 = vector.shape_cast %60 : vector<1x8x32xf32> to vector<8x32xf32>
    %62 = tpu.concatenate %56, %61 in 1 : vector<8x32xf32>, vector<8x32xf32> -> vector<8x64xf32>
    %c0_40 = arith.constant 0 : index
    %c0_41 = arith.constant 0 : index
    %63 = vector.load %arg8[%c0_40, %c0_41] : memref<64x128xf32, #tpu.memory_space<vmem>>, vector<64x128xf32>
    %cst_42 = arith.constant dense<0.000000e+00> : vector<8x128xf32>
    %64 = tpu.matmul %62, %63, %cst_42 {dimension_numbers = #tpu.dot_dimension_numbers<[1], [0], [0], [1], [0, 0, 1, 1], [], []>} : vector<8x64xf32>, vector<64x128xf32>, vector<8x128xf32> -> vector<8x128xf32>
    %65 = arith.addf %64, %23 : vector<8x128xf32>
    %66 = vector.extract_strided_slice %65 {offsets = [0, 0], sizes = [8, 32], strides = [1, 1]} : vector<8x128xf32> to vector<8x32xf32>
    %67 = arith.negf %66 : vector<8x32xf32>
    %68 = math.exp %67 : vector<8x32xf32>
    %cst_43 = arith.constant 1.000000e+00 : f32
    %69 = vector.broadcast %cst_43 : f32 to vector<8x32xf32>
    %70 = arith.addf %69, %68 : vector<8x32xf32>
    %71 = arith.divf %69, %70 : vector<8x32xf32>
    %72 = vector.extract_strided_slice %65 {offsets = [0, 32], sizes = [8, 32], strides = [1, 1]} : vector<8x128xf32> to vector<8x32xf32>
    %73 = arith.negf %72 : vector<8x32xf32>
    %74 = math.exp %73 : vector<8x32xf32>
    %cst_44 = arith.constant 1.000000e+00 : f32
    %75 = vector.broadcast %cst_44 : f32 to vector<8x32xf32>
    %76 = arith.addf %75, %74 : vector<8x32xf32>
    %77 = arith.divf %75, %76 : vector<8x32xf32>
    %78 = vector.extract_strided_slice %65 {offsets = [0, 64], sizes = [8, 32], strides = [1, 1]} : vector<8x128xf32> to vector<8x32xf32>
    %79 = vector.extract_strided_slice %65 {offsets = [0, 96], sizes = [8, 32], strides = [1, 1]} : vector<8x128xf32> to vector<8x32xf32>
    %80 = arith.mulf %71, %79 : vector<8x32xf32>
    %81 = arith.addf %78, %80 : vector<8x32xf32>
    %82 = math.tanh %81 : vector<8x32xf32>
    %cst_45 = arith.constant 1.000000e+00 : f32
    %83 = vector.broadcast %cst_45 : f32 to vector<8x32xf32>
    %84 = arith.subf %83, %77 : vector<8x32xf32>
    %85 = arith.mulf %84, %82 : vector<8x32xf32>
    %86 = arith.mulf %77, %61 : vector<8x32xf32>
    %87 = arith.addf %85, %86 : vector<8x32xf32>
    %c1_46 = arith.constant 1 : index
    %c0_47 = arith.constant 0 : index
    %c0_48 = arith.constant 0 : index
    %88 = vector.load %arg15[%c1_46, %c0_47, %c0_48] : memref<2x8x32xf32, #tpu.memory_space<vmem>>, vector<1x8x32xf32>
    %89 = vector.shape_cast %88 : vector<1x8x32xf32> to vector<8x32xf32>
    %90 = vector.shape_cast %87 : vector<8x32xf32> to vector<1x8x32xf32>
    tpu.vector_store %arg15[%c1_46, %c0_47, %c0_48], %90 {strides = array<i32>} : memref<2x8x32xf32, #tpu.memory_space<vmem>>, vector<1x8x32xf32>,
    %c0_49 = arith.constant 0 : index
    %c0_50 = arith.constant 0 : index
    %c0_51 = arith.constant 0 : index
    %91 = vector.load %arg17[%c0_49, %c0_50, %c0_51] : memref<8x8x32xf32, #tpu.memory_space<vmem>>, vector<1x8x32xf32>
    %92 = vector.shape_cast %91 : vector<1x8x32xf32> to vector<8x32xf32>
    %93 = vector.shape_cast %87 : vector<8x32xf32> to vector<1x8x32xf32>
    tpu.vector_store %arg17[%c0_49, %c0_50, %c0_51], %93 {strides = array<i32>} : memref<8x8x32xf32, #tpu.memory_space<vmem>>, vector<1x8x32xf32>,
    %c0_52 = arith.constant 0 : index
    %c0_53 = arith.constant 0 : index
    %c0_54 = arith.constant 0 : index
    %94 = vector.load %arg15[%c0_52, %c0_53, %c0_54] : memref<2x8x32xf32, #tpu.memory_space<vmem>>, vector<1x8x32xf32>
    %95 = vector.shape_cast %94 : vector<1x8x32xf32> to vector<8x32xf32>
    %c1_55 = arith.constant 1 : index
    %c0_56 = arith.constant 0 : index
    %c0_57 = arith.constant 0 : index
    %96 = vector.load %arg16[%c1_55, %c0_56, %c0_57] : memref<8x8x96xf32, #tpu.memory_space<vmem>>, vector<1x8x96xf32>
    %97 = vector.shape_cast %96 : vector<1x8x96xf32> to vector<8x96xf32>
    %c0_58 = arith.constant 0 : index
    %c0_59 = arith.constant 0 : index
    %98 = vector.load %arg6[%c0_58, %c0_59] : memref<32x96xf32, #tpu.memory_space<vmem>>, vector<32x96xf32>
    %cst_60 = arith.constant dense<0.000000e+00> : vector<8x96xf32>
    %99 = tpu.matmul %95, %98, %cst_60 {dimension_numbers = #tpu.dot_dimension_numbers<[1], [0], [0], [1], [0, 0, 1, 1], [], []>} : vector<8x32xf32>, vector<32x96xf32>, vector<8x96xf32> -> vector<8x96xf32>
    %100 = vector.extract_strided_slice %97 {offsets = [0, 0], sizes = [8, 32], strides = [1, 1]} : vector<8x96xf32> to vector<8x32xf32>
    %101 = vector.extract_strided_slice %99 {offsets = [0, 0], sizes = [8, 32], strides = [1, 1]} : vector<8x96xf32> to vector<8x32xf32>
    %102 = arith.addf %100, %101 : vector<8x32xf32>
    %103 = arith.negf %102 : vector<8x32xf32>
    %104 = math.exp %103 : vector<8x32xf32>
    %cst_61 = arith.constant 1.000000e+00 : f32
    %105 = vector.broadcast %cst_61 : f32 to vector<8x32xf32>
    %106 = arith.addf %105, %104 : vector<8x32xf32>
    %107 = arith.divf %105, %106 : vector<8x32xf32>
    %108 = vector.extract_strided_slice %97 {offsets = [0, 32], sizes = [8, 32], strides = [1, 1]} : vector<8x96xf32> to vector<8x32xf32>
    %109 = vector.extract_strided_slice %99 {offsets = [0, 32], sizes = [8, 32], strides = [1, 1]} : vector<8x96xf32> to vector<8x32xf32>
    %110 = arith.addf %108, %109 : vector<8x32xf32>
    %111 = arith.negf %110 : vector<8x32xf32>
    %112 = math.exp %111 : vector<8x32xf32>
    %cst_62 = arith.constant 1.000000e+00 : f32
    %113 = vector.broadcast %cst_62 : f32 to vector<8x32xf32>
    %114 = arith.addf %113, %112 : vector<8x32xf32>
    %115 = arith.divf %113, %114 : vector<8x32xf32>
    %116 = vector.extract_strided_slice %97 {offsets = [0, 64], sizes = [8, 32], strides = [1, 1]} : vector<8x96xf32> to vector<8x32xf32>
    %117 = vector.extract_strided_slice %99 {offsets = [0, 64], sizes = [8, 32], strides = [1, 1]} : vector<8x96xf32> to vector<8x32xf32>
    %118 = arith.addf %117, %20 : vector<8x32xf32>
    %119 = arith.mulf %107, %118 : vector<8x32xf32>
    %120 = arith.addf %116, %119 : vector<8x32xf32>
    %121 = math.tanh %120 : vector<8x32xf32>
    %cst_63 = arith.constant 1.000000e+00 : f32
    %122 = vector.broadcast %cst_63 : f32 to vector<8x32xf32>
    %123 = arith.subf %122, %115 : vector<8x32xf32>
    %124 = arith.mulf %123, %121 : vector<8x32xf32>
    %125 = arith.mulf %115, %95 : vector<8x32xf32>
    %126 = arith.addf %124, %125 : vector<8x32xf32>
    %c0_64 = arith.constant 0 : index
    %c0_65 = arith.constant 0 : index
    %c0_66 = arith.constant 0 : index
    %127 = vector.load %arg15[%c0_64, %c0_65, %c0_66] : memref<2x8x32xf32, #tpu.memory_space<vmem>>, vector<1x8x32xf32>
    %128 = vector.shape_cast %127 : vector<1x8x32xf32> to vector<8x32xf32>
    %129 = vector.shape_cast %126 : vector<8x32xf32> to vector<1x8x32xf32>
    tpu.vector_store %arg15[%c0_64, %c0_65, %c0_66], %129 {strides = array<i32>} : memref<2x8x32xf32, #tpu.memory_space<vmem>>, vector<1x8x32xf32>,
    %c1_67 = arith.constant 1 : index
    %c0_68 = arith.constant 0 : index
    %c0_69 = arith.constant 0 : index
    %130 = vector.load %arg15[%c1_67, %c0_68, %c0_69] : memref<2x8x32xf32, #tpu.memory_space<vmem>>, vector<1x8x32xf32>
    %131 = vector.shape_cast %130 : vector<1x8x32xf32> to vector<8x32xf32>
    %132 = tpu.concatenate %126, %131 in 1 : vector<8x32xf32>, vector<8x32xf32> -> vector<8x64xf32>
    %c0_70 = arith.constant 0 : index
    %c0_71 = arith.constant 0 : index
    %133 = vector.load %arg8[%c0_70, %c0_71] : memref<64x128xf32, #tpu.memory_space<vmem>>, vector<64x128xf32>
    %cst_72 = arith.constant dense<0.000000e+00> : vector<8x128xf32>
    %134 = tpu.matmul %132, %133, %cst_72 {dimension_numbers = #tpu.dot_dimension_numbers<[1], [0], [0], [1], [0, 0, 1, 1], [], []>} : vector<8x64xf32>, vector<64x128xf32>, vector<8x128xf32> -> vector<8x128xf32>
    %135 = arith.addf %134, %23 : vector<8x128xf32>
    %136 = vector.extract_strided_slice %135 {offsets = [0, 0], sizes = [8, 32], strides = [1, 1]} : vector<8x128xf32> to vector<8x32xf32>
    %137 = arith.negf %136 : vector<8x32xf32>
    %138 = math.exp %137 : vector<8x32xf32>
    %cst_73 = arith.constant 1.000000e+00 : f32
    %139 = vector.broadcast %cst_73 : f32 to vector<8x32xf32>
    %140 = arith.addf %139, %138 : vector<8x32xf32>
    %141 = arith.divf %139, %140 : vector<8x32xf32>
    %142 = vector.extract_strided_slice %135 {offsets = [0, 32], sizes = [8, 32], strides = [1, 1]} : vector<8x128xf32> to vector<8x32xf32>
    %143 = arith.negf %142 : vector<8x32xf32>
    %144 = math.exp %143 : vector<8x32xf32>
    %cst_74 = arith.constant 1.000000e+00 : f32
    %145 = vector.broadcast %cst_74 : f32 to vector<8x32xf32>
    %146 = arith.addf %145, %144 : vector<8x32xf32>
    %147 = arith.divf %145, %146 : vector<8x32xf32>
    %148 = vector.extract_strided_slice %135 {offsets = [0, 64], sizes = [8, 32], strides = [1, 1]} : vector<8x128xf32> to vector<8x32xf32>
    %149 = vector.extract_strided_slice %135 {offsets = [0, 96], sizes = [8, 32], strides = [1, 1]} : vector<8x128xf32> to vector<8x32xf32>
    %150 = arith.mulf %141, %149 : vector<8x32xf32>
    %151 = arith.addf %148, %150 : vector<8x32xf32>
    %152 = math.tanh %151 : vector<8x32xf32>
    %cst_75 = arith.constant 1.000000e+00 : f32
    %153 = vector.broadcast %cst_75 : f32 to vector<8x32xf32>
    %154 = arith.subf %153, %147 : vector<8x32xf32>
    %155 = arith.mulf %154, %152 : vector<8x32xf32>
    %156 = arith.mulf %147, %131 : vector<8x32xf32>
    %157 = arith.addf %155, %156 : vector<8x32xf32>
    %c1_76 = arith.constant 1 : index
    %c0_77 = arith.constant 0 : index
    %c0_78 = arith.constant 0 : index
    %158 = vector.load %arg15[%c1_76, %c0_77, %c0_78] : memref<2x8x32xf32, #tpu.memory_space<vmem>>, vector<1x8x32xf32>
    %159 = vector.shape_cast %158 : vector<1x8x32xf32> to vector<8x32xf32>
    %160 = vector.shape_cast %157 : vector<8x32xf32> to vector<1x8x32xf32>
    tpu.vector_store %arg15[%c1_76, %c0_77, %c0_78], %160 {strides = array<i32>} : memref<2x8x32xf32, #tpu.memory_space<vmem>>, vector<1x8x32xf32>,
    %c1_79 = arith.constant 1 : index
    %c0_80 = arith.constant 0 : index
    %c0_81 = arith.constant 0 : index
    %161 = vector.load %arg17[%c1_79, %c0_80, %c0_81] : memref<8x8x32xf32, #tpu.memory_space<vmem>>, vector<1x8x32xf32>
    %162 = vector.shape_cast %161 : vector<1x8x32xf32> to vector<8x32xf32>
    %163 = vector.shape_cast %157 : vector<8x32xf32> to vector<1x8x32xf32>
    tpu.vector_store %arg17[%c1_79, %c0_80, %c0_81], %163 {strides = array<i32>} : memref<8x8x32xf32, #tpu.memory_space<vmem>>, vector<1x8x32xf32>,
    %c0_82 = arith.constant 0 : index
    %c0_83 = arith.constant 0 : index
    %c0_84 = arith.constant 0 : index
    %164 = vector.load %arg15[%c0_82, %c0_83, %c0_84] : memref<2x8x32xf32, #tpu.memory_space<vmem>>, vector<1x8x32xf32>
    %165 = vector.shape_cast %164 : vector<1x8x32xf32> to vector<8x32xf32>
    %c2 = arith.constant 2 : index
    %c0_85 = arith.constant 0 : index
    %c0_86 = arith.constant 0 : index
    %166 = vector.load %arg16[%c2, %c0_85, %c0_86] : memref<8x8x96xf32, #tpu.memory_space<vmem>>, vector<1x8x96xf32>
    %167 = vector.shape_cast %166 : vector<1x8x96xf32> to vector<8x96xf32>
    %c0_87 = arith.constant 0 : index
    %c0_88 = arith.constant 0 : index
    %168 = vector.load %arg6[%c0_87, %c0_88] : memref<32x96xf32, #tpu.memory_space<vmem>>, vector<32x96xf32>
    %cst_89 = arith.constant dense<0.000000e+00> : vector<8x96xf32>
    %169 = tpu.matmul %165, %168, %cst_89 {dimension_numbers = #tpu.dot_dimension_numbers<[1], [0], [0], [1], [0, 0, 1, 1], [], []>} : vector<8x32xf32>, vector<32x96xf32>, vector<8x96xf32> -> vector<8x96xf32>
    %170 = vector.extract_strided_slice %167 {offsets = [0, 0], sizes = [8, 32], strides = [1, 1]} : vector<8x96xf32> to vector<8x32xf32>
    %171 = vector.extract_strided_slice %169 {offsets = [0, 0], sizes = [8, 32], strides = [1, 1]} : vector<8x96xf32> to vector<8x32xf32>
    %172 = arith.addf %170, %171 : vector<8x32xf32>
    %173 = arith.negf %172 : vector<8x32xf32>
    %174 = math.exp %173 : vector<8x32xf32>
    %cst_90 = arith.constant 1.000000e+00 : f32
    %175 = vector.broadcast %cst_90 : f32 to vector<8x32xf32>
    %176 = arith.addf %175, %174 : vector<8x32xf32>
    %177 = arith.divf %175, %176 : vector<8x32xf32>
    %178 = vector.extract_strided_slice %167 {offsets = [0, 32], sizes = [8, 32], strides = [1, 1]} : vector<8x96xf32> to vector<8x32xf32>
    %179 = vector.extract_strided_slice %169 {offsets = [0, 32], sizes = [8, 32], strides = [1, 1]} : vector<8x96xf32> to vector<8x32xf32>
    %180 = arith.addf %178, %179 : vector<8x32xf32>
    %181 = arith.negf %180 : vector<8x32xf32>
    %182 = math.exp %181 : vector<8x32xf32>
    %cst_91 = arith.constant 1.000000e+00 : f32
    %183 = vector.broadcast %cst_91 : f32 to vector<8x32xf32>
    %184 = arith.addf %183, %182 : vector<8x32xf32>
    %185 = arith.divf %183, %184 : vector<8x32xf32>
    %186 = vector.extract_strided_slice %167 {offsets = [0, 64], sizes = [8, 32], strides = [1, 1]} : vector<8x96xf32> to vector<8x32xf32>
    %187 = vector.extract_strided_slice %169 {offsets = [0, 64], sizes = [8, 32], strides = [1, 1]} : vector<8x96xf32> to vector<8x32xf32>
    %188 = arith.addf %187, %20 : vector<8x32xf32>
    %189 = arith.mulf %177, %188 : vector<8x32xf32>
    %190 = arith.addf %186, %189 : vector<8x32xf32>
    %191 = math.tanh %190 : vector<8x32xf32>
    %cst_92 = arith.constant 1.000000e+00 : f32
    %192 = vector.broadcast %cst_92 : f32 to vector<8x32xf32>
    %193 = arith.subf %192, %185 : vector<8x32xf32>
    %194 = arith.mulf %193, %191 : vector<8x32xf32>
    %195 = arith.mulf %185, %165 : vector<8x32xf32>
    %196 = arith.addf %194, %195 : vector<8x32xf32>
    %c0_93 = arith.constant 0 : index
    %c0_94 = arith.constant 0 : index
    %c0_95 = arith.constant 0 : index
    %197 = vector.load %arg15[%c0_93, %c0_94, %c0_95] : memref<2x8x32xf32, #tpu.memory_space<vmem>>, vector<1x8x32xf32>
    %198 = vector.shape_cast %197 : vector<1x8x32xf32> to vector<8x32xf32>
    %199 = vector.shape_cast %196 : vector<8x32xf32> to vector<1x8x32xf32>
    tpu.vector_store %arg15[%c0_93, %c0_94, %c0_95], %199 {strides = array<i32>} : memref<2x8x32xf32, #tpu.memory_space<vmem>>, vector<1x8x32xf32>,
    %c1_96 = arith.constant 1 : index
    %c0_97 = arith.constant 0 : index
    %c0_98 = arith.constant 0 : index
    %200 = vector.load %arg15[%c1_96, %c0_97, %c0_98] : memref<2x8x32xf32, #tpu.memory_space<vmem>>, vector<1x8x32xf32>
    %201 = vector.shape_cast %200 : vector<1x8x32xf32> to vector<8x32xf32>
    %202 = tpu.concatenate %196, %201 in 1 : vector<8x32xf32>, vector<8x32xf32> -> vector<8x64xf32>
    %c0_99 = arith.constant 0 : index
    %c0_100 = arith.constant 0 : index
    %203 = vector.load %arg8[%c0_99, %c0_100] : memref<64x128xf32, #tpu.memory_space<vmem>>, vector<64x128xf32>
    %cst_101 = arith.constant dense<0.000000e+00> : vector<8x128xf32>
    %204 = tpu.matmul %202, %203, %cst_101 {dimension_numbers = #tpu.dot_dimension_numbers<[1], [0], [0], [1], [0, 0, 1, 1], [], []>} : vector<8x64xf32>, vector<64x128xf32>, vector<8x128xf32> -> vector<8x128xf32>
    %205 = arith.addf %204, %23 : vector<8x128xf32>
    %206 = vector.extract_strided_slice %205 {offsets = [0, 0], sizes = [8, 32], strides = [1, 1]} : vector<8x128xf32> to vector<8x32xf32>
    %207 = arith.negf %206 : vector<8x32xf32>
    %208 = math.exp %207 : vector<8x32xf32>
    %cst_102 = arith.constant 1.000000e+00 : f32
    %209 = vector.broadcast %cst_102 : f32 to vector<8x32xf32>
    %210 = arith.addf %209, %208 : vector<8x32xf32>
    %211 = arith.divf %209, %210 : vector<8x32xf32>
    %212 = vector.extract_strided_slice %205 {offsets = [0, 32], sizes = [8, 32], strides = [1, 1]} : vector<8x128xf32> to vector<8x32xf32>
    %213 = arith.negf %212 : vector<8x32xf32>
    %214 = math.exp %213 : vector<8x32xf32>
    %cst_103 = arith.constant 1.000000e+00 : f32
    %215 = vector.broadcast %cst_103 : f32 to vector<8x32xf32>
    %216 = arith.addf %215, %214 : vector<8x32xf32>
    %217 = arith.divf %215, %216 : vector<8x32xf32>
    %218 = vector.extract_strided_slice %205 {offsets = [0, 64], sizes = [8, 32], strides = [1, 1]} : vector<8x128xf32> to vector<8x32xf32>
    %219 = vector.extract_strided_slice %205 {offsets = [0, 96], sizes = [8, 32], strides = [1, 1]} : vector<8x128xf32> to vector<8x32xf32>
    %220 = arith.mulf %211, %219 : vector<8x32xf32>
    %221 = arith.addf %218, %220 : vector<8x32xf32>
    %222 = math.tanh %221 : vector<8x32xf32>
    %cst_104 = arith.constant 1.000000e+00 : f32
    %223 = vector.broadcast %cst_104 : f32 to vector<8x32xf32>
    %224 = arith.subf %223, %217 : vector<8x32xf32>
    %225 = arith.mulf %224, %222 : vector<8x32xf32>
    %226 = arith.mulf %217, %201 : vector<8x32xf32>
    %227 = arith.addf %225, %226 : vector<8x32xf32>
    %c1_105 = arith.constant 1 : index
    %c0_106 = arith.constant 0 : index
    %c0_107 = arith.constant 0 : index
    %228 = vector.load %arg15[%c1_105, %c0_106, %c0_107] : memref<2x8x32xf32, #tpu.memory_space<vmem>>, vector<1x8x32xf32>
    %229 = vector.shape_cast %228 : vector<1x8x32xf32> to vector<8x32xf32>
    %230 = vector.shape_cast %227 : vector<8x32xf32> to vector<1x8x32xf32>
    tpu.vector_store %arg15[%c1_105, %c0_106, %c0_107], %230 {strides = array<i32>} : memref<2x8x32xf32, #tpu.memory_space<vmem>>, vector<1x8x32xf32>,
    %c2_108 = arith.constant 2 : index
    %c0_109 = arith.constant 0 : index
    %c0_110 = arith.constant 0 : index
    %231 = vector.load %arg17[%c2_108, %c0_109, %c0_110] : memref<8x8x32xf32, #tpu.memory_space<vmem>>, vector<1x8x32xf32>
    %232 = vector.shape_cast %231 : vector<1x8x32xf32> to vector<8x32xf32>
    %233 = vector.shape_cast %227 : vector<8x32xf32> to vector<1x8x32xf32>
    tpu.vector_store %arg17[%c2_108, %c0_109, %c0_110], %233 {strides = array<i32>} : memref<8x8x32xf32, #tpu.memory_space<vmem>>, vector<1x8x32xf32>,
    %c0_111 = arith.constant 0 : index
    %c0_112 = arith.constant 0 : index
    %c0_113 = arith.constant 0 : index
    %234 = vector.load %arg15[%c0_111, %c0_112, %c0_113] : memref<2x8x32xf32, #tpu.memory_space<vmem>>, vector<1x8x32xf32>
    %235 = vector.shape_cast %234 : vector<1x8x32xf32> to vector<8x32xf32>
    %c3 = arith.constant 3 : index
    %c0_114 = arith.constant 0 : index
    %c0_115 = arith.constant 0 : index
    %236 = vector.load %arg16[%c3, %c0_114, %c0_115] : memref<8x8x96xf32, #tpu.memory_space<vmem>>, vector<1x8x96xf32>
    %237 = vector.shape_cast %236 : vector<1x8x96xf32> to vector<8x96xf32>
    %c0_116 = arith.constant 0 : index
    %c0_117 = arith.constant 0 : index
    %238 = vector.load %arg6[%c0_116, %c0_117] : memref<32x96xf32, #tpu.memory_space<vmem>>, vector<32x96xf32>
    %cst_118 = arith.constant dense<0.000000e+00> : vector<8x96xf32>
    %239 = tpu.matmul %235, %238, %cst_118 {dimension_numbers = #tpu.dot_dimension_numbers<[1], [0], [0], [1], [0, 0, 1, 1], [], []>} : vector<8x32xf32>, vector<32x96xf32>, vector<8x96xf32> -> vector<8x96xf32>
    %240 = vector.extract_strided_slice %237 {offsets = [0, 0], sizes = [8, 32], strides = [1, 1]} : vector<8x96xf32> to vector<8x32xf32>
    %241 = vector.extract_strided_slice %239 {offsets = [0, 0], sizes = [8, 32], strides = [1, 1]} : vector<8x96xf32> to vector<8x32xf32>
    %242 = arith.addf %240, %241 : vector<8x32xf32>
    %243 = arith.negf %242 : vector<8x32xf32>
    %244 = math.exp %243 : vector<8x32xf32>
    %cst_119 = arith.constant 1.000000e+00 : f32
    %245 = vector.broadcast %cst_119 : f32 to vector<8x32xf32>
    %246 = arith.addf %245, %244 : vector<8x32xf32>
    %247 = arith.divf %245, %246 : vector<8x32xf32>
    %248 = vector.extract_strided_slice %237 {offsets = [0, 32], sizes = [8, 32], strides = [1, 1]} : vector<8x96xf32> to vector<8x32xf32>
    %249 = vector.extract_strided_slice %239 {offsets = [0, 32], sizes = [8, 32], strides = [1, 1]} : vector<8x96xf32> to vector<8x32xf32>
    %250 = arith.addf %248, %249 : vector<8x32xf32>
    %251 = arith.negf %250 : vector<8x32xf32>
    %252 = math.exp %251 : vector<8x32xf32>
    %cst_120 = arith.constant 1.000000e+00 : f32
    %253 = vector.broadcast %cst_120 : f32 to vector<8x32xf32>
    %254 = arith.addf %253, %252 : vector<8x32xf32>
    %255 = arith.divf %253, %254 : vector<8x32xf32>
    %256 = vector.extract_strided_slice %237 {offsets = [0, 64], sizes = [8, 32], strides = [1, 1]} : vector<8x96xf32> to vector<8x32xf32>
    %257 = vector.extract_strided_slice %239 {offsets = [0, 64], sizes = [8, 32], strides = [1, 1]} : vector<8x96xf32> to vector<8x32xf32>
    %258 = arith.addf %257, %20 : vector<8x32xf32>
    %259 = arith.mulf %247, %258 : vector<8x32xf32>
    %260 = arith.addf %256, %259 : vector<8x32xf32>
    %261 = math.tanh %260 : vector<8x32xf32>
    %cst_121 = arith.constant 1.000000e+00 : f32
    %262 = vector.broadcast %cst_121 : f32 to vector<8x32xf32>
    %263 = arith.subf %262, %255 : vector<8x32xf32>
    %264 = arith.mulf %263, %261 : vector<8x32xf32>
    %265 = arith.mulf %255, %235 : vector<8x32xf32>
    %266 = arith.addf %264, %265 : vector<8x32xf32>
    %c0_122 = arith.constant 0 : index
    %c0_123 = arith.constant 0 : index
    %c0_124 = arith.constant 0 : index
    %267 = vector.load %arg15[%c0_122, %c0_123, %c0_124] : memref<2x8x32xf32, #tpu.memory_space<vmem>>, vector<1x8x32xf32>
    %268 = vector.shape_cast %267 : vector<1x8x32xf32> to vector<8x32xf32>
    %269 = vector.shape_cast %266 : vector<8x32xf32> to vector<1x8x32xf32>
    tpu.vector_store %arg15[%c0_122, %c0_123, %c0_124], %269 {strides = array<i32>} : memref<2x8x32xf32, #tpu.memory_space<vmem>>, vector<1x8x32xf32>,
    %c1_125 = arith.constant 1 : index
    %c0_126 = arith.constant 0 : index
    %c0_127 = arith.constant 0 : index
    %270 = vector.load %arg15[%c1_125, %c0_126, %c0_127] : memref<2x8x32xf32, #tpu.memory_space<vmem>>, vector<1x8x32xf32>
    %271 = vector.shape_cast %270 : vector<1x8x32xf32> to vector<8x32xf32>
    %272 = tpu.concatenate %266, %271 in 1 : vector<8x32xf32>, vector<8x32xf32> -> vector<8x64xf32>
    %c0_128 = arith.constant 0 : index
    %c0_129 = arith.constant 0 : index
    %273 = vector.load %arg8[%c0_128, %c0_129] : memref<64x128xf32, #tpu.memory_space<vmem>>, vector<64x128xf32>
    %cst_130 = arith.constant dense<0.000000e+00> : vector<8x128xf32>
    %274 = tpu.matmul %272, %273, %cst_130 {dimension_numbers = #tpu.dot_dimension_numbers<[1], [0], [0], [1], [0, 0, 1, 1], [], []>} : vector<8x64xf32>, vector<64x128xf32>, vector<8x128xf32> -> vector<8x128xf32>
    %275 = arith.addf %274, %23 : vector<8x128xf32>
    %276 = vector.extract_strided_slice %275 {offsets = [0, 0], sizes = [8, 32], strides = [1, 1]} : vector<8x128xf32> to vector<8x32xf32>
    %277 = arith.negf %276 : vector<8x32xf32>
    %278 = math.exp %277 : vector<8x32xf32>
    %cst_131 = arith.constant 1.000000e+00 : f32
    %279 = vector.broadcast %cst_131 : f32 to vector<8x32xf32>
    %280 = arith.addf %279, %278 : vector<8x32xf32>
    %281 = arith.divf %279, %280 : vector<8x32xf32>
    %282 = vector.extract_strided_slice %275 {offsets = [0, 32], sizes = [8, 32], strides = [1, 1]} : vector<8x128xf32> to vector<8x32xf32>
    %283 = arith.negf %282 : vector<8x32xf32>
    %284 = math.exp %283 : vector<8x32xf32>
    %cst_132 = arith.constant 1.000000e+00 : f32
    %285 = vector.broadcast %cst_132 : f32 to vector<8x32xf32>
    %286 = arith.addf %285, %284 : vector<8x32xf32>
    %287 = arith.divf %285, %286 : vector<8x32xf32>
    %288 = vector.extract_strided_slice %275 {offsets = [0, 64], sizes = [8, 32], strides = [1, 1]} : vector<8x128xf32> to vector<8x32xf32>
    %289 = vector.extract_strided_slice %275 {offsets = [0, 96], sizes = [8, 32], strides = [1, 1]} : vector<8x128xf32> to vector<8x32xf32>
    %290 = arith.mulf %281, %289 : vector<8x32xf32>
    %291 = arith.addf %288, %290 : vector<8x32xf32>
    %292 = math.tanh %291 : vector<8x32xf32>
    %cst_133 = arith.constant 1.000000e+00 : f32
    %293 = vector.broadcast %cst_133 : f32 to vector<8x32xf32>
    %294 = arith.subf %293, %287 : vector<8x32xf32>
    %295 = arith.mulf %294, %292 : vector<8x32xf32>
    %296 = arith.mulf %287, %271 : vector<8x32xf32>
    %297 = arith.addf %295, %296 : vector<8x32xf32>
    %c1_134 = arith.constant 1 : index
    %c0_135 = arith.constant 0 : index
    %c0_136 = arith.constant 0 : index
    %298 = vector.load %arg15[%c1_134, %c0_135, %c0_136] : memref<2x8x32xf32, #tpu.memory_space<vmem>>, vector<1x8x32xf32>
    %299 = vector.shape_cast %298 : vector<1x8x32xf32> to vector<8x32xf32>
    %300 = vector.shape_cast %297 : vector<8x32xf32> to vector<1x8x32xf32>
    tpu.vector_store %arg15[%c1_134, %c0_135, %c0_136], %300 {strides = array<i32>} : memref<2x8x32xf32, #tpu.memory_space<vmem>>, vector<1x8x32xf32>,
    %c3_137 = arith.constant 3 : index
    %c0_138 = arith.constant 0 : index
    %c0_139 = arith.constant 0 : index
    %301 = vector.load %arg17[%c3_137, %c0_138, %c0_139] : memref<8x8x32xf32, #tpu.memory_space<vmem>>, vector<1x8x32xf32>
    %302 = vector.shape_cast %301 : vector<1x8x32xf32> to vector<8x32xf32>
    %303 = vector.shape_cast %297 : vector<8x32xf32> to vector<1x8x32xf32>
    tpu.vector_store %arg17[%c3_137, %c0_138, %c0_139], %303 {strides = array<i32>} : memref<8x8x32xf32, #tpu.memory_space<vmem>>, vector<1x8x32xf32>,
    %c0_140 = arith.constant 0 : index
    %c0_141 = arith.constant 0 : index
    %c0_142 = arith.constant 0 : index
    %304 = vector.load %arg15[%c0_140, %c0_141, %c0_142] : memref<2x8x32xf32, #tpu.memory_space<vmem>>, vector<1x8x32xf32>
    %305 = vector.shape_cast %304 : vector<1x8x32xf32> to vector<8x32xf32>
    %c4 = arith.constant 4 : index
    %c0_143 = arith.constant 0 : index
    %c0_144 = arith.constant 0 : index
    %306 = vector.load %arg16[%c4, %c0_143, %c0_144] : memref<8x8x96xf32, #tpu.memory_space<vmem>>, vector<1x8x96xf32>
    %307 = vector.shape_cast %306 : vector<1x8x96xf32> to vector<8x96xf32>
    %c0_145 = arith.constant 0 : index
    %c0_146 = arith.constant 0 : index
    %308 = vector.load %arg6[%c0_145, %c0_146] : memref<32x96xf32, #tpu.memory_space<vmem>>, vector<32x96xf32>
    %cst_147 = arith.constant dense<0.000000e+00> : vector<8x96xf32>
    %309 = tpu.matmul %305, %308, %cst_147 {dimension_numbers = #tpu.dot_dimension_numbers<[1], [0], [0], [1], [0, 0, 1, 1], [], []>} : vector<8x32xf32>, vector<32x96xf32>, vector<8x96xf32> -> vector<8x96xf32>
    %310 = vector.extract_strided_slice %307 {offsets = [0, 0], sizes = [8, 32], strides = [1, 1]} : vector<8x96xf32> to vector<8x32xf32>
    %311 = vector.extract_strided_slice %309 {offsets = [0, 0], sizes = [8, 32], strides = [1, 1]} : vector<8x96xf32> to vector<8x32xf32>
    %312 = arith.addf %310, %311 : vector<8x32xf32>
    %313 = arith.negf %312 : vector<8x32xf32>
    %314 = math.exp %313 : vector<8x32xf32>
    %cst_148 = arith.constant 1.000000e+00 : f32
    %315 = vector.broadcast %cst_148 : f32 to vector<8x32xf32>
    %316 = arith.addf %315, %314 : vector<8x32xf32>
    %317 = arith.divf %315, %316 : vector<8x32xf32>
    %318 = vector.extract_strided_slice %307 {offsets = [0, 32], sizes = [8, 32], strides = [1, 1]} : vector<8x96xf32> to vector<8x32xf32>
    %319 = vector.extract_strided_slice %309 {offsets = [0, 32], sizes = [8, 32], strides = [1, 1]} : vector<8x96xf32> to vector<8x32xf32>
    %320 = arith.addf %318, %319 : vector<8x32xf32>
    %321 = arith.negf %320 : vector<8x32xf32>
    %322 = math.exp %321 : vector<8x32xf32>
    %cst_149 = arith.constant 1.000000e+00 : f32
    %323 = vector.broadcast %cst_149 : f32 to vector<8x32xf32>
    %324 = arith.addf %323, %322 : vector<8x32xf32>
    %325 = arith.divf %323, %324 : vector<8x32xf32>
    %326 = vector.extract_strided_slice %307 {offsets = [0, 64], sizes = [8, 32], strides = [1, 1]} : vector<8x96xf32> to vector<8x32xf32>
    %327 = vector.extract_strided_slice %309 {offsets = [0, 64], sizes = [8, 32], strides = [1, 1]} : vector<8x96xf32> to vector<8x32xf32>
    %328 = arith.addf %327, %20 : vector<8x32xf32>
    %329 = arith.mulf %317, %328 : vector<8x32xf32>
    %330 = arith.addf %326, %329 : vector<8x32xf32>
    %331 = math.tanh %330 : vector<8x32xf32>
    %cst_150 = arith.constant 1.000000e+00 : f32
    %332 = vector.broadcast %cst_150 : f32 to vector<8x32xf32>
    %333 = arith.subf %332, %325 : vector<8x32xf32>
    %334 = arith.mulf %333, %331 : vector<8x32xf32>
    %335 = arith.mulf %325, %305 : vector<8x32xf32>
    %336 = arith.addf %334, %335 : vector<8x32xf32>
    %c0_151 = arith.constant 0 : index
    %c0_152 = arith.constant 0 : index
    %c0_153 = arith.constant 0 : index
    %337 = vector.load %arg15[%c0_151, %c0_152, %c0_153] : memref<2x8x32xf32, #tpu.memory_space<vmem>>, vector<1x8x32xf32>
    %338 = vector.shape_cast %337 : vector<1x8x32xf32> to vector<8x32xf32>
    %339 = vector.shape_cast %336 : vector<8x32xf32> to vector<1x8x32xf32>
    tpu.vector_store %arg15[%c0_151, %c0_152, %c0_153], %339 {strides = array<i32>} : memref<2x8x32xf32, #tpu.memory_space<vmem>>, vector<1x8x32xf32>,
    %c1_154 = arith.constant 1 : index
    %c0_155 = arith.constant 0 : index
    %c0_156 = arith.constant 0 : index
    %340 = vector.load %arg15[%c1_154, %c0_155, %c0_156] : memref<2x8x32xf32, #tpu.memory_space<vmem>>, vector<1x8x32xf32>
    %341 = vector.shape_cast %340 : vector<1x8x32xf32> to vector<8x32xf32>
    %342 = tpu.concatenate %336, %341 in 1 : vector<8x32xf32>, vector<8x32xf32> -> vector<8x64xf32>
    %c0_157 = arith.constant 0 : index
    %c0_158 = arith.constant 0 : index
    %343 = vector.load %arg8[%c0_157, %c0_158] : memref<64x128xf32, #tpu.memory_space<vmem>>, vector<64x128xf32>
    %cst_159 = arith.constant dense<0.000000e+00> : vector<8x128xf32>
    %344 = tpu.matmul %342, %343, %cst_159 {dimension_numbers = #tpu.dot_dimension_numbers<[1], [0], [0], [1], [0, 0, 1, 1], [], []>} : vector<8x64xf32>, vector<64x128xf32>, vector<8x128xf32> -> vector<8x128xf32>
    %345 = arith.addf %344, %23 : vector<8x128xf32>
    %346 = vector.extract_strided_slice %345 {offsets = [0, 0], sizes = [8, 32], strides = [1, 1]} : vector<8x128xf32> to vector<8x32xf32>
    %347 = arith.negf %346 : vector<8x32xf32>
    %348 = math.exp %347 : vector<8x32xf32>
    %cst_160 = arith.constant 1.000000e+00 : f32
    %349 = vector.broadcast %cst_160 : f32 to vector<8x32xf32>
    %350 = arith.addf %349, %348 : vector<8x32xf32>
    %351 = arith.divf %349, %350 : vector<8x32xf32>
    %352 = vector.extract_strided_slice %345 {offsets = [0, 32], sizes = [8, 32], strides = [1, 1]} : vector<8x128xf32> to vector<8x32xf32>
    %353 = arith.negf %352 : vector<8x32xf32>
    %354 = math.exp %353 : vector<8x32xf32>
    %cst_161 = arith.constant 1.000000e+00 : f32
    %355 = vector.broadcast %cst_161 : f32 to vector<8x32xf32>
    %356 = arith.addf %355, %354 : vector<8x32xf32>
    %357 = arith.divf %355, %356 : vector<8x32xf32>
    %358 = vector.extract_strided_slice %345 {offsets = [0, 64], sizes = [8, 32], strides = [1, 1]} : vector<8x128xf32> to vector<8x32xf32>
    %359 = vector.extract_strided_slice %345 {offsets = [0, 96], sizes = [8, 32], strides = [1, 1]} : vector<8x128xf32> to vector<8x32xf32>
    %360 = arith.mulf %351, %359 : vector<8x32xf32>
    %361 = arith.addf %358, %360 : vector<8x32xf32>
    %362 = math.tanh %361 : vector<8x32xf32>
    %cst_162 = arith.constant 1.000000e+00 : f32
    %363 = vector.broadcast %cst_162 : f32 to vector<8x32xf32>
    %364 = arith.subf %363, %357 : vector<8x32xf32>
    %365 = arith.mulf %364, %362 : vector<8x32xf32>
    %366 = arith.mulf %357, %341 : vector<8x32xf32>
    %367 = arith.addf %365, %366 : vector<8x32xf32>
    %c1_163 = arith.constant 1 : index
    %c0_164 = arith.constant 0 : index
    %c0_165 = arith.constant 0 : index
    %368 = vector.load %arg15[%c1_163, %c0_164, %c0_165] : memref<2x8x32xf32, #tpu.memory_space<vmem>>, vector<1x8x32xf32>
    %369 = vector.shape_cast %368 : vector<1x8x32xf32> to vector<8x32xf32>
    %370 = vector.shape_cast %367 : vector<8x32xf32> to vector<1x8x32xf32>
    tpu.vector_store %arg15[%c1_163, %c0_164, %c0_165], %370 {strides = array<i32>} : memref<2x8x32xf32, #tpu.memory_space<vmem>>, vector<1x8x32xf32>,
    %c4_166 = arith.constant 4 : index
    %c0_167 = arith.constant 0 : index
    %c0_168 = arith.constant 0 : index
    %371 = vector.load %arg17[%c4_166, %c0_167, %c0_168] : memref<8x8x32xf32, #tpu.memory_space<vmem>>, vector<1x8x32xf32>
    %372 = vector.shape_cast %371 : vector<1x8x32xf32> to vector<8x32xf32>
    %373 = vector.shape_cast %367 : vector<8x32xf32> to vector<1x8x32xf32>
    tpu.vector_store %arg17[%c4_166, %c0_167, %c0_168], %373 {strides = array<i32>} : memref<8x8x32xf32, #tpu.memory_space<vmem>>, vector<1x8x32xf32>,
    %c0_169 = arith.constant 0 : index
    %c0_170 = arith.constant 0 : index
    %c0_171 = arith.constant 0 : index
    %374 = vector.load %arg15[%c0_169, %c0_170, %c0_171] : memref<2x8x32xf32, #tpu.memory_space<vmem>>, vector<1x8x32xf32>
    %375 = vector.shape_cast %374 : vector<1x8x32xf32> to vector<8x32xf32>
    %c5 = arith.constant 5 : index
    %c0_172 = arith.constant 0 : index
    %c0_173 = arith.constant 0 : index
    %376 = vector.load %arg16[%c5, %c0_172, %c0_173] : memref<8x8x96xf32, #tpu.memory_space<vmem>>, vector<1x8x96xf32>
    %377 = vector.shape_cast %376 : vector<1x8x96xf32> to vector<8x96xf32>
    %c0_174 = arith.constant 0 : index
    %c0_175 = arith.constant 0 : index
    %378 = vector.load %arg6[%c0_174, %c0_175] : memref<32x96xf32, #tpu.memory_space<vmem>>, vector<32x96xf32>
    %cst_176 = arith.constant dense<0.000000e+00> : vector<8x96xf32>
    %379 = tpu.matmul %375, %378, %cst_176 {dimension_numbers = #tpu.dot_dimension_numbers<[1], [0], [0], [1], [0, 0, 1, 1], [], []>} : vector<8x32xf32>, vector<32x96xf32>, vector<8x96xf32> -> vector<8x96xf32>
    %380 = vector.extract_strided_slice %377 {offsets = [0, 0], sizes = [8, 32], strides = [1, 1]} : vector<8x96xf32> to vector<8x32xf32>
    %381 = vector.extract_strided_slice %379 {offsets = [0, 0], sizes = [8, 32], strides = [1, 1]} : vector<8x96xf32> to vector<8x32xf32>
    %382 = arith.addf %380, %381 : vector<8x32xf32>
    %383 = arith.negf %382 : vector<8x32xf32>
    %384 = math.exp %383 : vector<8x32xf32>
    %cst_177 = arith.constant 1.000000e+00 : f32
    %385 = vector.broadcast %cst_177 : f32 to vector<8x32xf32>
    %386 = arith.addf %385, %384 : vector<8x32xf32>
    %387 = arith.divf %385, %386 : vector<8x32xf32>
    %388 = vector.extract_strided_slice %377 {offsets = [0, 32], sizes = [8, 32], strides = [1, 1]} : vector<8x96xf32> to vector<8x32xf32>
    %389 = vector.extract_strided_slice %379 {offsets = [0, 32], sizes = [8, 32], strides = [1, 1]} : vector<8x96xf32> to vector<8x32xf32>
    %390 = arith.addf %388, %389 : vector<8x32xf32>
    %391 = arith.negf %390 : vector<8x32xf32>
    %392 = math.exp %391 : vector<8x32xf32>
    %cst_178 = arith.constant 1.000000e+00 : f32
    %393 = vector.broadcast %cst_178 : f32 to vector<8x32xf32>
    %394 = arith.addf %393, %392 : vector<8x32xf32>
    %395 = arith.divf %393, %394 : vector<8x32xf32>
    %396 = vector.extract_strided_slice %377 {offsets = [0, 64], sizes = [8, 32], strides = [1, 1]} : vector<8x96xf32> to vector<8x32xf32>
    %397 = vector.extract_strided_slice %379 {offsets = [0, 64], sizes = [8, 32], strides = [1, 1]} : vector<8x96xf32> to vector<8x32xf32>
    %398 = arith.addf %397, %20 : vector<8x32xf32>
    %399 = arith.mulf %387, %398 : vector<8x32xf32>
    %400 = arith.addf %396, %399 : vector<8x32xf32>
    %401 = math.tanh %400 : vector<8x32xf32>
    %cst_179 = arith.constant 1.000000e+00 : f32
    %402 = vector.broadcast %cst_179 : f32 to vector<8x32xf32>
    %403 = arith.subf %402, %395 : vector<8x32xf32>
    %404 = arith.mulf %403, %401 : vector<8x32xf32>
    %405 = arith.mulf %395, %375 : vector<8x32xf32>
    %406 = arith.addf %404, %405 : vector<8x32xf32>
    %c0_180 = arith.constant 0 : index
    %c0_181 = arith.constant 0 : index
    %c0_182 = arith.constant 0 : index
    %407 = vector.load %arg15[%c0_180, %c0_181, %c0_182] : memref<2x8x32xf32, #tpu.memory_space<vmem>>, vector<1x8x32xf32>
    %408 = vector.shape_cast %407 : vector<1x8x32xf32> to vector<8x32xf32>
    %409 = vector.shape_cast %406 : vector<8x32xf32> to vector<1x8x32xf32>
    tpu.vector_store %arg15[%c0_180, %c0_181, %c0_182], %409 {strides = array<i32>} : memref<2x8x32xf32, #tpu.memory_space<vmem>>, vector<1x8x32xf32>,
    %c1_183 = arith.constant 1 : index
    %c0_184 = arith.constant 0 : index
    %c0_185 = arith.constant 0 : index
    %410 = vector.load %arg15[%c1_183, %c0_184, %c0_185] : memref<2x8x32xf32, #tpu.memory_space<vmem>>, vector<1x8x32xf32>
    %411 = vector.shape_cast %410 : vector<1x8x32xf32> to vector<8x32xf32>
    %412 = tpu.concatenate %406, %411 in 1 : vector<8x32xf32>, vector<8x32xf32> -> vector<8x64xf32>
    %c0_186 = arith.constant 0 : index
    %c0_187 = arith.constant 0 : index
    %413 = vector.load %arg8[%c0_186, %c0_187] : memref<64x128xf32, #tpu.memory_space<vmem>>, vector<64x128xf32>
    %cst_188 = arith.constant dense<0.000000e+00> : vector<8x128xf32>
    %414 = tpu.matmul %412, %413, %cst_188 {dimension_numbers = #tpu.dot_dimension_numbers<[1], [0], [0], [1], [0, 0, 1, 1], [], []>} : vector<8x64xf32>, vector<64x128xf32>, vector<8x128xf32> -> vector<8x128xf32>
    %415 = arith.addf %414, %23 : vector<8x128xf32>
    %416 = vector.extract_strided_slice %415 {offsets = [0, 0], sizes = [8, 32], strides = [1, 1]} : vector<8x128xf32> to vector<8x32xf32>
    %417 = arith.negf %416 : vector<8x32xf32>
    %418 = math.exp %417 : vector<8x32xf32>
    %cst_189 = arith.constant 1.000000e+00 : f32
    %419 = vector.broadcast %cst_189 : f32 to vector<8x32xf32>
    %420 = arith.addf %419, %418 : vector<8x32xf32>
    %421 = arith.divf %419, %420 : vector<8x32xf32>
    %422 = vector.extract_strided_slice %415 {offsets = [0, 32], sizes = [8, 32], strides = [1, 1]} : vector<8x128xf32> to vector<8x32xf32>
    %423 = arith.negf %422 : vector<8x32xf32>
    %424 = math.exp %423 : vector<8x32xf32>
    %cst_190 = arith.constant 1.000000e+00 : f32
    %425 = vector.broadcast %cst_190 : f32 to vector<8x32xf32>
    %426 = arith.addf %425, %424 : vector<8x32xf32>
    %427 = arith.divf %425, %426 : vector<8x32xf32>
    %428 = vector.extract_strided_slice %415 {offsets = [0, 64], sizes = [8, 32], strides = [1, 1]} : vector<8x128xf32> to vector<8x32xf32>
    %429 = vector.extract_strided_slice %415 {offsets = [0, 96], sizes = [8, 32], strides = [1, 1]} : vector<8x128xf32> to vector<8x32xf32>
    %430 = arith.mulf %421, %429 : vector<8x32xf32>
    %431 = arith.addf %428, %430 : vector<8x32xf32>
    %432 = math.tanh %431 : vector<8x32xf32>
    %cst_191 = arith.constant 1.000000e+00 : f32
    %433 = vector.broadcast %cst_191 : f32 to vector<8x32xf32>
    %434 = arith.subf %433, %427 : vector<8x32xf32>
    %435 = arith.mulf %434, %432 : vector<8x32xf32>
    %436 = arith.mulf %427, %411 : vector<8x32xf32>
    %437 = arith.addf %435, %436 : vector<8x32xf32>
    %c1_192 = arith.constant 1 : index
    %c0_193 = arith.constant 0 : index
    %c0_194 = arith.constant 0 : index
    %438 = vector.load %arg15[%c1_192, %c0_193, %c0_194] : memref<2x8x32xf32, #tpu.memory_space<vmem>>, vector<1x8x32xf32>
    %439 = vector.shape_cast %438 : vector<1x8x32xf32> to vector<8x32xf32>
    %440 = vector.shape_cast %437 : vector<8x32xf32> to vector<1x8x32xf32>
    tpu.vector_store %arg15[%c1_192, %c0_193, %c0_194], %440 {strides = array<i32>} : memref<2x8x32xf32, #tpu.memory_space<vmem>>, vector<1x8x32xf32>,
    %c5_195 = arith.constant 5 : index
    %c0_196 = arith.constant 0 : index
    %c0_197 = arith.constant 0 : index
    %441 = vector.load %arg17[%c5_195, %c0_196, %c0_197] : memref<8x8x32xf32, #tpu.memory_space<vmem>>, vector<1x8x32xf32>
    %442 = vector.shape_cast %441 : vector<1x8x32xf32> to vector<8x32xf32>
    %443 = vector.shape_cast %437 : vector<8x32xf32> to vector<1x8x32xf32>
    tpu.vector_store %arg17[%c5_195, %c0_196, %c0_197], %443 {strides = array<i32>} : memref<8x8x32xf32, #tpu.memory_space<vmem>>, vector<1x8x32xf32>,
    %c0_198 = arith.constant 0 : index
    %c0_199 = arith.constant 0 : index
    %c0_200 = arith.constant 0 : index
    %444 = vector.load %arg15[%c0_198, %c0_199, %c0_200] : memref<2x8x32xf32, #tpu.memory_space<vmem>>, vector<1x8x32xf32>
    %445 = vector.shape_cast %444 : vector<1x8x32xf32> to vector<8x32xf32>
    %c6 = arith.constant 6 : index
    %c0_201 = arith.constant 0 : index
    %c0_202 = arith.constant 0 : index
    %446 = vector.load %arg16[%c6, %c0_201, %c0_202] : memref<8x8x96xf32, #tpu.memory_space<vmem>>, vector<1x8x96xf32>
    %447 = vector.shape_cast %446 : vector<1x8x96xf32> to vector<8x96xf32>
    %c0_203 = arith.constant 0 : index
    %c0_204 = arith.constant 0 : index
    %448 = vector.load %arg6[%c0_203, %c0_204] : memref<32x96xf32, #tpu.memory_space<vmem>>, vector<32x96xf32>
    %cst_205 = arith.constant dense<0.000000e+00> : vector<8x96xf32>
    %449 = tpu.matmul %445, %448, %cst_205 {dimension_numbers = #tpu.dot_dimension_numbers<[1], [0], [0], [1], [0, 0, 1, 1], [], []>} : vector<8x32xf32>, vector<32x96xf32>, vector<8x96xf32> -> vector<8x96xf32>
    %450 = vector.extract_strided_slice %447 {offsets = [0, 0], sizes = [8, 32], strides = [1, 1]} : vector<8x96xf32> to vector<8x32xf32>
    %451 = vector.extract_strided_slice %449 {offsets = [0, 0], sizes = [8, 32], strides = [1, 1]} : vector<8x96xf32> to vector<8x32xf32>
    %452 = arith.addf %450, %451 : vector<8x32xf32>
    %453 = arith.negf %452 : vector<8x32xf32>
    %454 = math.exp %453 : vector<8x32xf32>
    %cst_206 = arith.constant 1.000000e+00 : f32
    %455 = vector.broadcast %cst_206 : f32 to vector<8x32xf32>
    %456 = arith.addf %455, %454 : vector<8x32xf32>
    %457 = arith.divf %455, %456 : vector<8x32xf32>
    %458 = vector.extract_strided_slice %447 {offsets = [0, 32], sizes = [8, 32], strides = [1, 1]} : vector<8x96xf32> to vector<8x32xf32>
    %459 = vector.extract_strided_slice %449 {offsets = [0, 32], sizes = [8, 32], strides = [1, 1]} : vector<8x96xf32> to vector<8x32xf32>
    %460 = arith.addf %458, %459 : vector<8x32xf32>
    %461 = arith.negf %460 : vector<8x32xf32>
    %462 = math.exp %461 : vector<8x32xf32>
    %cst_207 = arith.constant 1.000000e+00 : f32
    %463 = vector.broadcast %cst_207 : f32 to vector<8x32xf32>
    %464 = arith.addf %463, %462 : vector<8x32xf32>
    %465 = arith.divf %463, %464 : vector<8x32xf32>
    %466 = vector.extract_strided_slice %447 {offsets = [0, 64], sizes = [8, 32], strides = [1, 1]} : vector<8x96xf32> to vector<8x32xf32>
    %467 = vector.extract_strided_slice %449 {offsets = [0, 64], sizes = [8, 32], strides = [1, 1]} : vector<8x96xf32> to vector<8x32xf32>
    %468 = arith.addf %467, %20 : vector<8x32xf32>
    %469 = arith.mulf %457, %468 : vector<8x32xf32>
    %470 = arith.addf %466, %469 : vector<8x32xf32>
    %471 = math.tanh %470 : vector<8x32xf32>
    %cst_208 = arith.constant 1.000000e+00 : f32
    %472 = vector.broadcast %cst_208 : f32 to vector<8x32xf32>
    %473 = arith.subf %472, %465 : vector<8x32xf32>
    %474 = arith.mulf %473, %471 : vector<8x32xf32>
    %475 = arith.mulf %465, %445 : vector<8x32xf32>
    %476 = arith.addf %474, %475 : vector<8x32xf32>
    %c0_209 = arith.constant 0 : index
    %c0_210 = arith.constant 0 : index
    %c0_211 = arith.constant 0 : index
    %477 = vector.load %arg15[%c0_209, %c0_210, %c0_211] : memref<2x8x32xf32, #tpu.memory_space<vmem>>, vector<1x8x32xf32>
    %478 = vector.shape_cast %477 : vector<1x8x32xf32> to vector<8x32xf32>
    %479 = vector.shape_cast %476 : vector<8x32xf32> to vector<1x8x32xf32>
    tpu.vector_store %arg15[%c0_209, %c0_210, %c0_211], %479 {strides = array<i32>} : memref<2x8x32xf32, #tpu.memory_space<vmem>>, vector<1x8x32xf32>,
    %c1_212 = arith.constant 1 : index
    %c0_213 = arith.constant 0 : index
    %c0_214 = arith.constant 0 : index
    %480 = vector.load %arg15[%c1_212, %c0_213, %c0_214] : memref<2x8x32xf32, #tpu.memory_space<vmem>>, vector<1x8x32xf32>
    %481 = vector.shape_cast %480 : vector<1x8x32xf32> to vector<8x32xf32>
    %482 = tpu.concatenate %476, %481 in 1 : vector<8x32xf32>, vector<8x32xf32> -> vector<8x64xf32>
    %c0_215 = arith.constant 0 : index
    %c0_216 = arith.constant 0 : index
    %483 = vector.load %arg8[%c0_215, %c0_216] : memref<64x128xf32, #tpu.memory_space<vmem>>, vector<64x128xf32>
    %cst_217 = arith.constant dense<0.000000e+00> : vector<8x128xf32>
    %484 = tpu.matmul %482, %483, %cst_217 {dimension_numbers = #tpu.dot_dimension_numbers<[1], [0], [0], [1], [0, 0, 1, 1], [], []>} : vector<8x64xf32>, vector<64x128xf32>, vector<8x128xf32> -> vector<8x128xf32>
    %485 = arith.addf %484, %23 : vector<8x128xf32>
    %486 = vector.extract_strided_slice %485 {offsets = [0, 0], sizes = [8, 32], strides = [1, 1]} : vector<8x128xf32> to vector<8x32xf32>
    %487 = arith.negf %486 : vector<8x32xf32>
    %488 = math.exp %487 : vector<8x32xf32>
    %cst_218 = arith.constant 1.000000e+00 : f32
    %489 = vector.broadcast %cst_218 : f32 to vector<8x32xf32>
    %490 = arith.addf %489, %488 : vector<8x32xf32>
    %491 = arith.divf %489, %490 : vector<8x32xf32>
    %492 = vector.extract_strided_slice %485 {offsets = [0, 32], sizes = [8, 32], strides = [1, 1]} : vector<8x128xf32> to vector<8x32xf32>
    %493 = arith.negf %492 : vector<8x32xf32>
    %494 = math.exp %493 : vector<8x32xf32>
    %cst_219 = arith.constant 1.000000e+00 : f32
    %495 = vector.broadcast %cst_219 : f32 to vector<8x32xf32>
    %496 = arith.addf %495, %494 : vector<8x32xf32>
    %497 = arith.divf %495, %496 : vector<8x32xf32>
    %498 = vector.extract_strided_slice %485 {offsets = [0, 64], sizes = [8, 32], strides = [1, 1]} : vector<8x128xf32> to vector<8x32xf32>
    %499 = vector.extract_strided_slice %485 {offsets = [0, 96], sizes = [8, 32], strides = [1, 1]} : vector<8x128xf32> to vector<8x32xf32>
    %500 = arith.mulf %491, %499 : vector<8x32xf32>
    %501 = arith.addf %498, %500 : vector<8x32xf32>
    %502 = math.tanh %501 : vector<8x32xf32>
    %cst_220 = arith.constant 1.000000e+00 : f32
    %503 = vector.broadcast %cst_220 : f32 to vector<8x32xf32>
    %504 = arith.subf %503, %497 : vector<8x32xf32>
    %505 = arith.mulf %504, %502 : vector<8x32xf32>
    %506 = arith.mulf %497, %481 : vector<8x32xf32>
    %507 = arith.addf %505, %506 : vector<8x32xf32>
    %c1_221 = arith.constant 1 : index
    %c0_222 = arith.constant 0 : index
    %c0_223 = arith.constant 0 : index
    %508 = vector.load %arg15[%c1_221, %c0_222, %c0_223] : memref<2x8x32xf32, #tpu.memory_space<vmem>>, vector<1x8x32xf32>
    %509 = vector.shape_cast %508 : vector<1x8x32xf32> to vector<8x32xf32>
    %510 = vector.shape_cast %507 : vector<8x32xf32> to vector<1x8x32xf32>
    tpu.vector_store %arg15[%c1_221, %c0_222, %c0_223], %510 {strides = array<i32>} : memref<2x8x32xf32, #tpu.memory_space<vmem>>, vector<1x8x32xf32>,
    %c6_224 = arith.constant 6 : index
    %c0_225 = arith.constant 0 : index
    %c0_226 = arith.constant 0 : index
    %511 = vector.load %arg17[%c6_224, %c0_225, %c0_226] : memref<8x8x32xf32, #tpu.memory_space<vmem>>, vector<1x8x32xf32>
    %512 = vector.shape_cast %511 : vector<1x8x32xf32> to vector<8x32xf32>
    %513 = vector.shape_cast %507 : vector<8x32xf32> to vector<1x8x32xf32>
    tpu.vector_store %arg17[%c6_224, %c0_225, %c0_226], %513 {strides = array<i32>} : memref<8x8x32xf32, #tpu.memory_space<vmem>>, vector<1x8x32xf32>,
    %c0_227 = arith.constant 0 : index
    %c0_228 = arith.constant 0 : index
    %c0_229 = arith.constant 0 : index
    %514 = vector.load %arg15[%c0_227, %c0_228, %c0_229] : memref<2x8x32xf32, #tpu.memory_space<vmem>>, vector<1x8x32xf32>
    %515 = vector.shape_cast %514 : vector<1x8x32xf32> to vector<8x32xf32>
    %c7 = arith.constant 7 : index
    %c0_230 = arith.constant 0 : index
    %c0_231 = arith.constant 0 : index
    %516 = vector.load %arg16[%c7, %c0_230, %c0_231] : memref<8x8x96xf32, #tpu.memory_space<vmem>>, vector<1x8x96xf32>
    %517 = vector.shape_cast %516 : vector<1x8x96xf32> to vector<8x96xf32>
    %c0_232 = arith.constant 0 : index
    %c0_233 = arith.constant 0 : index
    %518 = vector.load %arg6[%c0_232, %c0_233] : memref<32x96xf32, #tpu.memory_space<vmem>>, vector<32x96xf32>
    %cst_234 = arith.constant dense<0.000000e+00> : vector<8x96xf32>
    %519 = tpu.matmul %515, %518, %cst_234 {dimension_numbers = #tpu.dot_dimension_numbers<[1], [0], [0], [1], [0, 0, 1, 1], [], []>} : vector<8x32xf32>, vector<32x96xf32>, vector<8x96xf32> -> vector<8x96xf32>
    %520 = vector.extract_strided_slice %517 {offsets = [0, 0], sizes = [8, 32], strides = [1, 1]} : vector<8x96xf32> to vector<8x32xf32>
    %521 = vector.extract_strided_slice %519 {offsets = [0, 0], sizes = [8, 32], strides = [1, 1]} : vector<8x96xf32> to vector<8x32xf32>
    %522 = arith.addf %520, %521 : vector<8x32xf32>
    %523 = arith.negf %522 : vector<8x32xf32>
    %524 = math.exp %523 : vector<8x32xf32>
    %cst_235 = arith.constant 1.000000e+00 : f32
    %525 = vector.broadcast %cst_235 : f32 to vector<8x32xf32>
    %526 = arith.addf %525, %524 : vector<8x32xf32>
    %527 = arith.divf %525, %526 : vector<8x32xf32>
    %528 = vector.extract_strided_slice %517 {offsets = [0, 32], sizes = [8, 32], strides = [1, 1]} : vector<8x96xf32> to vector<8x32xf32>
    %529 = vector.extract_strided_slice %519 {offsets = [0, 32], sizes = [8, 32], strides = [1, 1]} : vector<8x96xf32> to vector<8x32xf32>
    %530 = arith.addf %528, %529 : vector<8x32xf32>
    %531 = arith.negf %530 : vector<8x32xf32>
    %532 = math.exp %531 : vector<8x32xf32>
    %cst_236 = arith.constant 1.000000e+00 : f32
    %533 = vector.broadcast %cst_236 : f32 to vector<8x32xf32>
    %534 = arith.addf %533, %532 : vector<8x32xf32>
    %535 = arith.divf %533, %534 : vector<8x32xf32>
    %536 = vector.extract_strided_slice %517 {offsets = [0, 64], sizes = [8, 32], strides = [1, 1]} : vector<8x96xf32> to vector<8x32xf32>
    %537 = vector.extract_strided_slice %519 {offsets = [0, 64], sizes = [8, 32], strides = [1, 1]} : vector<8x96xf32> to vector<8x32xf32>
    %538 = arith.addf %537, %20 : vector<8x32xf32>
    %539 = arith.mulf %527, %538 : vector<8x32xf32>
    %540 = arith.addf %536, %539 : vector<8x32xf32>
    %541 = math.tanh %540 : vector<8x32xf32>
    %cst_237 = arith.constant 1.000000e+00 : f32
    %542 = vector.broadcast %cst_237 : f32 to vector<8x32xf32>
    %543 = arith.subf %542, %535 : vector<8x32xf32>
    %544 = arith.mulf %543, %541 : vector<8x32xf32>
    %545 = arith.mulf %535, %515 : vector<8x32xf32>
    %546 = arith.addf %544, %545 : vector<8x32xf32>
    %c0_238 = arith.constant 0 : index
    %c0_239 = arith.constant 0 : index
    %c0_240 = arith.constant 0 : index
    %547 = vector.load %arg15[%c0_238, %c0_239, %c0_240] : memref<2x8x32xf32, #tpu.memory_space<vmem>>, vector<1x8x32xf32>
    %548 = vector.shape_cast %547 : vector<1x8x32xf32> to vector<8x32xf32>
    %549 = vector.shape_cast %546 : vector<8x32xf32> to vector<1x8x32xf32>
    tpu.vector_store %arg15[%c0_238, %c0_239, %c0_240], %549 {strides = array<i32>} : memref<2x8x32xf32, #tpu.memory_space<vmem>>, vector<1x8x32xf32>,
    %c1_241 = arith.constant 1 : index
    %c0_242 = arith.constant 0 : index
    %c0_243 = arith.constant 0 : index
    %550 = vector.load %arg15[%c1_241, %c0_242, %c0_243] : memref<2x8x32xf32, #tpu.memory_space<vmem>>, vector<1x8x32xf32>
    %551 = vector.shape_cast %550 : vector<1x8x32xf32> to vector<8x32xf32>
    %552 = tpu.concatenate %546, %551 in 1 : vector<8x32xf32>, vector<8x32xf32> -> vector<8x64xf32>
    %c0_244 = arith.constant 0 : index
    %c0_245 = arith.constant 0 : index
    %553 = vector.load %arg8[%c0_244, %c0_245] : memref<64x128xf32, #tpu.memory_space<vmem>>, vector<64x128xf32>
    %cst_246 = arith.constant dense<0.000000e+00> : vector<8x128xf32>
    %554 = tpu.matmul %552, %553, %cst_246 {dimension_numbers = #tpu.dot_dimension_numbers<[1], [0], [0], [1], [0, 0, 1, 1], [], []>} : vector<8x64xf32>, vector<64x128xf32>, vector<8x128xf32> -> vector<8x128xf32>
    %555 = arith.addf %554, %23 : vector<8x128xf32>
    %556 = vector.extract_strided_slice %555 {offsets = [0, 0], sizes = [8, 32], strides = [1, 1]} : vector<8x128xf32> to vector<8x32xf32>
    %557 = arith.negf %556 : vector<8x32xf32>
    %558 = math.exp %557 : vector<8x32xf32>
    %cst_247 = arith.constant 1.000000e+00 : f32
    %559 = vector.broadcast %cst_247 : f32 to vector<8x32xf32>
    %560 = arith.addf %559, %558 : vector<8x32xf32>
    %561 = arith.divf %559, %560 : vector<8x32xf32>
    %562 = vector.extract_strided_slice %555 {offsets = [0, 32], sizes = [8, 32], strides = [1, 1]} : vector<8x128xf32> to vector<8x32xf32>
    %563 = arith.negf %562 : vector<8x32xf32>
    %564 = math.exp %563 : vector<8x32xf32>
    %cst_248 = arith.constant 1.000000e+00 : f32
    %565 = vector.broadcast %cst_248 : f32 to vector<8x32xf32>
    %566 = arith.addf %565, %564 : vector<8x32xf32>
    %567 = arith.divf %565, %566 : vector<8x32xf32>
    %568 = vector.extract_strided_slice %555 {offsets = [0, 64], sizes = [8, 32], strides = [1, 1]} : vector<8x128xf32> to vector<8x32xf32>
    %569 = vector.extract_strided_slice %555 {offsets = [0, 96], sizes = [8, 32], strides = [1, 1]} : vector<8x128xf32> to vector<8x32xf32>
    %570 = arith.mulf %561, %569 : vector<8x32xf32>
    %571 = arith.addf %568, %570 : vector<8x32xf32>
    %572 = math.tanh %571 : vector<8x32xf32>
    %cst_249 = arith.constant 1.000000e+00 : f32
    %573 = vector.broadcast %cst_249 : f32 to vector<8x32xf32>
    %574 = arith.subf %573, %567 : vector<8x32xf32>
    %575 = arith.mulf %574, %572 : vector<8x32xf32>
    %576 = arith.mulf %567, %551 : vector<8x32xf32>
    %577 = arith.addf %575, %576 : vector<8x32xf32>
    %c1_250 = arith.constant 1 : index
    %c0_251 = arith.constant 0 : index
    %c0_252 = arith.constant 0 : index
    %578 = vector.load %arg15[%c1_250, %c0_251, %c0_252] : memref<2x8x32xf32, #tpu.memory_space<vmem>>, vector<1x8x32xf32>
    %579 = vector.shape_cast %578 : vector<1x8x32xf32> to vector<8x32xf32>
    %580 = vector.shape_cast %577 : vector<8x32xf32> to vector<1x8x32xf32>
    tpu.vector_store %arg15[%c1_250, %c0_251, %c0_252], %580 {strides = array<i32>} : memref<2x8x32xf32, #tpu.memory_space<vmem>>, vector<1x8x32xf32>,
    %c7_253 = arith.constant 7 : index
    %c0_254 = arith.constant 0 : index
    %c0_255 = arith.constant 0 : index
    %581 = vector.load %arg17[%c7_253, %c0_254, %c0_255] : memref<8x8x32xf32, #tpu.memory_space<vmem>>, vector<1x8x32xf32>
    %582 = vector.shape_cast %581 : vector<1x8x32xf32> to vector<8x32xf32>
    %583 = vector.shape_cast %577 : vector<8x32xf32> to vector<1x8x32xf32>
    tpu.vector_store %arg17[%c7_253, %c0_254, %c0_255], %583 {strides = array<i32>} : memref<8x8x32xf32, #tpu.memory_space<vmem>>, vector<1x8x32xf32>,
    %c0_256 = arith.constant 0 : index
    %c0_257 = arith.constant 0 : index
    %c0_258 = arith.constant 0 : index
    %584 = vector.load %arg17[%c0_256, %c0_257, %c0_258] : memref<8x8x32xf32, #tpu.memory_space<vmem>>, vector<8x8x32xf32>
    %585 = vector.shape_cast %584 : vector<8x8x32xf32> to vector<64x32xf32>
    %c0_259 = arith.constant 0 : index
    %c0_260 = arith.constant 0 : index
    %586 = vector.load %arg10[%c0_259, %c0_260] : memref<32x32xf32, #tpu.memory_space<vmem>>, vector<32x32xf32>
    %cst_261 = arith.constant dense<0.000000e+00> : vector<64x32xf32>
    %587 = tpu.matmul %585, %586, %cst_261 {dimension_numbers = #tpu.dot_dimension_numbers<[1], [0], [0], [1], [0, 0, 1, 1], [], []>} : vector<64x32xf32>, vector<32x32xf32>, vector<64x32xf32> -> vector<64x32xf32>
    %c0_262 = arith.constant 0 : index
    %c0_263 = arith.constant 0 : index
    %588 = vector.load %arg11[%c0_262, %c0_263] : memref<1x32xf32, #tpu.memory_space<vmem>>, vector<1x32xf32>
    %589 = vector.broadcast %588 : vector<1x32xf32> to vector<64x32xf32>
    %590 = arith.addf %587, %589 : vector<64x32xf32>
    %cst_264 = arith.constant 0.000000e+00 : f32
    %591 = vector.broadcast %cst_264 : f32 to vector<64x32xf32>
    %592 = arith.maximumf %590, %591 : vector<64x32xf32>
    %c0_265 = arith.constant 0 : index
    %c0_266 = arith.constant 0 : index
    %593 = vector.load %arg12[%c0_265, %c0_266] : memref<32x16xf32, #tpu.memory_space<vmem>>, vector<32x16xf32>
    %cst_267 = arith.constant dense<0.000000e+00> : vector<64x16xf32>
    %594 = tpu.matmul %592, %593, %cst_267 {dimension_numbers = #tpu.dot_dimension_numbers<[1], [0], [0], [1], [0, 0, 1, 1], [], []>} : vector<64x32xf32>, vector<32x16xf32>, vector<64x16xf32> -> vector<64x16xf32>
    %c0_268 = arith.constant 0 : index
    %c0_269 = arith.constant 0 : index
    %595 = vector.load %arg13[%c0_268, %c0_269] : memref<1x16xf32, #tpu.memory_space<vmem>>, vector<1x16xf32>
    %596 = vector.broadcast %595 : vector<1x16xf32> to vector<64x16xf32>
    %597 = arith.addf %594, %596 : vector<64x16xf32>
    %598 = arith.negf %597 : vector<64x16xf32>
    %599 = math.exp %598 : vector<64x16xf32>
    %cst_270 = arith.constant 1.000000e+00 : f32
    %600 = vector.broadcast %cst_270 : f32 to vector<64x16xf32>
    %601 = arith.addf %600, %599 : vector<64x16xf32>
    %602 = arith.divf %600, %601 : vector<64x16xf32>
    %603 = vector.shape_cast %602 : vector<64x16xf32> to vector<8x8x16xf32>
    %604 = tpu.iota {dimensions = array<i32: 0>} : vector<8x8x1xi32>
    %c0_271 = arith.constant 0 : index
    %c0_272 = arith.constant 0 : index
    %605 = vector.load %arg0[%c0_271, %c0_272] : memref<8x1xi32, #tpu.memory_space<vmem>>, vector<8x1xi32>
    %606 = vector.shape_cast %605 : vector<8x1xi32> to vector<1x8x1xi32>
    %607 = vector.broadcast %606 : vector<1x8x1xi32> to vector<8x8x1xi32>
    %608 = arith.cmpi slt, %604, %607 : vector<8x8x1xi32>
    %cst_273 = arith.constant 0.000000e+00 : f32
    %609 = vector.shape_cast %608 : vector<8x8x1xi1> to vector<8x8x1xi1>
    %610 = vector.broadcast %609 : vector<8x8x1xi1> to vector<8x8x16xi1>
    %611 = vector.broadcast %cst_273 : f32 to vector<8x8x16xf32>
    %612 = arith.select %610, %603, %611 : vector<8x8x16xi1>, vector<8x8x16xf32>
    %c0_274 = arith.constant 0 : index
    %c0_275 = arith.constant 0 : index
    %c0_276 = arith.constant 0 : index
    %613 = vector.load %arg14[%c0_274, %c0_275, %c0_276] : memref<8x8x16xf32, #tpu.memory_space<vmem>>, vector<8x8x16xf32>
    tpu.vector_store %arg14[%c0_274, %c0_275, %c0_276], %612 {strides = array<i32>} : memref<8x8x16xf32, #tpu.memory_space<vmem>>, vector<8x8x16xf32>,
    return
  }
}

</mosaic_0001>

<bundles_post_ra>
// kernel: tpu_custom_call.1
= control target key start
LH: loop header
LB: loop body
LE: loop exit
PB: predicated region body
PF: predicated region fallthrough
CT: control target
= control target key end

     0   :  { %19 = vsyncpa [#allocation6], 0  ;;  %s4440_s0 = inlined_call_operand.vmem [shape: s32[8,1], index: 0, kind: input, shape index: {}]   ;;  %s4441_s1 = inlined_call_operand.hbm [shape: f32[8,8,16], index: 1, kind: input, shape index: {}]   ;;  %s4442_s2 = inlined_call_operand.hbm [shape: f32[16,32], index: 2, kind: input, shape index: {}]   ;;  %s4443_s3 = inlined_call_operand.vmem [shape: f32[1,32], index: 3, kind: input, shape index: {}]   ;;  %s4444_s4 = inlined_call_operand.hbm [shape: f32[32,96], index: 4, kind: input, shape index: {}]   ;;  %s4445_s5 = inlined_call_operand.vmem [shape: f32[1,96], index: 5, kind: input, shape index: {}]   ;;  %s4446_s6 = inlined_call_operand.hbm [shape: f32[32,96], index: 6, kind: input, shape index: {}]   ;;  %s4447_s7 = inlined_call_operand.vmem [shape: f32[1,32], index: 7, kind: input, shape index: {}]   ;;  %s4448_s8 = inlined_call_operand.vmem [shape: f32[64,128], index: 8, kind: input, shape index: {}]   ;;  %s4449_s9 = inlined_call_operand.vmem [shape: f32[1,128], index: 9, kind: input, shape index: {}]   ;;  %s4450_s10 = inlined_call_operand.hbm [shape: f32[32,32], index: 10, kind: input, shape index: {}]   ;;  %s4451_s11 = inlined_call_operand.vmem [shape: f32[1,32], index: 11, kind: input, shape index: {}]   ;;  %s4452_s12 = inlined_call_operand.vmem [shape: f32[32,16], index: 12, kind: input, shape index: {}]   ;;  %s4453_s13 = inlined_call_operand.vmem [shape: f32[1,16], index: 13, kind: input, shape index: {}]   ;;  %s4454_s14 = inlined_call_operand.hbm [shape: f32[8,8,16], index: 14, kind: output, shape index: {}]  }
   0x1   :  { %20 = vsyncpa [#allocation9], 0 }
   0x2   :  { %21 = vsyncpa [#allocation12], 0 }
   0x3   :  { %22 = vsyncpa [#allocation7], 0  ;;  %s3749_s29 = smov [#allocation8]   ;;  %s3750_s15 = smov [#allocation11]  }
   0x4   :  { %s42_s30 = sshll.u32 %s3749_s29, 4  ;;  %s70_s16 = sshll.u32 %s3750_s15, 4  ;;  %s43_s30 = int_to_ptr.vmem [resolvable:$true] %s42_s30  ;;  %s3839_s16 = int_to_ptr.vmem [resolvable:$true] %s70_s16 }
   0x5   :  { %s3609_s19 = scalar_lea.hbm %s4442_s2, 256 }
   0x6   :  { %p3610_p0 = scmp.ne.s32.totalorder %s4442_s2, %s3609_s19  ;;  %p3613_p1 = scmp.lt.u32.totalorder %s3609_s19, %s4442_s2 }
   0x8   :  { %p3615_p2 = pnand %p3613_p1, %p3610_p0 }
   0xa   :  { %3618 = shalt.err (!%p3615_p2)
}
   0xb   :  { %s3619_s24 = scalar_lea.vmem %s43_s30, 256  ;;  %p3624_p4 = scmp.lt.s32.totalorder %s43_s30, %s43_s30 }
   0xc   :  { %p3620_p3 = scmp.ne.s32.totalorder %s43_s30, %s3619_s24  ;;  %p3625_p5 = scmp.lt.s32.totalorder %s3619_s24, %s3619_s24 }
   0xe   :  { %p3626_p6 = por %p3625_p5, %p3624_p4 }
  0x10   :  { %p3627_p7 = pnand %p3626_p6, %p3620_p3 }
  0x12   :  { %3630 = shalt.err (!%p3627_p7)
}
  0x13   :  { %s3751_s25 = smov 128   ;;  %s3752_s26 = smov 8  }
  0x14   :  { %48 = dma.hbm_to_vmem [thread:$0]  %s4442_s2, 256, %s43_s30, [#allocation9], %s3751_s25, %s3751_s25, %s3752_s26  }
  0x15   :  { %s3631_s17 = scalar_lea.hbm %s4446_s6, 512 }
  0x16   :  { %p3632_p8 = scmp.ne.s32.totalorder %s4446_s6, %s3631_s17  ;;  %p3635_p9 = scmp.lt.u32.totalorder %s3631_s17, %s4446_s6 }
  0x18   :  { %p3637_p10 = pnand %p3635_p9, %p3632_p8 }
  0x1a   :  { %3640 = shalt.err (!%p3637_p10)
}
  0x1b   :  { %s3641_s22 = scalar_lea.vmem %s3839_s16, 512  ;;  %p3646_p12 = scmp.lt.s32.totalorder %s3839_s16, %s3839_s16 }
  0x1c   :  { %p3642_p11 = scmp.ne.s32.totalorder %s3839_s16, %s3641_s22  ;;  %p3647_p13 = scmp.lt.s32.totalorder %s3641_s22, %s3641_s22 }
  0x1e   :  { %p3648_p0 = por %p3647_p13, %p3646_p12 }
  0x20   :  { %p3649_p1 = pnand %p3648_p0, %p3642_p11 }
  0x22   :  { %3652 = shalt.err (!%p3649_p1)
}
  0x23   :  { %76 = dma.hbm_to_vmem [thread:$0]  %s4446_s6, 512, %s3839_s16, [#allocation12], %s3751_s25, %s3751_s25, %s3752_s26  }
  0x24   :  { %s3753_s23 = smov [#allocation5]   ;;  %s3754_s27 = smov [#allocation10]  }
  0x25   :  { %s30_s24 = sshll.u32 %s3753_s23, 4  ;;  %s56_s28 = sshll.u32 %s3754_s27, 4  ;;  %s31_s24 = int_to_ptr.vmem [resolvable:$true] %s30_s24  ;;  %s3876_s28 = int_to_ptr.vmem [resolvable:$true] %s56_s28 }
  0x26   :  { %s3653_s17 = scalar_lea.hbm %s4441_s1, 1024 }
  0x27   :  { %p3654_p2 = scmp.ne.s32.totalorder %s4441_s1, %s3653_s17  ;;  %p3657_p3 = scmp.lt.u32.totalorder %s3653_s17, %s4441_s1 }
  0x29   :  { %p3659_p4 = pnand %p3657_p3, %p3654_p2 }
  0x2b   :  { %3662 = shalt.err (!%p3659_p4)
}
  0x2c   :  { %s3663_s6 = scalar_lea.vmem %s31_s24, 1024  ;;  %p3668_p6 = scmp.lt.s32.totalorder %s31_s24, %s31_s24 }
  0x2d   :  { %p3664_p5 = scmp.ne.s32.totalorder %s31_s24, %s3663_s6  ;;  %p3669_p7 = scmp.lt.s32.totalorder %s3663_s6, %s3663_s6 }
  0x2f   :  { %p3670_p8 = por %p3669_p7, %p3668_p6 }
  0x31   :  { %p3671_p9 = pnand %p3670_p8, %p3664_p5 }
  0x33   :  { %3674 = shalt.err (!%p3671_p9)
}
  0x34   :  { %36 = dma.hbm_to_vmem [thread:$0]  %s4441_s1, 1024, %s31_s24, [#allocation6], %s3751_s25, %s3751_s25, %s3752_s26  }
  0x35   :  { %s3675_s23 = scalar_lea.hbm %s4444_s4, 512 }
  0x36   :  { %p3676_p10 = scmp.ne.s32.totalorder %s4444_s4, %s3675_s23  ;;  %p3679_p11 = scmp.lt.u32.totalorder %s3675_s23, %s4444_s4 }
  0x38   :  { %p3681_p12 = pnand %p3679_p11, %p3676_p10 }
  0x3a   :  { %3684 = shalt.err (!%p3681_p12)
}
  0x3b   :  { %s3685_s18 = scalar_lea.vmem %s3876_s28, 512  ;;  %p3690_p0 = scmp.lt.s32.totalorder %s3876_s28, %s3876_s28 }
  0x3c   :  { %p3686_p13 = scmp.ne.s32.totalorder %s3876_s28, %s3685_s18  ;;  %p3691_p1 = scmp.lt.s32.totalorder %s3685_s18, %s3685_s18 }
  0x3e   :  { %p3692_p2 = por %p3691_p1, %p3690_p0 }
  0x40   :  { %p3693_p3 = pnand %p3692_p2, %p3686_p13 }
  0x42   :  { %3696 = shalt.err (!%p3693_p3)
}
  0x43   :  { %62 = dma.hbm_to_vmem [thread:$0]  %s4444_s4, 512, %s3876_s28, [#allocation9], %s3751_s25, %s3751_s25, %s3752_s26  }
  0x44   :  { %s3755_s19 = smov [#allocation13]   ;;  %s3697_s16 = scalar_lea.hbm %s4450_s10, 512 }
  0x45   :  { %s88_s20 = sshll.u32 %s3755_s19, 4  ;;  %p3698_p4 = scmp.ne.s32.totalorder %s4450_s10, %s3697_s16  ;;  %s89_s20 = int_to_ptr.vmem [resolvable:$true] %s88_s20 }
  0x46   :  { %p3701_p5 = scmp.lt.u32.totalorder %s3697_s16, %s4450_s10 }
  0x48   :  { %p3703_p6 = pnand %p3701_p5, %p3698_p4 }
  0x4a   :  { %3706 = shalt.err (!%p3703_p6)
}
  0x4b   :  { %s3707_s27 = scalar_lea.vmem %s89_s20, 512  ;;  %p3712_p8 = scmp.lt.s32.totalorder %s89_s20, %s89_s20 }
  0x4c   :  { %p3708_p7 = scmp.ne.s32.totalorder %s89_s20, %s3707_s27  ;;  %p3713_p9 = scmp.lt.s32.totalorder %s3707_s27, %s3707_s27 }
  0x4e   :  { %p3714_p10 = por %p3713_p9, %p3712_p8 }
  0x50   :  { %p3715_p11 = pnand %p3714_p10, %p3708_p7 }
  0x52   :  { %3718 = shalt.err (!%p3715_p11)
}
  0x53   :  { %94 = dma.hbm_to_vmem [thread:$0]  %s4450_s10, 512, %s89_s20, [#allocation12], %s3751_s25, %s3751_s25, %s3752_s26  }
  0x54   :  { %3741 = dma.done.wait [#allocation6], 1024  }
  0x55   :  { %3742 = vsyncadd [#allocation6], 4294966272 }
  0x56   :  { %3743 = dma.done.wait [#allocation9], 768  }
  0x57   :  { %3744 = vsyncadd [#allocation9], 4294966528 }
  0x58   :  { %3745 = dma.done.wait [#allocation12], 1024  }
  0x59   :  { %3746 = vsyncadd [#allocation12], 4294966272  ;;  %vm282_vm0 = vcmask 261120   ;;  %v3756_v0 = vmov 0.0   ;;  %vm133_vm1 = vcmask 130048   ;;  %v124_v1 = vld [vmem:[#allocation8] sm:$0xff] }
  0x5a   :  { %421 = vst.msk [vmem:[#allocation2] sm:$0xff] %vm282_vm0, %v3756_v0  ;;  %422 = vst.msk [vmem:[#allocation2 + $0x8] sm:$0xff] %vm282_vm0, %v3756_v0  ;;  %v125_v2 = vld [vmem:[#allocation8 + $0x8] sm:$0xff]  ;;  %v116_v3 = vld [vmem:[#allocation5] sm:$0xff]  ;;  %v3757_v11 = vmov 0.0|0.0   ;;  %vm3758_vm2 = vmmov 0  }
  0x5b   :  { %v3291_v4 = vpack.c.bf16 %v125_v2, %v124_v1  ;;  %2979 = vmatprep.mubr.msk.f32.mxu0 %vm133_vm1, %v116_v3  ;;  %v438_v5 = vld [vmem:[#allocation11] sm:$0xff]  ;;  %v439_v6 = vld [vmem:[#allocation11 + $0x8] sm:$0xff]  ;;  %v117_v7 = vld [vmem:[#allocation5 + $0x8] sm:$0xff]  ;;  %s3759_s15 = smov 64   ;;  %vm412_vm3 = vcmask 785408   ;;  %s3761_s17 = smov 96  }
  0x5c   :  { %v118_v8 = vld [vmem:[#allocation5 + $0x10] sm:$0xff]  ;;  %v3933_v9 = vpack.c.bf16 %v439_v6, %v438_v5  ;;  %v440_v10 = vld [vmem:[#allocation11 + $0x10] sm:$0xff]  ;;  %v441_v12 = vld [vmem:[#allocation11 + $0x18] sm:$0xff]  ;;  %vm568_vm4 = vcmask 523264  }
  0x5d   :  { %3292 = vmatprep.subr.bf16.mxu0 %v3291_v4  ;;  %v271_v13 = vld [vmem:[#allocation10] sm:$0xff]  ;;  %v272_v14 = vld [vmem:[#allocation10 + $0x8] sm:$0xff]  ;;  %v3939_v17 = vpack.c.bf16 %v441_v12, %v440_v10  ;;  %v120_v18 = vld [vmem:[#allocation5 + $0x20] sm:$0xff] }
  0x5e   :  { %3294 = vmatpush3.bf16.msra.mxu0 %v3291_v4  ;;  %v3295_v15 = vpack.c.bf16 %v272_v14, %v271_v13  ;;  %v119_v16 = vld [vmem:[#allocation5 + $0x18] sm:$0xff]  ;;  %v121_v19 = vld [vmem:[#allocation5 + $0x28] sm:$0xff]  ;;  %v122_v20 = vld [vmem:[#allocation5 + $0x30] sm:$0xff] }
  0x5f   :  { %3303 = vmatprep.subr.bf16.mxu0 %v3757_v11  ;;  %v123_v21 = vld [vmem:[#allocation5 + $0x38] sm:$0xff]  ;;  %v273_v23 = vld [vmem:[#allocation10 + $0x10] sm:$0xff]  ;;  %v274_v24 = vld [vmem:[#allocation10 + $0x18] sm:$0xff] }
  0x60   :  { %3296 = vmatprep.subr.bf16.mxu1 %v3295_v15  ;;  %v3299_v25 = vpack.c.bf16 %v274_v24, %v273_v23  ;;  %v2757_v26 = vld [vmem:[%s4447_s7] ss:$0 sm:$0xff] }
  0x61   :  { %2980 = vmatmul.mubr.msk.f32.vlgmr.msra.gmra.mrb[0].mxu0 %vm133_vm1, %v117_v7  ;;  %3298 = vmatpush3.bf16.msra.mxu1 %v3295_v15  ;;  %v436_v22 = vld [vmem:[#allocation2] sm:$0xff]  ;;  %v2739_v27 = vld [vmem:[%s4443_s3] ss:$0 sm:$0xff]  ;;  %s3760_s3 = smov 32  }
  0x62   :  { %2982 = vmatprep.mubr.msk.f32.mxu0 %vm133_vm1, %v118_v8  ;;  %3305 = vmatpush3.bf16.msra.mxu0 %v3933_v9  ;;  %v2748_v56 = vld [vmem:[%s4445_s5] ss:$0 sm:$0xff] }
  0x63   :  { %3306 = vmatprep.subr.bf16.mxu0 %v3757_v11  ;;  %3300 = vmatprep.subr.bf16.mxu1 %v3299_v25  ;;  %v554_v23 = vld [vmem:[#allocation2 + $0x8] sm:$0xff] }
  0x64   :  { %522 = vrot.lane.b32.xlu0 %v2757_v26, %s3759_s15  ;;  %v560_v24 = vld [vmem:[%s4448_s8] sm:$0xff]  ;;  %v562_v26 = vld [vmem:[%s4448_s8 + $0x10] sm:$0xff] }
  0x65   :  { %2983 = vmatmul.mubr.msk.f32.gmra.mrb[2].mxu0 %vm133_vm1, %v119_v16  ;;  %3302 = vmatpush3.bf16.msra.mxu1 %v3299_v25  ;;  %v561_v25 = vld [vmem:[%s4448_s8 + $0x8] sm:$0xff] }
  0x66   :  { %2985 = vmatprep.mubr.msk.f32.mxu0 %vm133_vm1, %v120_v18  ;;  %3308 = vmatpush3.bf16.msra.mxu0 %v3939_v17 }
  0x67   :  { %3321 = vmatprep.subr.bf16.mxu0 %v3757_v11  ;;  %3309 = vmatprep.subr.bf16.mxu1 %v3757_v11 }
  0x69   :  { %2986 = vmatmul.mubr.msk.f32.gmra.mrb[4].mxu0 %vm133_vm1, %v121_v19 }
  0x6a   :  { %2988 = vmatprep.mubr.msk.f32.mxu0 %vm133_vm1, %v122_v20 }
  0x6d   :  { %2989 = vmatmul.mubr.msk.f32.gmra.mrb[6].mxu0 %vm133_vm1, %v123_v21 }
  0x6e   :  { %3019 = vmatprep.mubr.msk.f32.mxu0 %vm3758_vm2, %v3756_v0 }
  0x71   :  { %3020 = vmatmul.mubr.msk.f32.vlgmr.msra.gmra.mrb[8].mxu0 %vm282_vm0, %v436_v22 }
  0x72   :  { %3323 = vmatpush3.bf16.msra.mxu0 %v3933_v9  ;;  %3049 = vmatprep.mubr.msk.f32.mxu0 %vm3758_vm2, %v3756_v0 }
  0x73   :  { %3324 = vmatprep.subr.bf16.mxu0 %v3757_v11 }
  0x76   :  { %3326 = vmatpush3.bf16.msra.mxu0 %v3939_v17 }
  0x77   :  { %3339 = vmatprep.subr.bf16.mxu0 %v3757_v11 }
  0xd6   :  { %v3971_v50 = vpop.permute.xlu0 %522 }
 0x134   :  { %v2981_v28 = vpop.f32.mrb[0].mxu0 }
 0x135   :  { %v230_v29 = vadd.f32 %v2981_v28, %v2739_v27  ;;  %v224_v30 = vpop.f32.mrb[1].mxu0  ;;  %v563_v28 = vld [vmem:[%s4448_s8 + $0x18] sm:$0xff] }
 0x136   :  { %v225_v31 = vadd.f32 %v2739_v27, %v224_v30  ;;  %v564_v30 = vld [vmem:[%s4448_s8 + $0x20] sm:$0xff] }
 0x137   :  { %v264_v34 = vmax.f32 %v230_v29, 0.0  ;;  %v4009_v29 = vpack.c.bf16 %v563_v28, %v562_v26 }
 0x138   :  { %v263_v32 = vmax.f32 %v225_v31, 0.0  ;;  %v2984_v33 = vpop.f32.mrb[2].mxu0  ;;  %v565_v31 = vld [vmem:[%s4448_s8 + $0x28] sm:$0xff] }
 0x139   :  { %v240_v35 = vadd.f32 %v2984_v33, %v2739_v27  ;;  %v234_v36 = vpop.f32.mrb[3].mxu0 }
 0x13a   :  { %2999 = vmatprep.mubr.msk.f32.mxu1 %vm282_vm0, %v263_v32  ;;  %v235_v37 = vadd.f32 %v2739_v27, %v234_v36  ;;  %v4019_v32 = vpack.c.bf16 %v565_v31, %v564_v30 }
 0x13b   :  { %3000 = vmatmul.mubr.msk.f32.vlgmr.msra.gmra.mrb[0].mxu1 %vm282_vm0, %v264_v34  ;;  %v266_v38 = vmax.f32 %v240_v35, 0.0  ;;  %v566_v34 = vld [vmem:[%s4448_s8 + $0x30] sm:$0xff]  ;;  %v567_v35 = vld [vmem:[%s4448_s8 + $0x38] sm:$0xff] }
 0x13c   :  { %v265_v39 = vmax.f32 %v235_v37, 0.0  ;;  %v2987_v40 = vpop.f32.mrb[4].mxu0  ;;  %v4030_v36 = vpack.c.bf16 %v567_v35, %v566_v34 }
 0x13d   :  { %v250_v41 = vadd.f32 %v2987_v40, %v2739_v27  ;;  %v244_v42 = vpop.f32.mrb[5].mxu0 }
 0x13e   :  { %v245_v43 = vadd.f32 %v2739_v27, %v244_v42  ;;  %3002 = vmatprep.mubr.msk.f32.mxu1 %vm282_vm0, %v265_v39 }
 0x13f   :  { %v268_v44 = vmax.f32 %v250_v41, 0.0  ;;  %3003 = vmatmul.mubr.msk.f32.gmra.mrb[2].mxu1 %vm282_vm0, %v266_v38 }
 0x140   :  { %v267_v45 = vmax.f32 %v245_v43, 0.0  ;;  %v2990_v46 = vpop.f32.mrb[6].mxu0 }
 0x141   :  { %v260_v47 = vadd.f32 %v2990_v46, %v2739_v27  ;;  %v254_v48 = vpop.f32.mrb[7].mxu0 }
 0x142   :  { %v255_v49 = vadd.f32 %v2739_v27, %v254_v48  ;;  %3005 = vmatprep.mubr.msk.f32.mxu1 %vm282_vm0, %v267_v45  ;;  %v4003_v27 = vpack.c.bf16 %v561_v25, %v560_v24 }
 0x143   :  { %v270_v51 = vmax.f32 %v260_v47, 0.0  ;;  %3006 = vmatmul.mubr.msk.f32.gmra.mrb[4].mxu1 %vm282_vm0, %v268_v44  ;;  %v4062_v47 = vld [vmem:[%s4449_s9] ss:$0 sm:$0xff] }
 0x144   :  { %v269_v52 = vmax.f32 %v255_v49, 0.0  ;;  %v511_v53 = vpop.f32.mrb[8].mxu0  ;;  %3311 = vmatpush3.bf16.msra.mxu1 %v4003_v27 }
 0x145   :  { %v525_v54 = vadd.f32 %v3971_v50, %v511_v53  ;;  %v3021_v55 = vpop.f32.mrb[9].mxu0  ;;  %3312 = vmatprep.subr.bf16.mxu1 %v3757_v11 }
 0x146   :  { %3008 = vmatprep.mubr.msk.f32.mxu1 %vm282_vm0, %v269_v52 }
 0x147   :  { %527 = vrot.lane.b32.xlu0 %v525_v54, %s3759_s15  ;;  %3009 = vmatmul.mubr.msk.f32.gmra.mrb[6].mxu1 %vm282_vm0, %v270_v51 }
 0x148   :  { %3038 = vmatprep.mubr.msk.f32.mxu1 %vm3758_vm2, %v3756_v0  ;;  %3314 = vmatpush3.bf16.msra.mxu1 %v4009_v29 }
 0x149   :  { %3315 = vmatprep.subr.bf16.mxu1 %v3757_v11 }
 0x14b   :  { %543 = vrot.lane.b32.xlu0 %v436_v22, %s3760_s3 }
 0x14c   :  { %3317 = vmatpush3.bf16.msra.mxu1 %v4019_v32 }
 0x14d   :  { %3318 = vmatprep.subr.bf16.mxu1 %v3757_v11 }
 0x14f   :  { %556 = vrot.lane.b32.xlu0 %v554_v23, %s3760_s3 }
 0x150   :  { %3320 = vmatpush3.bf16.msra.mxu1 %v4030_v36 }
 0x151   :  { %3327 = vmatprep.subr.bf16.mxu1 %v3757_v11 }
 0x1b9   :  { %v528_v19 = vpop.permute.xlu0 %527 }
 0x1bd   :  { %v544_v37 = vpop.permute.xlu0 %543 }
 0x1c1   :  { %v4036_v43 = vpop.permute.xlu0 %556 }
 0x20e   :  { %v3001_v57 = vpop.f32.mrb[0].mxu1 }
 0x20f   :  { %v379_v58 = vadd.f32 %v3001_v57, %v2748_v56  ;;  %v373_v59 = vpop.f32.mrb[1].mxu1 }
 0x210   :  { %v374_v60 = vadd.f32 %v2748_v56, %v373_v59 }
 0x211   :  { %414 = vst.msk [vmem:[#allocation3 + $0x8] sm:$0xff] %vm412_vm3, %v379_v58 }
 0x212   :  { %413 = vst.msk [vmem:[#allocation3] sm:$0xff] %vm412_vm3, %v374_v60  ;;  %v3004_v61 = vpop.f32.mrb[2].mxu1 }
 0x213   :  { %v389_v62 = vadd.f32 %v3004_v61, %v2748_v56  ;;  %v383_v63 = vpop.f32.mrb[3].mxu1 }
 0x214   :  { %v384_v1 = vadd.f32 %v2748_v56, %v383_v63 }
 0x215   :  { %416 = vst.msk [vmem:[#allocation3 + $0x18] sm:$0xff] %vm412_vm3, %v389_v62 }
 0x216   :  { %415 = vst.msk [vmem:[#allocation3 + $0x10] sm:$0xff] %vm412_vm3, %v384_v1  ;;  %v3007_v2 = vpop.f32.mrb[4].mxu1 }
 0x217   :  { %v399_v3 = vadd.f32 %v3007_v2, %v2748_v56  ;;  %v393_v4 = vpop.f32.mrb[5].mxu1 }
 0x218   :  { %v394_v5 = vadd.f32 %v2748_v56, %v393_v4 }
 0x219   :  { %v437_v6 = vld [vmem:[#allocation3] sm:$0xff]  ;;  %418 = vst.msk [vmem:[#allocation3 + $0x28] sm:$0xff] %vm412_vm3, %v399_v3 }
 0x21a   :  { %v515_v7 = vadd.f32 %v511_v53, %v437_v6  ;;  %417 = vst.msk [vmem:[#allocation3 + $0x20] sm:$0xff] %vm412_vm3, %v394_v5  ;;  %v3010_v8 = vpop.f32.mrb[6].mxu1 }
 0x21b   :  { %v409_v10 = vadd.f32 %v3010_v8, %v2748_v56  ;;  %v403_v12 = vpop.f32.mrb[7].mxu1 }
 0x21c   :  { %v2760_v13 = vmul.f32 -1.442695, %v515_v7  ;;  %v404_v14 = vadd.f32 %v2748_v56, %v403_v12  ;;  %v675_v56 = vld [vmem:[#allocation3 + $0x8] sm:$0xff] }
 0x21d   :  { %420 = vst.msk [vmem:[#allocation3 + $0x38] sm:$0xff] %vm412_vm3, %v409_v10 }
 0x21e   :  { %3480 = vpow2.f32 %v2760_v13  ;;  %419 = vst.msk [vmem:[#allocation3 + $0x30] sm:$0xff] %vm412_vm3, %v404_v14 }
 0x228   :  { %v3481_v15 = vpop.eup %3480 }
 0x229   :  { %v519_v16 = vadd.f32 1.0, %v3481_v15 }
 0x22b   :  { %3482 = vrcp.f32 %v519_v16 }
 0x235   :  { %v3483_v18 = vpop.eup %3482 }
 0x236   :  { %v530_v20 = vmul.f32 %v3483_v18, %v528_v19  ;;  %v537_v38 = vsub.f32 1.0, %v3483_v18  ;;  %v546_v40 = vmul.f32 %v3483_v18, %v544_v37 }
 0x238   :  { %532 = vrot.lane.b32.xlu1 %v530_v20, %s3759_s15 }
 0x2aa   :  { %v533_v21 = vpop.permute.xlu1 %532 }
 0x2ab   :  { %v535_v22 = vadd.f32 %v533_v21, %v437_v6 }
 0x2ad   :  { %3484 = vtanh.f32 %v535_v22 }
 0x2b7   :  { %v3485_v33 = vpop.eup %3484 }
 0x2b8   :  { %539 = vrot.lane.b32.xlu1 %v3485_v33, %s3761_s17 }
 0x32a   :  { %v540_v39 = vpop.permute.xlu1 %539 }
 0x32b   :  { %v542_v41 = vmul.f32 %v540_v39, %v537_v38 }
 0x32d   :  { %v547_v42 = vadd.f32 %v546_v40, %v542_v41 }
 0x32f   :  { %549 = vrot.lane.b32.xlu1 %v547_v42, %s3761_s17 }
 0x3a1   :  { %v550_v44 = vpop.permute.xlu1 %549 }
 0x3a2   :  { %552 = vst.msk [vmem:[#allocation2] sm:$0xff] %vm282_vm0, %v550_v44  ;;  %v559_v45 = vsel %vm282_vm0, %v550_v44, %v4036_v43 }
 0x3a3   :  { %3039 = vmatmul.mubr.msk.f32.vlgmr.msra.gmra.mrb[8].mxu1 %vm568_vm4, %v559_v45 }
 0x3a4   :  { %3329 = vmatpush3.bf16.msra.mxu1 %v4003_v27  ;;  %3068 = vmatprep.mubr.msk.f32.mxu1 %vm3758_vm2, %v3756_v0 }
 0x3a5   :  { %3330 = vmatprep.subr.bf16.mxu1 %v3757_v11 }
 0x3a8   :  { %3332 = vmatpush3.bf16.msra.mxu1 %v4009_v29 }
 0x3a9   :  { %v673_v46 = vld [vmem:[#allocation2] sm:$0xff]  ;;  %3333 = vmatprep.subr.bf16.mxu1 %v3757_v11 }
 0x3aa   :  { %3050 = vmatmul.mubr.msk.f32.vlgmr.msra.gmra.mrb[10].mxu0 %vm282_vm0, %v673_v46 }
 0x3ab   :  { %3341 = vmatpush3.bf16.msra.mxu0 %v3933_v9  ;;  %3079 = vmatprep.mubr.msk.f32.mxu0 %vm3758_vm2, %v3756_v0 }
 0x3ac   :  { %3335 = vmatpush3.bf16.msra.mxu1 %v4019_v32  ;;  %3342 = vmatprep.subr.bf16.mxu0 %v3757_v11 }
 0x3ad   :  { %3336 = vmatprep.subr.bf16.mxu1 %v3757_v11 }
 0x3af   :  { %3344 = vmatpush3.bf16.msra.mxu0 %v3939_v17 }
 0x3b0   :  { %3338 = vmatpush3.bf16.msra.mxu1 %v4030_v36  ;;  %3345 = vmatprep.subr.bf16.mxu0 %v3757_v11 }
 0x3b1   :  { %3363 = vmatprep.subr.bf16.mxu1 %v3757_v11 }
 0x476   :  { %v638_v48 = vpop.f32.mrb[8].mxu1 }
 0x477   :  { %v639_v49 = vadd.f32 %v4062_v47, %v638_v48  ;;  %v3040_v51 = vpop.f32.mrb[9].mxu1 }
 0x479   :  { %649 = vrot.lane.b32.xlu1 %v639_v49, %s3760_s3  ;;  %v2762_v55 = vmul.f32 -1.442695, %v639_v49 }
 0x47b   :  { %3486 = vpow2.f32 %v2762_v55 }
 0x47d   :  { %v749_v52 = vpop.f32.mrb[10].mxu0 }
 0x47e   :  { %v760_v53 = vadd.f32 %v749_v52, %v3971_v50  ;;  %v3051_v54 = vpop.f32.mrb[11].mxu0  ;;  %v753_v57 = vadd.f32 %v749_v52, %v675_v56 }
 0x480   :  { %762 = vrot.lane.b32.xlu1 %v760_v53, %s3759_s15  ;;  %v2764_v58 = vmul.f32 -1.442695, %v753_v57 }
 0x482   :  { %3488 = vpow2.f32 %v2764_v58 }
 0x485   :  { %v3487_v59 = vpop.eup %3486 }
 0x486   :  { %v645_v60 = vadd.f32 1.0, %v3487_v59 }
 0x488   :  { %3490 = vrcp.f32 %v645_v60 }
 0x48c   :  { %v3489_v61 = vpop.eup %3488 }
 0x48d   :  { %v757_v62 = vadd.f32 1.0, %v3489_v61 }
 0x48f   :  { %3492 = vrcp.f32 %v757_v62 }
 0x492   :  { %v3491_v63 = vpop.eup %3490 }
 0x493   :  { %v659_v14 = vsub.f32 1.0, %v3491_v63  ;;  %v665_v16 = vmul.f32 %v3491_v63, %v4036_v43  ;;  %v909_v43 = vld [vmem:[#allocation3 + $0x10] sm:$0xff] }
 0x499   :  { %v3493_v3 = vpop.eup %3492 }
 0x49a   :  { %v772_v22 = vsub.f32 1.0, %v3493_v3 }
 0x4eb   :  { %v650_v1 = vpop.permute.xlu1 %649 }
 0x4ec   :  { %v652_v2 = vmul.f32 %v3491_v63, %v650_v1 }
 0x4ee   :  { %654 = vrot.lane.b32.xlu0 %v652_v2, %s3759_s15 }
 0x4f2   :  { %v763_v4 = vpop.permute.xlu1 %762 }
 0x4f3   :  { %v765_v5 = vmul.f32 %v3493_v3, %v763_v4 }
 0x4f5   :  { %767 = vrot.lane.b32.xlu0 %v765_v5, %s3759_s15 }
 0x560   :  { %v655_v6 = vpop.permute.xlu0 %654 }
 0x561   :  { %v657_v7 = vadd.f32 %v655_v6, %v639_v49 }
 0x563   :  { %3494 = vtanh.f32 %v657_v7 }
 0x567   :  { %v768_v8 = vpop.permute.xlu0 %767 }
 0x568   :  { %v770_v10 = vadd.f32 %v768_v8, %v675_v56 }
 0x56a   :  { %3496 = vtanh.f32 %v770_v10 }
 0x56d   :  { %v3495_v12 = vpop.eup %3494 }
 0x56e   :  { %661 = vrot.lane.b32.xlu1 %v3495_v12, %s3761_s17 }
 0x574   :  { %v3497_v13 = vpop.eup %3496 }
 0x575   :  { %774 = vrot.lane.b32.xlu1 %v3497_v13, %s3761_s17 }
 0x5e0   :  { %v662_v15 = vpop.permute.xlu1 %661 }
 0x5e1   :  { %v664_v18 = vmul.f32 %v662_v15, %v659_v14 }
 0x5e3   :  { %v666_v19 = vadd.f32 %v665_v16, %v664_v18 }
 0x5e5   :  { %668 = vrot.lane.b32.xlu0 %v666_v19, %s3761_s17 }
 0x5e7   :  { %v775_v21 = vpop.permute.xlu1 %774 }
 0x5e8   :  { %v777_v24 = vmul.f32 %v775_v21, %v772_v22 }
 0x5e9   :  { %778 = vrot.lane.b32.xlu0 %v673_v46, %s3760_s3 }
 0x657   :  { %v669_v20 = vpop.permute.xlu0 %668 }
 0x658   :  { %671 = vst.msk [vmem:[#allocation2 + $0x8] sm:$0xff] %vm282_vm0, %v669_v20  ;;  %672 = vst.msk [vmem:[#allocation4] sm:$0xff] %vm282_vm0, %v669_v20 }
 0x65b   :  { %v779_v23 = vpop.permute.xlu0 %778 }
 0x65c   :  { %v781_v25 = vmul.f32 %v3493_v3, %v779_v23 }
 0x65e   :  { %v782_v26 = vadd.f32 %v781_v25, %v777_v24 }
 0x65f   :  { %v788_v28 = vld [vmem:[#allocation2 + $0x8] sm:$0xff] }
 0x660   :  { %790 = vrot.lane.b32.xlu0 %v788_v28, %s3760_s3  ;;  %784 = vrot.lane.b32.xlu1 %v782_v26, %s3761_s17  ;;  %v1143_v28 = vld [vmem:[#allocation3 + $0x18] sm:$0xff] }
 0x6d2   :  { %v785_v30 = vpop.permute.xlu1 %784  ;;  %v4079_v31 = vpop.permute.xlu0 %790 }
 0x6d3   :  { %787 = vst.msk [vmem:[#allocation2] sm:$0xff] %vm282_vm0, %v785_v30  ;;  %v793_v33 = vsel %vm282_vm0, %v785_v30, %v4079_v31 }
 0x6d4   :  { %3069 = vmatmul.mubr.msk.f32.vlgmr.msra.gmra.mrb[10].mxu1 %vm568_vm4, %v793_v33 }
 0x6d5   :  { %3365 = vmatpush3.bf16.msra.mxu1 %v4003_v27  ;;  %3128 = vmatprep.mubr.msk.f32.mxu1 %vm3758_vm2, %v3756_v0 }
 0x6d6   :  { %3366 = vmatprep.subr.bf16.mxu1 %v3757_v11 }
 0x6d9   :  { %3368 = vmatpush3.bf16.msra.mxu1 %v4009_v29 }
 0x6da   :  { %v907_v34 = vld [vmem:[#allocation2] sm:$0xff]  ;;  %3369 = vmatprep.subr.bf16.mxu1 %v3757_v11 }
 0x6db   :  { %3080 = vmatmul.mubr.msk.f32.vlgmr.msra.gmra.mrb[12].mxu0 %vm282_vm0, %v907_v34 }
 0x6dc   :  { %3347 = vmatpush3.bf16.msra.mxu0 %v4003_v27  ;;  %3098 = vmatprep.mubr.msk.f32.mxu0 %vm3758_vm2, %v3756_v0 }
 0x6dd   :  { %3348 = vmatprep.subr.bf16.mxu0 %v3757_v11  ;;  %3371 = vmatpush3.bf16.msra.mxu1 %v4019_v32 }
 0x6de   :  { %3372 = vmatprep.subr.bf16.mxu1 %v3757_v11 }
 0x6e0   :  { %3350 = vmatpush3.bf16.msra.mxu0 %v4009_v29 }
 0x6e1   :  { %3351 = vmatprep.subr.bf16.mxu0 %v3757_v11  ;;  %3374 = vmatpush3.bf16.msra.mxu1 %v4030_v36 }
 0x6e2   :  { %3393 = vmatprep.subr.bf16.mxu1 %v3757_v11 }
 0x6e4   :  { %3353 = vmatpush3.bf16.msra.mxu0 %v4019_v32 }
 0x6e5   :  { %3354 = vmatprep.subr.bf16.mxu0 %v3757_v11 }
 0x6e8   :  { %3356 = vmatpush3.bf16.msra.mxu0 %v4030_v36 }
 0x6e9   :  { %3357 = vmatprep.subr.bf16.mxu0 %v3757_v11 }
 0x7a7   :  { %v871_v35 = vpop.f32.mrb[10].mxu1 }
 0x7a8   :  { %v872_v37 = vadd.f32 %v4062_v47, %v871_v35  ;;  %v3070_v38 = vpop.f32.mrb[11].mxu1 }
 0x7aa   :  { %882 = vrot.lane.b32.xlu1 %v872_v37, %s3760_s3  ;;  %v2766_v42 = vmul.f32 -1.442695, %v872_v37 }
 0x7ac   :  { %3498 = vpow2.f32 %v2766_v42 }
 0x7ae   :  { %v983_v39 = vpop.f32.mrb[12].mxu0 }
 0x7af   :  { %v994_v40 = vadd.f32 %v983_v39, %v3971_v50  ;;  %v3081_v41 = vpop.f32.mrb[13].mxu0  ;;  %v987_v44 = vadd.f32 %v983_v39, %v909_v43 }
 0x7b1   :  { %996 = vrot.lane.b32.xlu1 %v994_v40, %s3759_s15  ;;  %v2768_v45 = vmul.f32 -1.442695, %v987_v44 }
 0x7b3   :  { %3500 = vpow2.f32 %v2768_v45 }
 0x7b6   :  { %v3499_v46 = vpop.eup %3498 }
 0x7b7   :  { %v878_v48 = vadd.f32 1.0, %v3499_v46 }
 0x7b9   :  { %3502 = vrcp.f32 %v878_v48 }
 0x7bd   :  { %v3501_v49 = vpop.eup %3500 }
 0x7be   :  { %v991_v51 = vadd.f32 1.0, %v3501_v49 }
 0x7c0   :  { %3504 = vrcp.f32 %v991_v51 }
 0x7c3   :  { %v3503_v52 = vpop.eup %3502 }
 0x7c4   :  { %v892_v1 = vsub.f32 1.0, %v3503_v52  ;;  %v898_v3 = vmul.f32 %v3503_v52, %v4079_v31 }
 0x7ca   :  { %v3505_v55 = vpop.eup %3504 }
 0x7cb   :  { %v1006_v8 = vsub.f32 1.0, %v3505_v55 }
 0x81c   :  { %v883_v53 = vpop.permute.xlu1 %882 }
 0x81d   :  { %v885_v54 = vmul.f32 %v3503_v52, %v883_v53 }
 0x81f   :  { %887 = vrot.lane.b32.xlu0 %v885_v54, %s3759_s15 }
 0x823   :  { %v997_v56 = vpop.permute.xlu1 %996 }
 0x824   :  { %v999_v57 = vmul.f32 %v3505_v55, %v997_v56 }
 0x826   :  { %1001 = vrot.lane.b32.xlu0 %v999_v57, %s3759_s15 }
 0x891   :  { %v888_v58 = vpop.permute.xlu0 %887 }
 0x892   :  { %v890_v59 = vadd.f32 %v888_v58, %v872_v37 }
 0x894   :  { %3506 = vtanh.f32 %v890_v59 }
 0x898   :  { %v1002_v60 = vpop.permute.xlu0 %1001 }
 0x899   :  { %v1004_v61 = vadd.f32 %v1002_v60, %v909_v43 }
 0x89b   :  { %3508 = vtanh.f32 %v1004_v61 }
 0x89e   :  { %v3507_v62 = vpop.eup %3506 }
 0x89f   :  { %894 = vrot.lane.b32.xlu1 %v3507_v62, %s3761_s17 }
 0x8a5   :  { %v3509_v63 = vpop.eup %3508 }
 0x8a6   :  { %1008 = vrot.lane.b32.xlu1 %v3509_v63, %s3761_s17 }
 0x911   :  { %v895_v2 = vpop.permute.xlu1 %894 }
 0x912   :  { %v897_v4 = vmul.f32 %v895_v2, %v892_v1 }
 0x914   :  { %v899_v5 = vadd.f32 %v898_v3, %v897_v4 }
 0x916   :  { %901 = vrot.lane.b32.xlu0 %v899_v5, %s3761_s17 }
 0x918   :  { %v1009_v7 = vpop.permute.xlu1 %1008 }
 0x919   :  { %v1011_v12 = vmul.f32 %v1009_v7, %v1006_v8 }
 0x91a   :  { %1012 = vrot.lane.b32.xlu0 %v907_v34, %s3760_s3 }
 0x988   :  { %v902_v6 = vpop.permute.xlu0 %901 }
 0x989   :  { %904 = vst.msk [vmem:[#allocation2 + $0x8] sm:$0xff] %vm282_vm0, %v902_v6  ;;  %906 = vst.msk [vmem:[#allocation4 + $0x8] sm:$0xff] %vm282_vm0, %v902_v6 }
 0x98c   :  { %v1013_v10 = vpop.permute.xlu0 %1012 }
 0x98d   :  { %v1015_v13 = vmul.f32 %v3505_v55, %v1013_v10 }
 0x98f   :  { %v1016_v14 = vadd.f32 %v1015_v13, %v1011_v12 }
 0x990   :  { %v1022_v15 = vld [vmem:[#allocation2 + $0x8] sm:$0xff] }
 0x991   :  { %1024 = vrot.lane.b32.xlu0 %v1022_v15, %s3760_s3  ;;  %1018 = vrot.lane.b32.xlu1 %v1016_v14, %s3761_s17  ;;  %v1377_v15 = vld [vmem:[#allocation3 + $0x20] sm:$0xff] }
 0xa03   :  { %v1019_v16 = vpop.permute.xlu1 %1018  ;;  %v1025_v18 = vpop.permute.xlu0 %1024 }
 0xa04   :  { %1021 = vst.msk [vmem:[#allocation2] sm:$0xff] %vm282_vm0, %v1019_v16  ;;  %v1027_v19 = vsel %vm282_vm0, %v1019_v16, %v1025_v18 }
 0xa05   :  { %3099 = vmatmul.mubr.msk.f32.vlgmr.msra.gmra.mrb[14].mxu0 %vm568_vm4, %v1027_v19 }
 0xa06   :  { %3359 = vmatpush3.bf16.msra.mxu0 %v3933_v9  ;;  %3109 = vmatprep.mubr.msk.f32.mxu0 %vm3758_vm2, %v3756_v0 }
 0xa07   :  { %3360 = vmatprep.subr.bf16.mxu0 %v3757_v11 }
 0xa0a   :  { %3362 = vmatpush3.bf16.msra.mxu0 %v3939_v17 }
 0xa0b   :  { %v1141_v20 = vld [vmem:[#allocation2] sm:$0xff]  ;;  %3375 = vmatprep.subr.bf16.mxu0 %v3757_v11 }
 0xa0d   :  { %3110 = vmatmul.mubr.msk.f32.vlgmr.msra.gmra.mrb[16].mxu0 %vm282_vm0, %v1141_v20 }
 0xa0e   :  { %3377 = vmatpush3.bf16.msra.mxu0 %v3933_v9  ;;  %3139 = vmatprep.mubr.msk.f32.mxu0 %vm3758_vm2, %v3756_v0 }
 0xa0f   :  { %3378 = vmatprep.subr.bf16.mxu0 %v3757_v11 }
 0xa12   :  { %3380 = vmatpush3.bf16.msra.mxu0 %v3939_v17 }
 0xa13   :  { %3381 = vmatprep.subr.bf16.mxu0 %v3757_v11 }
 0xad8   :  { %v1105_v21 = vpop.f32.mrb[14].mxu0 }
 0xad9   :  { %v1106_v22 = vadd.f32 %v4062_v47, %v1105_v21  ;;  %v3100_v23 = vpop.f32.mrb[15].mxu0 }
 0xadb   :  { %1116 = vrot.lane.b32.xlu1 %v1106_v22, %s3760_s3  ;;  %v2770_v9 = vmul.f32 -1.442695, %v1106_v22 }
 0xadd   :  { %3510 = vpow2.f32 %v2770_v9 }
 0xae0   :  { %v1217_v24 = vpop.f32.mrb[16].mxu0 }
 0xae1   :  { %v1228_v25 = vadd.f32 %v1217_v24, %v3971_v50  ;;  %v3111_v26 = vpop.f32.mrb[17].mxu0  ;;  %v1221_v30 = vadd.f32 %v1217_v24, %v1143_v28 }
 0xae3   :  { %1230 = vrot.lane.b32.xlu1 %v1228_v25, %s3759_s15  ;;  %v2772_v31 = vmul.f32 -1.442695, %v1221_v30 }
 0xae5   :  { %3512 = vpow2.f32 %v2772_v31 }
 0xae7   :  { %v3511_v33 = vpop.eup %3510 }
 0xae8   :  { %v1112_v34 = vadd.f32 1.0, %v3511_v33 }
 0xaea   :  { %3514 = vrcp.f32 %v1112_v34 }
 0xaef   :  { %v3513_v35 = vpop.eup %3512 }
 0xaf0   :  { %v1225_v37 = vadd.f32 1.0, %v3513_v35 }
 0xaf2   :  { %3516 = vrcp.f32 %v1225_v37 }
 0xaf4   :  { %v3515_v38 = vpop.eup %3514 }
 0xaf5   :  { %v1126_v52 = vsub.f32 1.0, %v3515_v38  ;;  %v1132_v54 = vmul.f32 %v3515_v38, %v1025_v18 }
 0xafc   :  { %v3517_v41 = vpop.eup %3516 }
 0xafd   :  { %v1240_v59 = vsub.f32 1.0, %v3517_v41 }
 0xb4d   :  { %v1117_v39 = vpop.permute.xlu1 %1116 }
 0xb4e   :  { %v1119_v40 = vmul.f32 %v3515_v38, %v1117_v39 }
 0xb50   :  { %1121 = vrot.lane.b32.xlu0 %v1119_v40, %s3759_s15 }
 0xb55   :  { %v1231_v42 = vpop.permute.xlu1 %1230 }
 0xb56   :  { %v1233_v43 = vmul.f32 %v3517_v41, %v1231_v42 }
 0xb58   :  { %1235 = vrot.lane.b32.xlu0 %v1233_v43, %s3759_s15  ;;  %v1612_v43 = vld [vmem:[#allocation11] sm:$0xff] }
 0xbc2   :  { %v1122_v44 = vpop.permute.xlu0 %1121 }
 0xbc3   :  { %v1124_v45 = vadd.f32 %v1122_v44, %v1106_v22  ;;  %v1613_v44 = vld [vmem:[#allocation11 + $0x8] sm:$0xff] }
 0xbc5   :  { %3518 = vtanh.f32 %v1124_v45  ;;  %v4177_v45 = vpack.c.bf16 %v1613_v44, %v1612_v43 }
 0xbca   :  { %v1236_v46 = vpop.permute.xlu0 %1235 }
 0xbcb   :  { %v1238_v48 = vadd.f32 %v1236_v46, %v1143_v28 }
 0xbcd   :  { %3520 = vtanh.f32 %v1238_v48 }
 0xbcf   :  { %v3519_v49 = vpop.eup %3518 }
 0xbd0   :  { %1128 = vrot.lane.b32.xlu1 %v3519_v49, %s3761_s17 }
 0xbd7   :  { %v3521_v51 = vpop.eup %3520 }
 0xbd8   :  { %1242 = vrot.lane.b32.xlu1 %v3521_v51, %s3761_s17 }
 0xc42   :  { %v1129_v53 = vpop.permute.xlu1 %1128 }
 0xc43   :  { %v1131_v55 = vmul.f32 %v1129_v53, %v1126_v52 }
 0xc45   :  { %v1133_v56 = vadd.f32 %v1132_v54, %v1131_v55 }
 0xc47   :  { %1135 = vrot.lane.b32.xlu0 %v1133_v56, %s3761_s17 }
 0xc4a   :  { %v1243_v58 = vpop.permute.xlu1 %1242 }
 0xc4b   :  { %1246 = vrot.lane.b32.xlu0 %v1141_v20, %s3760_s3  ;;  %v1245_v61 = vmul.f32 %v1243_v58, %v1240_v59 }
 0xcb9   :  { %v1136_v57 = vpop.permute.xlu0 %1135 }
 0xcba   :  { %1138 = vst.msk [vmem:[#allocation2 + $0x8] sm:$0xff] %vm282_vm0, %v1136_v57  ;;  %1140 = vst.msk [vmem:[#allocation4 + $0x10] sm:$0xff] %vm282_vm0, %v1136_v57 }
 0xcbd   :  { %v1247_v60 = vpop.permute.xlu0 %1246 }
 0xcbe   :  { %v1249_v62 = vmul.f32 %v3517_v41, %v1247_v60 }
 0xcc0   :  { %v1250_v63 = vadd.f32 %v1249_v62, %v1245_v61 }
 0xcc1   :  { %v1256_v1 = vld [vmem:[#allocation2 + $0x8] sm:$0xff] }
 0xcc2   :  { %1258 = vrot.lane.b32.xlu0 %v1256_v1, %s3760_s3  ;;  %1252 = vrot.lane.b32.xlu1 %v1250_v63, %s3761_s17 }
 0xd34   :  { %v1253_v2 = vpop.permute.xlu1 %1252  ;;  %v1259_v3 = vpop.permute.xlu0 %1258 }
 0xd35   :  { %1255 = vst.msk [vmem:[#allocation2] sm:$0xff] %vm282_vm0, %v1253_v2  ;;  %v1261_v4 = vsel %vm282_vm0, %v1253_v2, %v1259_v3 }
 0xd36   :  { %3129 = vmatmul.mubr.msk.f32.vlgmr.msra.gmra.mrb[12].mxu1 %vm568_vm4, %v1261_v4 }
 0xd37   :  { %3169 = vmatprep.mubr.msk.f32.mxu1 %vm3758_vm2, %v3756_v0  ;;  %3395 = vmatpush3.bf16.msra.mxu1 %v4177_v45 }
 0xd38   :  { %3396 = vmatprep.subr.bf16.mxu1 %v3757_v11 }
 0xd3b   :  { %3398 = vmatpush3.bf16.msra.mxu1 %v3939_v17 }
 0xd3c   :  { %v1375_v5 = vld [vmem:[#allocation2] sm:$0xff]  ;;  %3399 = vmatprep.subr.bf16.mxu1 %v3757_v11 }
 0xd3d   :  { %3140 = vmatmul.mubr.msk.f32.vlgmr.msra.gmra.mrb[18].mxu0 %vm282_vm0, %v1375_v5 }
 0xd3e   :  { %3383 = vmatpush3.bf16.msra.mxu0 %v4003_v27  ;;  %3158 = vmatprep.mubr.msk.f32.mxu0 %vm3758_vm2, %v3756_v0 }
 0xd3f   :  { %3384 = vmatprep.subr.bf16.mxu0 %v3757_v11 }
 0xd42   :  { %3386 = vmatpush3.bf16.msra.mxu0 %v4009_v29 }
 0xd43   :  { %3387 = vmatprep.subr.bf16.mxu0 %v3757_v11 }
 0xd46   :  { %3389 = vmatpush3.bf16.msra.mxu0 %v4019_v32 }
 0xd47   :  { %3390 = vmatprep.subr.bf16.mxu0 %v3757_v11 }
 0xd4a   :  { %3392 = vmatpush3.bf16.msra.mxu0 %v4030_v36 }
 0xd4b   :  { %3411 = vmatprep.subr.bf16.mxu0 %v3757_v11 }
 0xe09   :  { %v1339_v6 = vpop.f32.mrb[12].mxu1 }
 0xe0a   :  { %v1340_v7 = vadd.f32 %v4062_v47, %v1339_v6  ;;  %v3130_v8 = vpop.f32.mrb[13].mxu1 }
 0xe0c   :  { %1350 = vrot.lane.b32.xlu1 %v1340_v7, %s3760_s3  ;;  %v2774_v14 = vmul.f32 -1.442695, %v1340_v7 }
 0xe0e   :  { %3522 = vpow2.f32 %v2774_v14 }
 0xe10   :  { %v1451_v10 = vpop.f32.mrb[18].mxu0 }
 0xe11   :  { %v1462_v12 = vadd.f32 %v1451_v10, %v3971_v50  ;;  %v3141_v13 = vpop.f32.mrb[19].mxu0  ;;  %v1455_v16 = vadd.f32 %v1451_v10, %v1377_v15 }
 0xe13   :  { %1464 = vrot.lane.b32.xlu1 %v1462_v12, %s3759_s15  ;;  %v2776_v18 = vmul.f32 -1.442695, %v1455_v16 }
 0xe15   :  { %3524 = vpow2.f32 %v2776_v18 }
 0xe18   :  { %v3523_v19 = vpop.eup %3522 }
 0xe19   :  { %v1346_v20 = vadd.f32 1.0, %v3523_v19 }
 0xe1b   :  { %3526 = vrcp.f32 %v1346_v20 }
 0xe1f   :  { %v3525_v21 = vpop.eup %3524 }
 0xe20   :  { %v1459_v22 = vadd.f32 1.0, %v3525_v21 }
 0xe22   :  { %3528 = vrcp.f32 %v1459_v22 }
 0xe25   :  { %v3527_v23 = vpop.eup %3526 }
 0xe26   :  { %v1360_v38 = vsub.f32 1.0, %v3527_v23  ;;  %v1366_v40 = vmul.f32 %v3527_v23, %v1259_v3 }
 0xe2c   :  { %v3529_v26 = vpop.eup %3528 }
 0xe2d   :  { %v1474_v49 = vsub.f32 1.0, %v3529_v26 }
 0xe7e   :  { %v1351_v24 = vpop.permute.xlu1 %1350 }
 0xe7f   :  { %v1353_v25 = vmul.f32 %v3527_v23, %v1351_v24 }
 0xe81   :  { %1355 = vrot.lane.b32.xlu0 %v1353_v25, %s3759_s15 }
 0xe85   :  { %v1465_v9 = vpop.permute.xlu1 %1464 }
 0xe86   :  { %v1467_v28 = vmul.f32 %v3529_v26, %v1465_v9  ;;  %v1849_v9 = vld [vmem:[#allocation11 + $0x18] sm:$0xff] }
 0xe88   :  { %1469 = vrot.lane.b32.xlu0 %v1467_v28, %s3759_s15 }
 0xef3   :  { %v1356_v30 = vpop.permute.xlu0 %1355 }
 0xef4   :  { %v1358_v31 = vadd.f32 %v1356_v30, %v1340_v7 }
 0xef6   :  { %3530 = vtanh.f32 %v1358_v31 }
 0xefa   :  { %v1470_v33 = vpop.permute.xlu0 %1469 }
 0xefb   :  { %v1472_v34 = vadd.f32 %v1470_v33, %v1377_v15 }
 0xefd   :  { %3532 = vtanh.f32 %v1472_v34 }
 0xf00   :  { %v3531_v35 = vpop.eup %3530 }
 0xf01   :  { %1362 = vrot.lane.b32.xlu1 %v3531_v35, %s3761_s17 }
 0xf07   :  { %v3533_v37 = vpop.eup %3532 }
 0xf08   :  { %1476 = vrot.lane.b32.xlu1 %v3533_v37, %s3761_s17 }
 0xf73   :  { %v1363_v39 = vpop.permute.xlu1 %1362 }
 0xf74   :  { %v1365_v41 = vmul.f32 %v1363_v39, %v1360_v38 }
 0xf76   :  { %v1367_v42 = vadd.f32 %v1366_v40, %v1365_v41 }
 0xf78   :  { %1369 = vrot.lane.b32.xlu0 %v1367_v42, %s3761_s17 }
 0xf7a   :  { %v1477_v48 = vpop.permute.xlu1 %1476 }
 0xf7b   :  { %v1479_v52 = vmul.f32 %v1477_v48, %v1474_v49 }
 0xf7c   :  { %1480 = vrot.lane.b32.xlu0 %v1375_v5, %s3760_s3 }
 0xfea   :  { %v1370_v46 = vpop.permute.xlu0 %1369 }
 0xfeb   :  { %1372 = vst.msk [vmem:[#allocation2 + $0x8] sm:$0xff] %vm282_vm0, %v1370_v46  ;;  %1374 = vst.msk [vmem:[#allocation4 + $0x18] sm:$0xff] %vm282_vm0, %v1370_v46 }
 0xfee   :  { %v1481_v51 = vpop.permute.xlu0 %1480 }
 0xfef   :  { %v1483_v53 = vmul.f32 %v3529_v26, %v1481_v51  ;;  %v1848_v26 = vld [vmem:[#allocation11 + $0x10] sm:$0xff] }
 0xff0   :  { %v3415_v28 = vpack.c.bf16 %v1849_v9, %v1848_v26 }
 0xff1   :  { %v1484_v54 = vadd.f32 %v1483_v53, %v1479_v52  ;;  %v1845_v53 = vld [vmem:[#allocation3 + $0x30] sm:$0xff] }
 0xff2   :  { %v1490_v55 = vld [vmem:[#allocation2 + $0x8] sm:$0xff] }
 0xff3   :  { %1492 = vrot.lane.b32.xlu0 %v1490_v55, %s3760_s3  ;;  %1486 = vrot.lane.b32.xlu1 %v1484_v54, %s3761_s17 }
0x1065   :  { %v1487_v56 = vpop.permute.xlu1 %1486  ;;  %v1493_v57 = vpop.permute.xlu0 %1492 }
0x1066   :  { %1489 = vst.msk [vmem:[#allocation2] sm:$0xff] %vm282_vm0, %v1487_v56  ;;  %v1495_v58 = vsel %vm282_vm0, %v1487_v56, %v1493_v57 }
0x1067   :  { %3159 = vmatmul.mubr.msk.f32.vlgmr.msra.gmra.mrb[20].mxu0 %vm568_vm4, %v1495_v58 }
0x1068   :  { %3413 = vmatpush3.bf16.msra.mxu0 %v4177_v45  ;;  %3199 = vmatprep.mubr.msk.f32.mxu0 %vm3758_vm2, %v3756_v0 }
0x1069   :  { %3414 = vmatprep.subr.bf16.mxu0 %v3757_v11 }
0x106c   :  { %3416 = vmatpush3.bf16.msra.mxu0 %v3415_v28 }
0x106d   :  { %v1609_v17 = vld [vmem:[#allocation2] sm:$0xff]  ;;  %3417 = vmatprep.subr.bf16.mxu0 %v3757_v11 }
0x106e   :  { %3170 = vmatmul.mubr.msk.f32.vlgmr.msra.gmra.mrb[14].mxu1 %vm282_vm0, %v1609_v17 }
0x106f   :  { %3401 = vmatpush3.bf16.msra.mxu1 %v4003_v27  ;;  %3188 = vmatprep.mubr.msk.f32.mxu1 %vm3758_vm2, %v3756_v0 }
0x1070   :  { %3402 = vmatprep.subr.bf16.mxu1 %v3757_v11 }
0x1073   :  { %3404 = vmatpush3.bf16.msra.mxu1 %v4009_v29 }
0x1074   :  { %3405 = vmatprep.subr.bf16.mxu1 %v3757_v11 }
0x1077   :  { %3407 = vmatpush3.bf16.msra.mxu1 %v4019_v32  ;;  %v1611_v32 = vld [vmem:[#allocation3 + $0x28] sm:$0xff] }
0x1078   :  { %3408 = vmatprep.subr.bf16.mxu1 %v3757_v11 }
0x107b   :  { %3410 = vmatpush3.bf16.msra.mxu1 %v4030_v36 }
0x107c   :  { %3429 = vmatprep.subr.bf16.mxu1 %v3757_v11 }
0x113a   :  { %v1573_v59 = vpop.f32.mrb[20].mxu0 }
0x113b   :  { %v1574_v27 = vadd.f32 %v4062_v47, %v1573_v59  ;;  %v3160_v60 = vpop.f32.mrb[21].mxu0 }
0x113d   :  { %1584 = vrot.lane.b32.xlu1 %v1574_v27, %s3760_s3  ;;  %v2778_v63 = vmul.f32 -1.442695, %v1574_v27 }
0x113f   :  { %3534 = vpow2.f32 %v2778_v63 }
0x1141   :  { %v1685_v61 = vpop.f32.mrb[14].mxu1 }
0x1142   :  { %v1696_v62 = vadd.f32 %v1685_v61, %v3971_v50  ;;  %v3171_v29 = vpop.f32.mrb[15].mxu1  ;;  %v1689_v1 = vadd.f32 %v1685_v61, %v1611_v32 }
0x1144   :  { %1698 = vrot.lane.b32.xlu1 %v1696_v62, %s3759_s15  ;;  %v2780_v2 = vmul.f32 -1.442695, %v1689_v1 }
0x1146   :  { %3536 = vpow2.f32 %v2780_v2 }
0x1149   :  { %v3535_v36 = vpop.eup %3534 }
0x114a   :  { %v1580_v3 = vadd.f32 1.0, %v3535_v36 }
0x114c   :  { %3538 = vrcp.f32 %v1580_v3 }
0x1150   :  { %v3537_v4 = vpop.eup %3536 }
0x1151   :  { %v1693_v5 = vadd.f32 1.0, %v3537_v4 }
0x1153   :  { %3540 = vrcp.f32 %v1693_v5 }
0x1156   :  { %v3539_v6 = vpop.eup %3538 }
0x1157   :  { %v1594_v21 = vsub.f32 1.0, %v3539_v6  ;;  %v1600_v23 = vmul.f32 %v3539_v6, %v1493_v57 }
0x115d   :  { %v3541_v10 = vpop.eup %3540 }
0x115e   :  { %v1708_v33 = vsub.f32 1.0, %v3541_v10 }
0x11af   :  { %v1585_v7 = vpop.permute.xlu1 %1584 }
0x11b0   :  { %v1587_v8 = vmul.f32 %v3539_v6, %v1585_v7  ;;  %v1964_v6 = vld [vmem:[%s4448_s8] sm:$0xff]  ;;  %v1965_v7 = vld [vmem:[%s4448_s8 + $0x8] sm:$0xff] }
0x11b2   :  { %1589 = vrot.lane.b32.xlu0 %v1587_v8, %s3759_s15  ;;  %v1966_v8 = vld [vmem:[%s4448_s8 + $0x10] sm:$0xff] }
0x11b6   :  { %v1699_v12 = vpop.permute.xlu1 %1698 }
0x11b7   :  { %v1701_v13 = vmul.f32 %v3541_v10, %v1699_v12 }
0x11b9   :  { %1703 = vrot.lane.b32.xlu0 %v1701_v13, %s3759_s15  ;;  %v3418_v13 = vpack.c.bf16 %v1965_v7, %v1964_v6 }
0x1224   :  { %v1590_v14 = vpop.permute.xlu0 %1589 }
0x1225   :  { %v1592_v15 = vadd.f32 %v1590_v14, %v1574_v27  ;;  %v1967_v14 = vld [vmem:[%s4448_s8 + $0x18] sm:$0xff] }
0x1227   :  { %3542 = vtanh.f32 %v1592_v15 }
0x122b   :  { %v1704_v16 = vpop.permute.xlu0 %1703 }
0x122c   :  { %v1706_v18 = vadd.f32 %v1704_v16, %v1611_v32  ;;  %v3421_v16 = vpack.c.bf16 %v1967_v14, %v1966_v8 }
0x122e   :  { %3544 = vtanh.f32 %v1706_v18  ;;  %v1968_v18 = vld [vmem:[%s4448_s8 + $0x20] sm:$0xff] }
0x1231   :  { %v3543_v19 = vpop.eup %3542 }
0x1232   :  { %1596 = vrot.lane.b32.xlu1 %v3543_v19, %s3761_s17  ;;  %v1969_v19 = vld [vmem:[%s4448_s8 + $0x28] sm:$0xff] }
0x1238   :  { %v3545_v20 = vpop.eup %3544 }
0x1239   :  { %1710 = vrot.lane.b32.xlu1 %v3545_v20, %s3761_s17  ;;  %v3424_v20 = vpack.c.bf16 %v1969_v19, %v1968_v18 }
0x12a4   :  { %v1597_v22 = vpop.permute.xlu1 %1596 }
0x12a5   :  { %v1599_v24 = vmul.f32 %v1597_v22, %v1594_v21  ;;  %v1970_v21 = vld [vmem:[%s4448_s8 + $0x30] sm:$0xff]  ;;  %v1971_v22 = vld [vmem:[%s4448_s8 + $0x38] sm:$0xff] }
0x12a7   :  { %v1601_v25 = vadd.f32 %v1600_v23, %v1599_v24  ;;  %v3427_v23 = vpack.c.bf16 %v1971_v22, %v1970_v21  ;;  %v2319_v24 = vld [vmem:[#allocation13] sm:$0xff]  ;;  %v2467_v21 = vld [vmem:[%s4452_s12] sm:$0xff]  ;;  %v2468_v22 = vld [vmem:[%s4452_s12 + $0x8] sm:$0xff] }
0x12a9   :  { %1603 = vrot.lane.b32.xlu0 %v1601_v25, %s3761_s17  ;;  %v2320_v25 = vld [vmem:[#allocation13 + $0x8] sm:$0xff] }
0x12aa   :  { %v3447_v26 = vpack.c.bf16 %v2320_v25, %v2319_v24 }
0x12ab   :  { %v1711_v31 = vpop.permute.xlu1 %1710 }
0x12ac   :  { %v1713_v35 = vmul.f32 %v1711_v31, %v1708_v33 }
0x12ad   :  { %1714 = vrot.lane.b32.xlu0 %v1609_v17, %s3760_s3 }
0x131b   :  { %v1604_v30 = vpop.permute.xlu0 %1603 }
0x131c   :  { %1606 = vst.msk [vmem:[#allocation2 + $0x8] sm:$0xff] %vm282_vm0, %v1604_v30  ;;  %1608 = vst.msk [vmem:[#allocation4 + $0x20] sm:$0xff] %vm282_vm0, %v1604_v30 }
0x131f   :  { %v1715_v34 = vpop.permute.xlu0 %1714 }
0x1320   :  { %v1717_v37 = vmul.f32 %v3541_v10, %v1715_v34 }
0x1322   :  { %v1718_v38 = vadd.f32 %v1717_v37, %v1713_v35 }
0x1323   :  { %v1724_v39 = vld [vmem:[#allocation2 + $0x8] sm:$0xff] }
0x1324   :  { %1726 = vrot.lane.b32.xlu0 %v1724_v39, %s3760_s3  ;;  %1720 = vrot.lane.b32.xlu1 %v1718_v38, %s3761_s17  ;;  %v2321_v38 = vld [vmem:[#allocation13 + $0x10] sm:$0xff]  ;;  %v2322_v39 = vld [vmem:[#allocation13 + $0x18] sm:$0xff] }
0x1396   :  { %v1721_v40 = vpop.permute.xlu1 %1720  ;;  %v1727_v41 = vpop.permute.xlu0 %1726 }
0x1397   :  { %1723 = vst.msk [vmem:[#allocation2] sm:$0xff] %vm282_vm0, %v1721_v40  ;;  %v1729_v42 = vsel %vm282_vm0, %v1721_v40, %v1727_v41 }
0x1398   :  { %3189 = vmatmul.mubr.msk.f32.vlgmr.msra.gmra.mrb[16].mxu1 %vm568_vm4, %v1729_v42  ;;  %v3451_v42 = vpack.c.bf16 %v2322_v39, %v2321_v38  ;;  %v2469_v38 = vld [vmem:[%s4452_s12 + $0x10] sm:$0xff]  ;;  %v2470_v39 = vld [vmem:[%s4452_s12 + $0x18] sm:$0xff] }
0x1399   :  { %3431 = vmatpush3.bf16.msra.mxu1 %v4177_v45  ;;  %3229 = vmatprep.mubr.msk.f32.mxu1 %vm3758_vm2, %v3756_v0 }
0x139a   :  { %3432 = vmatprep.subr.bf16.mxu1 %v3757_v11 }
0x139d   :  { %3434 = vmatpush3.bf16.msra.mxu1 %v3415_v28 }
0x139e   :  { %v1843_v43 = vld [vmem:[#allocation2] sm:$0xff]  ;;  %3435 = vmatprep.subr.bf16.mxu1 %v3757_v11 }
0x139f   :  { %3200 = vmatmul.mubr.msk.f32.vlgmr.msra.gmra.mrb[22].mxu0 %vm282_vm0, %v1843_v43 }
0x13a0   :  { %3218 = vmatprep.mubr.msk.f32.mxu0 %vm3758_vm2, %v3756_v0  ;;  %3419 = vmatpush3.bf16.msra.mxu0 %v3418_v13 }
0x13a1   :  { %3420 = vmatprep.subr.bf16.mxu0 %v3757_v11 }
0x13a4   :  { %3422 = vmatpush3.bf16.msra.mxu0 %v3421_v16 }
0x13a5   :  { %3423 = vmatprep.subr.bf16.mxu0 %v3757_v11 }
0x13a8   :  { %3425 = vmatpush3.bf16.msra.mxu0 %v3424_v20 }
0x13a9   :  { %3426 = vmatprep.subr.bf16.mxu0 %v3757_v11 }
0x13ac   :  { %3428 = vmatpush3.bf16.msra.mxu0 %v3427_v23 }
0x13ad   :  { %3448 = vmatprep.subr.bf16.mxu0 %v3447_v26 }
0x146b   :  { %v1807_v44 = vpop.f32.mrb[16].mxu1 }
0x146c   :  { %v1808_v46 = vadd.f32 %v4062_v47, %v1807_v44  ;;  %v3190_v48 = vpop.f32.mrb[17].mxu1  ;;  %v2311_v44 = vld [vmem:[#allocation4] sm:$0xff] }
0x146d   :  { %v2312_v48 = vld [vmem:[#allocation4 + $0x8] sm:$0xff] }
0x146e   :  { %1818 = vrot.lane.b32.xlu1 %v1808_v46, %s3760_s3  ;;  %v2782_v52 = vmul.f32 -1.442695, %v1808_v46 }
0x1470   :  { %3546 = vpow2.f32 %v2782_v52 }
0x1472   :  { %v1919_v45 = vpop.f32.mrb[22].mxu0 }
0x1473   :  { %v1930_v49 = vadd.f32 %v1919_v45, %v3971_v50  ;;  %v3201_v51 = vpop.f32.mrb[23].mxu0  ;;  %v1923_v54 = vadd.f32 %v1919_v45, %v1845_v53  ;;  %v2313_v45 = vld [vmem:[#allocation4 + $0x10] sm:$0xff] }
0x1474   :  { %v2315_v51 = vld [vmem:[#allocation4 + $0x20] sm:$0xff] }
0x1475   :  { %1932 = vrot.lane.b32.xlu1 %v1930_v49, %s3759_s15  ;;  %v2784_v55 = vmul.f32 -1.442695, %v1923_v54  ;;  %v2314_v49 = vld [vmem:[#allocation4 + $0x18] sm:$0xff] }
0x1477   :  { %3548 = vpow2.f32 %v2784_v55 }
0x147a   :  { %v3547_v56 = vpop.eup %3546 }
0x147b   :  { %v1814_v57 = vadd.f32 1.0, %v3547_v56 }
0x147d   :  { %3550 = vrcp.f32 %v1814_v57 }
0x1481   :  { %v3549_v58 = vpop.eup %3548 }
0x1482   :  { %v1927_v17 = vadd.f32 1.0, %v3549_v58 }
0x1484   :  { %3552 = vrcp.f32 %v1927_v17 }
0x1487   :  { %v3551_v59 = vpop.eup %3550 }
0x1488   :  { %v1828_v4 = vsub.f32 1.0, %v3551_v59  ;;  %v1834_v10 = vmul.f32 %v3551_v59, %v1727_v41 }
0x148e   :  { %v3553_v61 = vpop.eup %3552 }
0x148f   :  { %v1942_v30 = vsub.f32 1.0, %v3553_v61 }
0x14e0   :  { %v1819_v27 = vpop.permute.xlu1 %1818 }
0x14e1   :  { %v1821_v60 = vmul.f32 %v3551_v59, %v1819_v27 }
0x14e3   :  { %1823 = vrot.lane.b32.xlu0 %v1821_v60, %s3759_s15 }
0x14e7   :  { %v1933_v62 = vpop.permute.xlu1 %1932 }
0x14e8   :  { %v1935_v29 = vmul.f32 %v3553_v61, %v1933_v62 }
0x14ea   :  { %1937 = vrot.lane.b32.xlu0 %v1935_v29, %s3759_s15 }
0x1555   :  { %v1824_v63 = vpop.permute.xlu0 %1823 }
0x1556   :  { %v1826_v32 = vadd.f32 %v1824_v63, %v1808_v46 }
0x1558   :  { %3554 = vtanh.f32 %v1826_v32 }
0x155c   :  { %v1938_v1 = vpop.permute.xlu0 %1937 }
0x155d   :  { %v1940_v2 = vadd.f32 %v1938_v1, %v1845_v53 }
0x155f   :  { %3556 = vtanh.f32 %v1940_v2 }
0x1562   :  { %v3555_v36 = vpop.eup %3554 }
0x1563   :  { %1830 = vrot.lane.b32.xlu1 %v3555_v36, %s3761_s17 }
0x1569   :  { %v3557_v3 = vpop.eup %3556 }
0x156a   :  { %1944 = vrot.lane.b32.xlu1 %v3557_v3, %s3761_s17 }
0x15d5   :  { %v1831_v5 = vpop.permute.xlu1 %1830 }
0x15d6   :  { %v1833_v12 = vmul.f32 %v1831_v5, %v1828_v4 }
0x15d8   :  { %v1835_v15 = vadd.f32 %v1834_v10, %v1833_v12 }
0x15da   :  { %1837 = vrot.lane.b32.xlu0 %v1835_v15, %s3761_s17 }
0x15dc   :  { %v1945_v28 = vpop.permute.xlu1 %1944 }
0x15dd   :  { %v1947_v33 = vmul.f32 %v1945_v28, %v1942_v30 }
0x15de   :  { %1948 = vrot.lane.b32.xlu0 %v1843_v43, %s3760_s3 }
0x164c   :  { %v1838_v9 = vpop.permute.xlu0 %1837 }
0x164d   :  { %1840 = vst.msk [vmem:[#allocation2 + $0x8] sm:$0xff] %vm282_vm0, %v1838_v9  ;;  %1842 = vst.msk [vmem:[#allocation4 + $0x28] sm:$0xff] %vm282_vm0, %v1838_v9 }
0x1650   :  { %v1949_v31 = vpop.permute.xlu0 %1948 }
0x1651   :  { %v1951_v34 = vmul.f32 %v3553_v61, %v1949_v31  ;;  %v2079_v61 = vld [vmem:[#allocation3 + $0x38] sm:$0xff] }
0x1653   :  { %v1952_v35 = vadd.f32 %v1951_v34, %v1947_v33 }
0x1654   :  { %v1958_v37 = vld [vmem:[#allocation2 + $0x8] sm:$0xff]  ;;  %v2316_v52 = vld [vmem:[#allocation4 + $0x28] sm:$0xff] }
0x1655   :  { %1960 = vrot.lane.b32.xlu0 %v1958_v37, %s3760_s3  ;;  %1954 = vrot.lane.b32.xlu1 %v1952_v35, %s3761_s17  ;;  %v4329_v35 = vld [vmem:[%s4451_s11] ss:$0 sm:$0xff] }
0x16c7   :  { %v1955_v40 = vpop.permute.xlu1 %1954  ;;  %v4272_v41 = vpop.permute.xlu0 %1960 }
0x16c8   :  { %1957 = vst.msk [vmem:[#allocation2] sm:$0xff] %vm282_vm0, %v1955_v40  ;;  %v1963_v43 = vsel %vm282_vm0, %v1955_v40, %v4272_v41 }
0x16c9   :  { %3219 = vmatmul.mubr.msk.f32.vlgmr.msra.gmra.mrb[24].mxu0 %vm568_vm4, %v1963_v43 }
0x16ca   :  { %3450 = vmatpush3.bf16.msra.mxu0 %v3447_v26  ;;  %3259 = vmatprep.mubr.msk.f32.mxu0 %vm282_vm0, %v2311_v44 }
0x16cb   :  { %3452 = vmatprep.subr.bf16.mxu0 %v3451_v42 }
0x16ce   :  { %3454 = vmatpush3.bf16.msra.mxu0 %v3451_v42  ;;  %v3459_v42 = vpack.c.bf16 %v2470_v39, %v2469_v38 }
0x16cf   :  { %v4279_v46 = vld [vmem:[#allocation2] sm:$0xff] }
0x16d0   :  { %3230 = vmatmul.mubr.msk.f32.vlgmr.msra.gmra.mrb[18].mxu1 %vm282_vm0, %v4279_v46 }
0x16d1   :  { %3260 = vmatmul.mubr.msk.f32.vlgmr.msra.gmra.mrb[26].mxu0 %vm282_vm0, %v2312_v48  ;;  %3437 = vmatpush3.bf16.msra.mxu1 %v3418_v13 }
0x16d2   :  { %3262 = vmatprep.mubr.msk.f32.mxu0 %vm282_vm0, %v2313_v45  ;;  %3438 = vmatprep.subr.bf16.mxu1 %v3757_v11 }
0x16d3   :  { %3248 = vmatprep.mubr.msk.f32.mxu1 %vm3758_vm2, %v3756_v0 }
0x16d5   :  { %3263 = vmatmul.mubr.msk.f32.gmra.mrb[28].mxu0 %vm282_vm0, %v2314_v49  ;;  %3440 = vmatpush3.bf16.msra.mxu1 %v3421_v16 }
0x16d6   :  { %3265 = vmatprep.mubr.msk.f32.mxu0 %vm282_vm0, %v2315_v51  ;;  %3441 = vmatprep.subr.bf16.mxu1 %v3757_v11 }
0x16d9   :  { %3266 = vmatmul.mubr.msk.f32.gmra.mrb[30].mxu0 %vm282_vm0, %v2316_v52  ;;  %3443 = vmatpush3.bf16.msra.mxu1 %v3424_v20 }
0x16da   :  { %3444 = vmatprep.subr.bf16.mxu1 %v3757_v11 }
0x16dd   :  { %3446 = vmatpush3.bf16.msra.mxu1 %v3427_v23  ;;  %v3455_v23 = vpack.c.bf16 %v2468_v22, %v2467_v21 }
0x16df   :  { %3456 = vmatprep.subr.bf16.mxu1 %v3455_v23 }
0x179c   :  { %v2041_v53 = vpop.f32.mrb[24].mxu0 }
0x179d   :  { %v2042_v54 = vadd.f32 %v4062_v47, %v2041_v53  ;;  %v3220_v0 = vpop.f32.mrb[25].mxu0 }
0x179f   :  { %2052 = vrot.lane.b32.xlu1 %v2042_v54, %s3760_s3  ;;  %v2786_v47 = vmul.f32 -1.442695, %v2042_v54 }
0x17a1   :  { %3558 = vpow2.f32 %v2786_v47 }
0x17a3   :  { %v2153_v55 = vpop.f32.mrb[18].mxu1 }
0x17a4   :  { %v2164_v56 = vadd.f32 %v2153_v55, %v3971_v50  ;;  %v4296_v57 = vpop.f32.mrb[26].mxu0  ;;  %v3231_v58 = vpop.f32.mrb[19].mxu1  ;;  %v2157_v62 = vadd.f32 %v2153_v55, %v2079_v61 }
0x17a5   :  { %v2420_v17 = vpop.f32.mrb[27].mxu0 }
0x17a6   :  { %2166 = vrot.lane.b32.xlu1 %v2164_v56, %s3759_s15  ;;  %v2788_v29 = vmul.f32 -1.442695, %v2157_v62  ;;  %v2421_v37 = vadd.f32 %v4329_v35, %v2420_v17 }
0x17a8   :  { %v4299_v59 = vpop.f32.mrb[28].mxu0  ;;  %3560 = vpow2.f32 %v2788_v29  ;;  %v2459_v43 = vmax.f32 %v2421_v37, 0.0 }
0x17a9   :  { %v4301_v27 = vpop.f32.mrb[29].mxu0  ;;  %v2436_v49 = vadd.f32 %v4299_v59, %v4329_v35 }
0x17aa   :  { %v2431_v48 = vadd.f32 %v4329_v35, %v4301_v27 }
0x17ab   :  { %v3559_v50 = vpop.eup %3558  ;;  %v2462_v53 = vmax.f32 %v2436_v49, 0.0 }
0x17ac   :  { %v4303_v11 = vpop.f32.mrb[30].mxu0  ;;  %v2048_v63 = vadd.f32 1.0, %v3559_v50  ;;  %v2461_v51 = vmax.f32 %v2431_v48, 0.0 }
0x17ad   :  { %v4305_v60 = vpop.f32.mrb[31].mxu0 }
0x17ae   :  { %3562 = vrcp.f32 %v2048_v63  ;;  %v2441_v52 = vadd.f32 %v4329_v35, %v4305_v60 }
0x17b0   :  { %v2463_v0 = vmax.f32 %v2441_v52, 0.0 }
0x17b2   :  { %v3561_v32 = vpop.eup %3560 }
0x17b3   :  { %v2161_v1 = vadd.f32 1.0, %v3561_v32 }
0x17b5   :  { %3564 = vrcp.f32 %v2161_v1 }
0x17b8   :  { %v3563_v2 = vpop.eup %3562 }
0x17b9   :  { %v2062_v15 = vsub.f32 1.0, %v3563_v2  ;;  %v2068_v18 = vmul.f32 %v3563_v2, %v4272_v41 }
0x17bf   :  { %v3565_v4 = vpop.eup %3564 }
0x17c0   :  { %v2176_v26 = vsub.f32 1.0, %v3565_v4 }
0x1811   :  { %v2053_v36 = vpop.permute.xlu1 %2052 }
0x1812   :  { %v2055_v3 = vmul.f32 %v3563_v2, %v2053_v36  ;;  %v3762_v2 = vmov 0  }
0x1813   :  { %3478 = vset.pattern.permute.xlu1 %v3762_v2  ;;  %3479 = vset.pattern.permute.xlu0 %v3762_v2 }
0x1814   :  { %2057 = vrot.lane.b32.xlu0 %v2055_v3, %s3759_s15 }
0x1818   :  { %v2167_v5 = vpop.permute.xlu1 %2166 }
0x1819   :  { %v2169_v6 = vmul.f32 %v3565_v4, %v2167_v5 }
0x181b   :  { %2171 = vrot.lane.b32.xlu0 %v2169_v6, %s3759_s15 }
0x1886   :  { %v2058_v7 = vpop.permute.xlu0 %2057 }
0x1887   :  { %v2060_v8 = vadd.f32 %v2058_v7, %v2042_v54  ;;  %v2446_v54 = vadd.f32 %v4303_v11, %v4329_v35 }
0x1889   :  { %3566 = vtanh.f32 %v2060_v8  ;;  %v2464_v55 = vmax.f32 %v2446_v54, 0.0 }
0x188d   :  { %v2172_v10 = vpop.permute.xlu0 %2171 }
0x188e   :  { %v2174_v12 = vadd.f32 %v2172_v10, %v2079_v61 }
0x1890   :  { %3568 = vtanh.f32 %v2174_v12  ;;  %v4388_v12 = vld [vmem:[%s4453_s13] ss:$0 sm:$0xff]  ;;  %s3763_s13 = smov [#allocation14]  }
0x1893   :  { %v3567_v13 = vpop.eup %3566 }
0x1894   :  { %2064 = vrot.lane.b32.xlu1 %v3567_v13, %s3761_s17 }
0x189a   :  { %v3569_v14 = vpop.eup %3568 }
0x189b   :  { %2178 = vrot.lane.b32.xlu1 %v3569_v14, %s3761_s17 }
0x1906   :  { %v2065_v16 = vpop.permute.xlu1 %2064 }
0x1907   :  { %v2067_v19 = vmul.f32 %v2065_v16, %v2062_v15 }
0x1909   :  { %v2069_v20 = vadd.f32 %v2068_v18, %v2067_v19 }
0x190b   :  { %2071 = vrot.lane.b32.xlu0 %v2069_v20, %s3761_s17 }
0x190d   :  { %v2179_v25 = vpop.permute.xlu1 %2178 }
0x190e   :  { %v2181_v28 = vmul.f32 %v2179_v25, %v2176_v26 }
0x190f   :  { %2182 = vrot.lane.b32.xlu0 %v4279_v46, %s3760_s3  ;;  %v2426_v46 = vadd.f32 %v4296_v57, %v4329_v35  ;;  %v3608_v57 = vld [vmem:[%s4449_s9] ss:$0 sm:$0xff] }
0x1911   :  { %v2460_v45 = vmax.f32 %v2426_v46, 0.0 }
0x197d   :  { %v2072_v24 = vpop.permute.xlu0 %2071 }
0x197e   :  { %2074 = vst.msk [vmem:[#allocation2 + $0x8] sm:$0xff] %vm282_vm0, %v2072_v24  ;;  %2076 = vst.msk [vmem:[#allocation4 + $0x30] sm:$0xff] %vm282_vm0, %v2072_v24 }
0x1981   :  { %v2183_v9 = vpop.permute.xlu0 %2182 }
0x1982   :  { %v2185_v30 = vmul.f32 %v3565_v4, %v2183_v9  ;;  %v4374_v4 = vld [vmem:[%s4440_s0] sm:$0xff] }
0x1983   :  { %vm2656_vm5 = vcmp.gt.s32.totalorder %v4374_v4, 0  ;;  %vm2658_vm6 = vcmp.gt.s32.totalorder %v4374_v4, 2  ;;  %vm2659_vm7 = vcmp.gt.s32.totalorder %v4374_v4, 3  ;;  %vm2661_vm8 = vcmp.gt.s32.totalorder %v4374_v4, 5 }
0x1984   :  { %v2186_v31 = vadd.f32 %v2185_v30, %v2181_v28  ;;  %v2664_v6 = vsel %vm2656_vm5, 1, %v3762_v2  ;;  %v2666_v7 = vsel %vm2658_vm6, 1, %v3762_v2  ;;  %v2667_v8 = vsel %vm2659_vm7, 1, %v3762_v2 }
0x1985   :  { %v2317_v33 = vld [vmem:[#allocation4 + $0x30] sm:$0xff]  ;;  %v2192_v34 = vld [vmem:[#allocation2 + $0x8] sm:$0xff]  ;;  %v2669_v10 = vsel %vm2661_vm8, 1, %v3762_v2  ;;  %vm2657_vm9 = vcmp.gt.s32.totalorder %v4374_v4, 1  ;;  %vm2660_vm10 = vcmp.gt.s32.totalorder %v4374_v4, 4  ;;  %vm2663_vm3 = vcmp.gt.s32.totalorder %v4374_v4, 7 }
0x1986   :  { %3268 = vmatprep.mubr.msk.f32.mxu0 %vm282_vm0, %v2317_v33  ;;  %2194 = vrot.lane.b32.xlu0 %v2192_v34, %s3760_s3  ;;  %v2668_v37 = vsel %vm2660_vm10, 1, %v3762_v2 }
0x1987   :  { %2188 = vrot.lane.b32.xlu1 %v2186_v31, %s3761_s17  ;;  %v2665_v31 = vsel %vm2657_vm9, 1, %v3762_v2 }
0x19f8   :  { %v4338_v40 = vpop.permute.xlu0 %2194 }
0x19f9   :  { %v2189_v41 = vpop.permute.xlu1 %2188 }
0x19fa   :  { %2191 = vst.msk [vmem:[#allocation2] sm:$0xff] %vm282_vm0, %v2189_v41  ;;  %v2197_v44 = vsel %vm282_vm0, %v2189_v41, %v4338_v40 }
0x19fb   :  { %3249 = vmatmul.mubr.msk.f32.vlgmr.msra.gmra.mrb[20].mxu1 %vm568_vm4, %v2197_v44  ;;  %vm2662_vm4 = vcmp.gt.s32.totalorder %v4374_v4, 6 }
0x19fc   :  { %3458 = vmatpush3.bf16.msra.mxu1 %v3455_v23  ;;  %3279 = vmatprep.mubr.msk.f32.mxu1 %vm282_vm0, %v2459_v43 }
0x19fd   :  { %3460 = vmatprep.subr.bf16.mxu1 %v3459_v42 }
0x1a00   :  { %3462 = vmatpush3.bf16.msra.mxu1 %v3459_v42 }
0x1a03   :  { %3280 = vmatmul.mubr.msk.f32.vlgmr.msra.gmra.mrb[22].mxu1 %vm282_vm0, %v2460_v45 }
0x1a04   :  { %3282 = vmatprep.mubr.msk.f32.mxu1 %vm282_vm0, %v2461_v51 }
0x1a07   :  { %3283 = vmatmul.mubr.msk.f32.gmra.mrb[24].mxu1 %vm282_vm0, %v2462_v53 }
0x1a08   :  { %3285 = vmatprep.mubr.msk.f32.mxu1 %vm282_vm0, %v2463_v0 }
0x1a0b   :  { %3286 = vmatmul.mubr.msk.f32.gmra.mrb[26].mxu1 %vm282_vm0, %v2464_v55 }
0x1ace   :  { %v2275_v56 = vpop.f32.mrb[20].mxu1 }
0x1acf   :  { %v2276_v58 = vadd.f32 %v3608_v57, %v2275_v56  ;;  %v3250_v17 = vpop.f32.mrb[21].mxu1 }
0x1ad1   :  { %2286 = vrot.lane.b32.xlu1 %v2276_v58, %s3760_s3  ;;  %v2790_v62 = vmul.f32 -1.442695, %v2276_v58 }
0x1ad3   :  { %3570 = vpow2.f32 %v2790_v62 }
0x1ad6   :  { %v4364_v59 = vpop.f32.mrb[22].mxu1 }
0x1ad7   :  { %v2568_v27 = vpop.f32.mrb[23].mxu1  ;;  %v2574_v0 = vadd.f32 %v4364_v59, %v4388_v12 }
0x1ad8   :  { %v2569_v13 = vadd.f32 %v4388_v12, %v2568_v27 }
0x1ad9   :  { %v2810_v55 = vmul.f32 -1.442695, %v2574_v0 }
0x1ada   :  { %v3284_v11 = vpop.f32.mrb[24].mxu1  ;;  %v2809_v14 = vmul.f32 -1.442695, %v2569_v13 }
0x1adb   :  { %v2578_v60 = vpop.f32.mrb[25].mxu1  ;;  %v2584_v16 = vadd.f32 %v3284_v11, %v4388_v12 }
0x1adc   :  { %v2579_v15 = vadd.f32 %v4388_v12, %v2578_v60 }
0x1add   :  { %v3571_v29 = vpop.eup %3570  ;;  %v2812_v19 = vmul.f32 -1.442695, %v2584_v16 }
0x1ade   :  { %v3287_v47 = vpop.f32.mrb[26].mxu1  ;;  %v2282_v50 = vadd.f32 1.0, %v3571_v29  ;;  %v2811_v18 = vmul.f32 -1.442695, %v2579_v15 }
0x1adf   :  { %v4366_v61 = vpop.f32.mrb[27].mxu1  ;;  %v2594_v20 = vadd.f32 %v3287_v47, %v4388_v12 }
0x1ae0   :  { %3572 = vrcp.f32 %v2282_v50  ;;  %v2589_v56 = vadd.f32 %v4388_v12, %v4366_v61 }
0x1ae1   :  { %v2814_v21 = vmul.f32 -1.442695, %v2594_v20 }
0x1ae2   :  { %v2813_v57 = vmul.f32 -1.442695, %v2589_v56 }
0x1aea   :  { %v3573_v63 = vpop.eup %3572 }
0x1aeb   :  { %v2296_v22 = vsub.f32 1.0, %v3573_v63  ;;  %v2302_v25 = vmul.f32 %v3573_v63, %v4338_v40 }
0x1b43   :  { %v2287_v32 = vpop.permute.xlu1 %2286 }
0x1b44   :  { %v2289_v1 = vmul.f32 %v3573_v63, %v2287_v32  ;;  %v2671_v32 = vsel %vm2663_vm3, 1, %v3762_v2 }
0x1b46   :  { %2291 = vrot.lane.b32.xlu0 %v2289_v1, %s3759_s15  ;;  %v2670_v1 = vsel %vm2662_vm4, 1, %v3762_v2 }
0x1bb8   :  { %v2292_v36 = vpop.permute.xlu0 %2291 }
0x1bb9   :  { %v2294_v3 = vadd.f32 %v2292_v36, %v2276_v58 }
0x1bbb   :  { %3574 = vtanh.f32 %v2294_v3 }
0x1bbc   :  { %3576 = vpow2.f32 %v2809_v14 }
0x1bbd   :  { %3578 = vpow2.f32 %v2811_v18 }
0x1bbe   :  { %3580 = vpow2.f32 %v2812_v19 }
0x1bbf   :  { %3582 = vpow2.f32 %v2814_v21 }
0x1bc5   :  { %v3575_v5 = vpop.eup %3574 }
0x1bc6   :  { %2298 = vrot.lane.b32.xlu1 %v3575_v5, %s3761_s17  ;;  %v3577_v24 = vpop.eup %3576 }
0x1bc7   :  { %v2631_v28 = vadd.f32 1.0, %v3577_v24  ;;  %v3579_v30 = vpop.eup %3578 }
0x1bc8   :  { %v2633_v33 = vadd.f32 1.0, %v3579_v30  ;;  %v3581_v34 = vpop.eup %3580 }
0x1bc9   :  { %3584 = vrcp.f32 %v2631_v28  ;;  %v2634_v38 = vadd.f32 1.0, %v3581_v34  ;;  %v3583_v39 = vpop.eup %3582 }
0x1bca   :  { %2673 = vperm.xlu1 %3478, %v2664_v6   ;;  %3586 = vrcp.f32 %v2633_v33  ;;  %v2636_v40 = vadd.f32 1.0, %v3583_v39 }
0x1bcb   :  { %3588 = vrcp.f32 %v2634_v38 }
0x1bcc   :  { %3590 = vrcp.f32 %v2636_v40 }
0x1bcd   :  { %3592 = vpow2.f32 %v2810_v55 }
0x1bce   :  { %2679 = vperm.xlu1 %3478, %v2666_v7   ;;  %3594 = vpow2.f32 %v2813_v57 }
0x1bd2   :  { %2682 = vperm.xlu1 %3478, %v2667_v8  }
0x1bd3   :  { %v3585_v42 = vpop.eup %3584 }
0x1bd4   :  { %v3587_v46 = vpop.eup %3586 }
0x1bd5   :  { %v3589_v49 = vpop.eup %3588 }
0x1bd6   :  { %2688 = vperm.xlu1 %3478, %v2669_v10   ;;  %v3591_v53 = vpop.eup %3590 }
0x1bd7   :  { %v3593_v17 = vpop.eup %3592 }
0x1bd8   :  { %v2632_v27 = vadd.f32 1.0, %v3593_v17  ;;  %v3595_v11 = vpop.eup %3594 }
0x1bd9   :  { %v2635_v60 = vadd.f32 1.0, %v3595_v11 }
0x1bda   :  { %3596 = vrcp.f32 %v2632_v27  ;;  %2694 = vperm.xlu1 %3478, %v2671_v32  }
0x1bdb   :  { %3598 = vrcp.f32 %v2635_v60 }
0x1be4   :  { %v3597_v62 = vpop.eup %3596 }
0x1be5   :  { %v3599_v50 = vpop.eup %3598 }
0x1c38   :  { %v2299_v23 = vpop.permute.xlu1 %2298 }
0x1c39   :  { %v2301_v26 = vmul.f32 %v2299_v23, %v2296_v22 }
0x1c3b   :  { %v2303_v9 = vadd.f32 %v2302_v25, %v2301_v26 }
0x1c3d   :  { %2305 = vrot.lane.b32.xlu0 %v2303_v9, %s3761_s17  ;;  %s2725_s17 = sshll.u32 %s3763_s13, 4  ;;  %s2726_s17 = int_to_ptr.vmem [resolvable:$true] %s2725_s17 }
0x1c3e   :  { %s3719_s6 = scalar_lea.vmem %s2726_s17, 1024  ;;  %p3724_p13 = scmp.lt.s32.totalorder %s2726_s17, %s2726_s17 }
0x1c3f   :  { %p3720_p12 = scmp.ne.s32.totalorder %s2726_s17, %s3719_s6  ;;  %p3725_p0 = scmp.lt.s32.totalorder %s3719_s6, %s3719_s6 }
0x1c41   :  { %2676 = vperm.xlu0 %3479, %v2665_v31   ;;  %p3726_p1 = por %p3725_p0, %p3724_p13 }
0x1c43   :  { %p3727_p2 = pnand %p3726_p1, %p3720_p12 }
0x1c45   :  { %2685 = vperm.xlu0 %3479, %v2668_v37  }
0x1c49   :  { %v2674_v41 = vpop.permute.xlu1 %2673  ;;  %2691 = vperm.xlu0 %3479, %v2670_v1  }
0x1c4a   :  { %vm2696_vm11 = vcmp.eq.s32.totalorder %v2674_v41, 1 }
0x1c4b   :  { %v2704_v43 = vsel %vm2696_vm11, %v3585_v42, 0.0 }
0x1c4c   :  { %2712 = vst.msk [vmem:[#allocation14] sm:$0xff] %vm133_vm1, %v2704_v43 }
0x1c4d   :  { %v2680_v44 = vpop.permute.xlu1 %2679 }
0x1c4e   :  { %vm2698_vm12 = vcmp.eq.s32.totalorder %v2680_v44, 1 }
0x1c4f   :  { %v2706_v48 = vsel %vm2698_vm12, %v3587_v46, 0.0 }
0x1c50   :  { %2714 = vst.msk [vmem:[#allocation14 + $0x10] sm:$0xff] %vm133_vm1, %v2706_v48 }
0x1c51   :  { %v2683_v45 = vpop.permute.xlu1 %2682 }
0x1c52   :  { %vm2699_vm13 = vcmp.eq.s32.totalorder %v2683_v45, 1 }
0x1c53   :  { %v2707_v51 = vsel %vm2699_vm13, %v3589_v49, 0.0 }
0x1c54   :  { %2715 = vst.msk [vmem:[#allocation14 + $0x18] sm:$0xff] %vm133_vm1, %v2707_v51 }
0x1c55   :  { %v2689_v52 = vpop.permute.xlu1 %2688 }
0x1c56   :  { %vm2701_vm14 = vcmp.eq.s32.totalorder %v2689_v52, 1 }
0x1c57   :  { %v2709_v54 = vsel %vm2701_vm14, %v3591_v53, 0.0 }
0x1c58   :  { %2717 = vst.msk [vmem:[#allocation14 + $0x28] sm:$0xff] %vm133_vm1, %v2709_v54 }
0x1c59   :  { %v2695_v20 = vpop.permute.xlu1 %2694 }
0x1caf   :  { %v2306_v58 = vpop.permute.xlu0 %2305 }
0x1cb0   :  { %2308 = vst.msk [vmem:[#allocation2 + $0x8] sm:$0xff] %vm282_vm0, %v2306_v58  ;;  %2310 = vst.msk [vmem:[#allocation4 + $0x38] sm:$0xff] %vm282_vm0, %v2306_v58 }
0x1cb7   :  { %v2318_v47 = vld [vmem:[#allocation4 + $0x38] sm:$0xff] }
0x1cb8   :  { %3269 = vmatmul.mubr.msk.f32.gmra.mrb[32].mxu0 %vm282_vm0, %v2318_v47 }
0x1cc0   :  { %v2677_v59 = vpop.permute.xlu0 %2676 }
0x1cc1   :  { %vm2697_vm15 = vcmp.eq.s32.totalorder %v2677_v59, 1 }
0x1cc2   :  { %v2705_v61 = vsel %vm2697_vm15, %v3597_v62, 0.0 }
0x1cc3   :  { %2713 = vst.msk [vmem:[#allocation14 + $0x8] sm:$0xff] %vm133_vm1, %v2705_v61 }
0x1cc4   :  { %v2686_v29 = vpop.permute.xlu0 %2685 }
0x1cc5   :  { %vm2700_vm2 = vcmp.eq.s32.totalorder %v2686_v29, 1 }
0x1cc6   :  { %v2708_v63 = vsel %vm2700_vm2, %v3599_v50, 0.0 }
0x1cc7   :  { %2716 = vst.msk [vmem:[#allocation14 + $0x20] sm:$0xff] %vm133_vm1, %v2708_v63 }
0x1cc8   :  { %v2692_v21 = vpop.permute.xlu0 %2691 }
0x1cc9   :  { %vm2702_vm5 = vcmp.eq.s32.totalorder %v2692_v21, 1 }
0x1d8b   :  { %v3270_v36 = vpop.f32.mrb[32].mxu0 }
0x1d8c   :  { %v2456_v3 = vadd.f32 %v3270_v36, %v4329_v35  ;;  %v2450_v5 = vpop.f32.mrb[33].mxu0 }
0x1d8d   :  { %v2451_v6 = vadd.f32 %v4329_v35, %v2450_v5 }
0x1d8e   :  { %v2466_v8 = vmax.f32 %v2456_v3, 0.0 }
0x1d8f   :  { %v2465_v7 = vmax.f32 %v2451_v6, 0.0 }
0x1d91   :  { %3288 = vmatprep.mubr.msk.f32.mxu1 %vm282_vm0, %v2465_v7 }
0x1d92   :  { %3289 = vmatmul.mubr.msk.f32.gmra.mrb[28].mxu1 %vm282_vm0, %v2466_v8  ;;  %vm2703_vm0 = vcmp.eq.s32.totalorder %v2695_v20, 1 }
0x1e65   :  { %v3290_v10 = vpop.f32.mrb[28].mxu1 }
0x1e66   :  { %v2604_v4 = vadd.f32 %v3290_v10, %v4388_v12  ;;  %v2598_v13 = vpop.f32.mrb[29].mxu1 }
0x1e67   :  { %v2599_v2 = vadd.f32 %v4388_v12, %v2598_v13 }
0x1e68   :  { %v2816_v14 = vmul.f32 -1.442695, %v2604_v4 }
0x1e69   :  { %v2815_v15 = vmul.f32 -1.442695, %v2599_v2 }
0x1e6a   :  { %3600 = vpow2.f32 %v2816_v14 }
0x1e6b   :  { %3602 = vpow2.f32 %v2815_v15 }
0x1e74   :  { %v3601_v16 = vpop.eup %3600 }
0x1e75   :  { %v3603_v18 = vpop.eup %3602  ;;  %v2638_v19 = vadd.f32 1.0, %v3601_v16 }
0x1e76   :  { %v2637_v35 = vadd.f32 1.0, %v3603_v18 }
0x1e77   :  { %3604 = vrcp.f32 %v2638_v19 }
0x1e78   :  { %3606 = vrcp.f32 %v2637_v35 }
0x1e81   :  { %v3605_v22 = vpop.eup %3604 }
0x1e82   :  { %v3607_v23 = vpop.eup %3606  ;;  %v2711_v24 = vsel %vm2703_vm0, %v3605_v22, 0.0 }
0x1e83   :  { %2719 = vst.msk [vmem:[#allocation14 + $0x38] sm:$0xff] %vm133_vm1, %v2711_v24  ;;  %v2710_v12 = vsel %vm2702_vm5, %v3607_v23, 0.0 }
0x1e84   :  { %2718 = vst.msk [vmem:[#allocation14 + $0x30] sm:$0xff] %vm133_vm1, %v2710_v12 }
0x1e85   :  { %3730 = shalt.err (!%p3727_p2)
}
0x1e86   :  { %s3731_s2 = scalar_lea.hbm %s4454_s14, 1024 }
0x1e87   :  { %p3732_p3 = scmp.ne.s32.totalorder %s4454_s14, %s3731_s2  ;;  %p3735_p4 = scmp.lt.u32.totalorder %s3731_s2, %s4454_s14 }
0x1e89   :  { %p3737_p5 = pnand %p3735_p4, %p3732_p3 }
0x1e8b   :  { %3740 = shalt.err (!%p3737_p5)
}
0x1e8c   :  { %2731 = dma.vmem_to_hbm [thread:$0]  %s2726_s17, 1024, %s4454_s14, [#allocation7], %s3751_s25, %s3751_s25, %s3752_s26  }
0x1e8d   :  { %3747 = dma.done.wait [#allocation7], 1024  }
0x1e8e   :  { %3748 = vsyncadd [#allocation7], 4294966272 }
0x1e8f   :  { %2735 = vsyncpa [#allocation6], 1 }
0x1e90   :  { %2736 = vsyncpa [#allocation9], 1 }
0x1e91   :  { %2737 = vsyncpa [#allocation12], 1 }
0x1e92   :  { %2738 = vsyncpa [#allocation7], 1 }

</bundles_post_ra>
